<compile_context>
chip_gen: v6e
topology: v6e:2x2x1
jax: 0.10.0
libtpu: 0.0.40
codegen_flags: <defaults>
</compile_context>

<pallas_src>
import functools

import numpy as np
import jax
import jax.numpy as jnp
from jax import lax
from jax.experimental import pallas as pl
from jax.experimental.pallas import tpu as pltpu


def _atomic_sin_mlp_kernel(x_ref, w0_ref, b0_ref, w1_ref, b1_ref,
                           w2_ref, b2_ref, o_ref, *, compute_dtype, precision):
    """Fused 3-layer MLP; atoms land on the LANE axis of every intermediate.

    x_ref  : (tile_m, D)  descriptor tile in natural (N, D) layout (no host x.T)
    w0_ref : (H1, D)      compute_dtype, PyTorch (out, in) layout
    b0_ref : (H1, 1)      f32
    w1_ref : (H2, H1)     compute_dtype
    b1_ref : (H2, 1)      f32
    w2_ref : (1, H2)      compute_dtype, final-layer weight as a row
    b2_ref : (1, 1)       f32 scalar bias in SMEM
    o_ref  : (1, tile_m)  lane-dense atomic-energy row
    """
    x = x_ref[...].astype(compute_dtype)

    # Layer 0 + sin.  Contract D (last axis of BOTH operands) so the transpose
    # happens on the MXU operand feed instead of as a separate HBM pass.
    h = lax.dot_general(w0_ref[...], x,
                        dimension_numbers=(((1,), (1,)), ((), ())),
                        precision=precision,
                        preferred_element_type=jnp.float32)
    h = jnp.sin(h + b0_ref[...])                              # (H1, tile_m)

    # Intermediate hidden layer + SiLU (default activation_type='silu').
    h = jnp.dot(w1_ref[...], h.astype(compute_dtype),
                precision=precision,
                preferred_element_type=jnp.float32) + b1_ref[...]
    # EUP-friendly SiLU: sigmoid(z) == 0.5*(tanh(z/2)+1) -> tanh uses the EUP
    # slot instead of a VALU divide chain.
    h = h * (0.5 * jnp.tanh(0.5 * h) + 0.5)                   # (H2, tile_m)

    # Final 1-output linear layer as a (1,H2)x(H2,tile_m) MXU matmul (the MXU
    # has plenty of slack); scalar bias comes from SMEM.
    out = jnp.dot(w2_ref[...], h.astype(compute_dtype),
                  precision=precision,
                  preferred_element_type=jnp.float32) + b2_ref[0, 0]
    o_ref[...] = out.astype(o_ref.dtype)


def _num_tensorcores():
    """TensorCores per chip (v7x: 2); best-effort query, defaults to 1."""
    try:
        info = pltpu.get_tpu_info()
        for attr in ("num_cores", "core_count", "num_tensorcores",
                     "tensorcore_count", "cores_per_chip"):
            v = getattr(info, attr, None)
            if isinstance(v, int) and v > 0:
                return v
    except Exception:
        pass
    return 1


def _choose_tile(n, num_cores=1, max_tile=16384, min_tile=512):
    """Lane tile: multiple of 128 (or the full extent for small n).

    Goals: large tiles to amortize the ~0.35us/step grid overhead, a step count
    that is a multiple of the TensorCore count (v7x balance), and >= 2 steps
    per core for DMA/compute pipeline depth.  Single-TC chips (v5e/v6e) just
    get the biggest tile that still leaves ~2 steps.
    """
    if n <= max(min_tile, 128):
        return n                                   # one full-extent block
    lane_groups = pl.cdiv(n, 128)
    steps = 2 * num_cores                          # pipeline depth + balance
    while pl.cdiv(lane_groups, steps) * 128 > max_tile:
        steps += num_cores
    tile = min(max_tile, pl.cdiv(lane_groups, steps) * 128)
    if tile < min_tile:                            # don't shatter small problems
        tile = pl.cdiv(lane_groups, num_cores) * 128
    return min(tile, max_tile)


def _vmem_budget(tile_m, d, h1, h2, in_itemsize):
    """Explicit scoped-VMEM budget with headroom (v7x default is only 32 MiB)."""
    x_bytes = 2 * tile_m * d * in_itemsize               # double-buffered input
    out_bytes = 2 * tile_m * 4
    w_bytes = 2 * ((h1 * d + h2 * h1 + h2) * 2 + (h1 + h2 + 1) * 4)
    tmp_bytes = 4 * tile_m * max(h1, h2) * 4              # in-kernel temporaries
    est = x_bytes + out_bytes + w_bytes + tmp_bytes + (4 << 20)
    return int(max(32 << 20, min(est, 56 << 20)))          # <= v7x physical 64 MiB


@functools.partial(jax.jit,
                   static_argnames=("tile_m", "compute_dtype", "atoms_last"))
def atomic_sin_subnetwork(x, params, *, tile_m=None,
                          compute_dtype=jnp.bfloat16, atoms_last=False):
    """x: (N, D) descriptor. params: PyTorch-layout (out, in) weights/biases."""
    N, D = x.shape
    w0 = params["w0"].astype(compute_dtype)                      # (H1, D)
    b0 = params["b0"].reshape(-1, 1).astype(jnp.float32)         # (H1, 1)
    w1 = params["w1"].astype(compute_dtype)                      # (H2, H1)
    b1 = params["b1"].reshape(-1, 1).astype(jnp.float32)         # (H2, 1)
    w2 = params["w2"].reshape(1, -1).astype(compute_dtype)       # (1, H2) row
    b2 = params["b2"].reshape(1, 1).astype(jnp.float32)          # SMEM scalar
    H1, H2 = w0.shape[0], w1.shape[0]

    if tile_m is None:
        tile_m = _choose_tile(N, num_cores=_num_tensorcores())

    grid = (pl.cdiv(N, tile_m),)
    invariant = lambda i: (0, 0)

    use_f32 = np.dtype(compute_dtype) == np.dtype(jnp.float32)
    precision = lax.Precision.HIGHEST if use_f32 else lax.Precision.DEFAULT
    kernel = functools.partial(_atomic_sin_mlp_kernel,
                               compute_dtype=compute_dtype, precision=precision)

    itemsize = x.dtype.itemsize
    cost = pl.CostEstimate(
        flops=2 * N * (D * H1 + H1 * H2 + H2),
        transcendentals=N * (H1 + H2),                 # sin + tanh(SiLU)
        bytes_accessed=N * D * itemsize + N * 4
        + (H1 * D + H2 * H1 + H2) * w0.dtype.itemsize + (H1 + H2 + 1) * 4)

    out_row = pl.pallas_call(
        kernel,
        out_shape=jax.ShapeDtypeStruct((1, N), x.dtype),
        grid_spec=pltpu.PrefetchScalarGridSpec(
            num_scalar_prefetch=0,
            grid=grid,
            in_specs=[
                pl.BlockSpec((tile_m, D), lambda i: (i, 0)),        # x tile (no x.T)
                pl.BlockSpec((H1, D), invariant),                   # W0 (resident)
                pl.BlockSpec((H1, 1), invariant),                   # b0
                pl.BlockSpec((H2, H1), invariant),                  # W1
                pl.BlockSpec((H2, 1), invariant),                   # b1
                pl.BlockSpec((1, H2), invariant),                   # w2 row
                pl.BlockSpec(memory_space=pltpu.MemorySpace.SMEM),  # b2 scalar
            ],
            out_specs=pl.BlockSpec((1, tile_m), lambda i: (0, i)),
        ),
        compiler_params=pltpu.CompilerParams(
            dimension_semantics=("parallel",),
            vmem_limit_bytes=_vmem_budget(tile_m, D, H1, H2, itemsize)),
        cost_estimate=cost,
    )(x, w0, b0, w1, b1, w2, b2)

    if atoms_last:
        return out_row                      # (1, N) lane-major: no relayout copy
    return out_row.reshape(N, 1)            # PyTorch module shape (N, 1)


# ----------------------------- test utilities ------------------------------

def init_params(key, input_size, hidden_layer_size):
    """nn.Linear-style U(-1/sqrt(fan_in), 1/sqrt(fan_in)), PyTorch (out,in) layout."""
    sizes = [input_size] + list(hidden_layer_size) + [1]
    assert len(sizes) == 4, "fused kernel implements 2 hidden layers + output"
    params = {}
    for idx in range(3):
        fan_in, fan_out = sizes[idx], sizes[idx + 1]
        key, kw, kb = jax.random.split(key, 3)
        bound = 1.0 / jnp.sqrt(fan_in)
        params[f"w{idx}"] = jax.random.uniform(
            kw, (fan_out, fan_in), jnp.float32, -bound, bound)
        params[f"b{idx}"] = jax.random.uniform(
            kb, (fan_out,), jnp.float32, -bound, bound)
    return params


def _silu(x):
    return x * jax.nn.sigmoid(x)


def reference_forward_f32(x, params):
    """Pure-f32 reference of AtomicSinSubNetwork.forward (HIGHEST precision)."""
    hi = lax.Precision.HIGHEST
    h = jnp.sin(jnp.dot(x, params["w0"].T, precision=hi) + params["b0"])
    h = _silu(jnp.dot(h, params["w1"].T, precision=hi) + params["b1"])
    return jnp.dot(h, params["w2"].T, precision=hi) + params["b2"]


def reference_forward_quantized(x, params, compute_dtype=jnp.bfloat16):
    """Reference applying the same bf16 operand quantization as the kernel."""
    c = lambda a: a.astype(compute_dtype)
    h = jnp.dot(c(x), c(params["w0"]).T,
                preferred_element_type=jnp.float32) + params["b0"]
    h = jnp.sin(h)
    h = jnp.dot(c(h), c(params["w1"]).T,
                preferred_element_type=jnp.float32) + params["b1"]
    h = h * (0.5 * jnp.tanh(0.5 * h) + 0.5)
    return jnp.dot(c(h), c(params["w2"]).T,
                   preferred_element_type=jnp.float32) + params["b2"]


if __name__ == "__main__":
    key = jax.random.PRNGKey(0)
    input_size = 32
    hidden_layer_size = [32, 32]          # -> layer sizes [32, 32, 32, 1]
    N = 1024                              # atoms; auto tile -> multi-step grid

    key, kx = jax.random.split(key)
    x = jax.random.normal(kx, (N, input_size), jnp.float32)
    params = init_params(key, input_size, hidden_layer_size)

    # Default (bf16 MXU operand) path.
    out = jax.block_until_ready(atomic_sin_subnetwork(x, params))
    assert out.shape == (N, 1), out.shape
    ref32 = reference_forward_f32(x, params)
    refq = reference_forward_quantized(x, params)
    assert jnp.allclose(out, ref32, atol=1e-1, rtol=1e-1), "mismatch vs f32 reference"
    assert jnp.allclose(out, refq, atol=1e-2, rtol=1e-2), "mismatch vs bf16 reference"

    # Ragged case: N not a multiple of the lane tile (partial edge block).
    # Padded lanes in the edge block may hold garbage but stores are masked.
    N2 = 200
    key, kx2 = jax.random.split(key)
    x2 = jax.random.normal(kx2, (N2, input_size), jnp.float32)
    out2 = jax.block_until_ready(atomic_sin_subnetwork(x2, params, tile_m=128))
    assert out2.shape == (N2, 1), out2.shape
    assert jnp.allclose(out2, reference_forward_quantized(x2, params),
                        atol=1e-2, rtol=1e-2), "ragged mismatch"

    # Strict-accuracy path: f32 operands with pinned HIGHEST precision.
    out3 = jax.block_until_ready(
        atomic_sin_subnetwork(x, params, compute_dtype=jnp.float32))
    assert jnp.allclose(out3, ref32, atol=1e-4, rtol=1e-4), "f32 path mismatch"

    print("KERNEL_OK")
</pallas_src>

<mosaic_0001>
module attributes {stable_mosaic.version = 11 : i64} {
  func.func @_atomic_sin_mlp_kernel(%arg0: i32, %arg1: memref<512x32xf32, #tpu.memory_space<vmem>>, %arg2: memref<32x32xbf16, #tpu.memory_space<vmem>>, %arg3: memref<32x1xf32, #tpu.memory_space<vmem>>, %arg4: memref<32x32xbf16, #tpu.memory_space<vmem>>, %arg5: memref<32x1xf32, #tpu.memory_space<vmem>>, %arg6: memref<1x32xbf16, #tpu.memory_space<vmem>>, %arg7: memref<1x1xf32, #tpu.memory_space<smem>>, %arg8: memref<1x512xf32, #tpu.memory_space<vmem>>) attributes {dimension_semantics = [#tpu.dimension_semantics<parallel>], iteration_bounds = array<i64: 2>, scalar_prefetch = 0 : i64, scratch_operands = 0 : i64, tpu.core_type = #tpu.core_type<tc>, window_params = [{transform_indices = @transform_0, window_bounds = array<i64: 512, 32>}, {pipeline_mode = #tpu.pipeline_mode<synchronous>, transform_indices = @transform_1, window_bounds = array<i64: 32, 32>}, {pipeline_mode = #tpu.pipeline_mode<synchronous>, transform_indices = @transform_2, window_bounds = array<i64: 32, 1>}, {pipeline_mode = #tpu.pipeline_mode<synchronous>, transform_indices = @transform_3, window_bounds = array<i64: 32, 32>}, {pipeline_mode = #tpu.pipeline_mode<synchronous>, transform_indices = @transform_4, window_bounds = array<i64: 32, 1>}, {pipeline_mode = #tpu.pipeline_mode<synchronous>, transform_indices = @transform_5, window_bounds = array<i64: 1, 32>}, {transform_indices = @transform_6, window_bounds = array<i64: 1, 1>}, {transform_indices = @transform_7, window_bounds = array<i64: 1, 512>}]} {
    %c0 = arith.constant 0 : index
    %c0_0 = arith.constant 0 : index
    %0 = vector.load %arg1[%c0, %c0_0] : memref<512x32xf32, #tpu.memory_space<vmem>>, vector<512x32xf32>
    %1 = arith.truncf %0 : vector<512x32xf32> to vector<512x32xbf16>
    %c0_1 = arith.constant 0 : index
    %c0_2 = arith.constant 0 : index
    %2 = vector.load %arg2[%c0_1, %c0_2] : memref<32x32xbf16, #tpu.memory_space<vmem>>, vector<32x32xbf16>
    %cst = arith.constant dense<0.000000e+00> : vector<32x512xf32>
    %3 = tpu.matmul %2, %1, %cst {dimension_numbers = #tpu.dot_dimension_numbers<[1], [1], [0], [0], [0, 0, 1, 0], [], []>} : vector<32x32xbf16>, vector<512x32xbf16>, vector<32x512xf32> -> vector<32x512xf32>
    %c0_3 = arith.constant 0 : index
    %c0_4 = arith.constant 0 : index
    %4 = vector.load %arg3[%c0_3, %c0_4] : memref<32x1xf32, #tpu.memory_space<vmem>>, vector<32x1xf32>
    %5 = vector.broadcast %4 : vector<32x1xf32> to vector<32x512xf32>
    %6 = arith.addf %3, %5 : vector<32x512xf32>
    %7 = math.sin %6 : vector<32x512xf32>
    %c0_5 = arith.constant 0 : index
    %c0_6 = arith.constant 0 : index
    %8 = vector.load %arg4[%c0_5, %c0_6] : memref<32x32xbf16, #tpu.memory_space<vmem>>, vector<32x32xbf16>
    %9 = arith.truncf %7 : vector<32x512xf32> to vector<32x512xbf16>
    %cst_7 = arith.constant dense<0.000000e+00> : vector<32x512xf32>
    %10 = tpu.matmul %8, %9, %cst_7 {dimension_numbers = #tpu.dot_dimension_numbers<[1], [0], [0], [1], [0, 0, 1, 1], [], []>} : vector<32x32xbf16>, vector<32x512xbf16>, vector<32x512xf32> -> vector<32x512xf32>
    %c0_8 = arith.constant 0 : index
    %c0_9 = arith.constant 0 : index
    %11 = vector.load %arg5[%c0_8, %c0_9] : memref<32x1xf32, #tpu.memory_space<vmem>>, vector<32x1xf32>
    %12 = vector.broadcast %11 : vector<32x1xf32> to vector<32x512xf32>
    %13 = arith.addf %10, %12 : vector<32x512xf32>
    %cst_10 = arith.constant 5.000000e-01 : f32
    %14 = vector.broadcast %cst_10 : f32 to vector<32x512xf32>
    %15 = arith.mulf %14, %13 : vector<32x512xf32>
    %16 = math.tanh %15 : vector<32x512xf32>
    %cst_11 = arith.constant 5.000000e-01 : f32
    %17 = vector.broadcast %cst_11 : f32 to vector<32x512xf32>
    %18 = arith.mulf %17, %16 : vector<32x512xf32>
    %cst_12 = arith.constant 5.000000e-01 : f32
    %19 = vector.broadcast %cst_12 : f32 to vector<32x512xf32>
    %20 = arith.addf %18, %19 : vector<32x512xf32>
    %21 = arith.mulf %13, %20 : vector<32x512xf32>
    %c0_13 = arith.constant 0 : index
    %c0_14 = arith.constant 0 : index
    %22 = vector.load %arg6[%c0_13, %c0_14] : memref<1x32xbf16, #tpu.memory_space<vmem>>, vector<1x32xbf16>
    %23 = arith.truncf %21 : vector<32x512xf32> to vector<32x512xbf16>
    %cst_15 = arith.constant dense<0.000000e+00> : vector<1x512xf32>
    %24 = tpu.matmul %22, %23, %cst_15 {dimension_numbers = #tpu.dot_dimension_numbers<[1], [0], [0], [1], [0, 0, 1, 1], [], []>} : vector<1x32xbf16>, vector<32x512xbf16>, vector<1x512xf32> -> vector<1x512xf32>
    %c0_16 = arith.constant 0 : index
    %c0_17 = arith.constant 0 : index
    %25 = memref.load %arg7[%c0_16, %c0_17] : memref<1x1xf32, #tpu.memory_space<smem>>
    %26 = vector.broadcast %25 : f32 to vector<1x512xf32>
    %27 = arith.addf %24, %26 : vector<1x512xf32>
    %c0_18 = arith.constant 0 : index
    %c0_19 = arith.constant 0 : index
    %28 = vector.load %arg8[%c0_18, %c0_19] : memref<1x512xf32, #tpu.memory_space<vmem>>, vector<1x512xf32>
    tpu.vector_store %arg8[%c0_18, %c0_19], %27 {strides = array<i32>} : memref<1x512xf32, #tpu.memory_space<vmem>>, vector<1x512xf32>,
    return
  }
  func.func @transform_0(%arg0: i32) -> (i32, i32) {
    %c0_i32 = arith.constant 0 : i32
    %c0_i32_0 = arith.constant 0 : i32
    return %arg0, %c0_i32 : i32, i32
  }
  func.func @transform_1(%arg0: i32) -> (i32, i32) {
    %c0_i32 = arith.constant 0 : i32
    %c0_i32_0 = arith.constant 0 : i32
    %c0_i32_1 = arith.constant 0 : i32
    return %c0_i32, %c0_i32_0 : i32, i32
  }
  func.func @transform_2(%arg0: i32) -> (i32, i32) {
    %c0_i32 = arith.constant 0 : i32
    %c0_i32_0 = arith.constant 0 : i32
    %c0_i32_1 = arith.constant 0 : i32
    return %c0_i32, %c0_i32_0 : i32, i32
  }
  func.func @transform_3(%arg0: i32) -> (i32, i32) {
    %c0_i32 = arith.constant 0 : i32
    %c0_i32_0 = arith.constant 0 : i32
    %c0_i32_1 = arith.constant 0 : i32
    return %c0_i32, %c0_i32_0 : i32, i32
  }
  func.func @transform_4(%arg0: i32) -> (i32, i32) {
    %c0_i32 = arith.constant 0 : i32
    %c0_i32_0 = arith.constant 0 : i32
    %c0_i32_1 = arith.constant 0 : i32
    return %c0_i32, %c0_i32_0 : i32, i32
  }
  func.func @transform_5(%arg0: i32) -> (i32, i32) {
    %c0_i32 = arith.constant 0 : i32
    %c0_i32_0 = arith.constant 0 : i32
    %c0_i32_1 = arith.constant 0 : i32
    return %c0_i32, %c0_i32_0 : i32, i32
  }
  func.func @transform_6(%arg0: i32) -> (i32, i32) {
    %c0_i32 = arith.constant 0 : i32
    %c0_i32_0 = arith.constant 0 : i32
    %c0_i32_1 = arith.constant 0 : i32
    return %c0_i32, %c0_i32_0 : i32, i32
  }
  func.func @transform_7(%arg0: i32) -> (i32, i32) {
    %c0_i32 = arith.constant 0 : i32
    %c0_i32_0 = arith.constant 0 : i32
    return %c0_i32, %arg0 : i32, i32
  }
}

</mosaic_0001>

<bundles_post_ra>
// kernel: atomic_sin_subnetwork.1
= control target key start
LH: loop header
LB: loop body
LE: loop exit
PB: predicated region body
PF: predicated region fallthrough
CT: control target
= control target key end

     0   :  { %s5093_s0 = inlined_call_operand.vmem [shape: f32[1024,32], index: 0, kind: input, shape index: {}]   ;;  %s5094_s1 = inlined_call_operand.vmem [shape: bf16[32,32], index: 1, kind: input, shape index: {}]   ;;  %s5095_s2 = inlined_call_operand.vmem [shape: f32[32,1], index: 2, kind: input, shape index: {}]   ;;  %s5096_s3 = inlined_call_operand.vmem [shape: bf16[32,32], index: 3, kind: input, shape index: {}]   ;;  %s5097_s4 = inlined_call_operand.vmem [shape: f32[32,1], index: 4, kind: input, shape index: {}]   ;;  %s5098_s5 = inlined_call_operand.vmem [shape: bf16[1,32], index: 5, kind: input, shape index: {}]   ;;  %s5099_s6 = inlined_call_operand.<no memory space> [shape: f32[1,1], index: 6, kind: input, shape index: {}]   ;;  %s5100_s7 = inlined_call_operand.hbm [shape: f32[1,1024], index: 7, kind: output, shape index: {}]  }
   0x1   :  { %12 = sst [smem:[#allocation2]] %s5099_s6 }
   0x2   :  { %13 = vsyncpa [#allocation4], 0 }
   0x3   :  { %15 = vsyncpa [#allocation4 + $0x1], 0  ;;  %s3205_s26 = smov 0   ;;  %s3207_s27 = smov 0  }
   0x4   :  { %s3209_s28 = smov 0   ;;  %s3211_s29 = smov 0  }
   0x5 LB: > { %s2730_s6 = sadd.s32 4294967295, %s3151_s29   ;;  %s2731_s30 = sadd.s32 4294967294, %s3151_s29   ;;  %s3151_s29 = sphi %s3211_s29, %s5308_s29   ;;  %s3147_s28 = sphi %s3209_s28, %s5307_s28   ;;  %s3143_s27 = sphi %s3207_s27, %s5306_s27   ;;  %s3139_s26 = sphi %s3205_s26, %s5305_s26  }
   0x6   : > { %s3228_s8 = sadd.s32 1, %s3151_s29   ;;  %s180_s9 = sadd.s32 1, %s3147_s28 }
   0x7   : > { %s177_s10 = ssub.s32 %s3151_s29, %s3228_s8  ;;  %p190_p0 = scmp.ne.s32.totalorder %s3147_s28, %s3143_s27 }
   0x8   : > { %p178_p1 = scmp.eq.s32.totalorder %s177_s10, 0  ;;  %p191_p2 = scmp.eq.s32.totalorder %s2730_s6, 1 }
   0x9   : > { %p196_p3 = scmp.ne.s32.totalorder %s3143_s27, %s3139_s26  ;;  %p197_p4 = scmp.eq.s32.totalorder %s2731_s30, 1 }
   0xa   : > { %s3238_s11 = scalar_select %p178_p1, %s3147_s28, %s180_s9  }
   0xb   : > { %p3240_p5 = por %p191_p2, %p190_p0  ;;  %p3244_p6 = por %p197_p4, %p196_p3 }
   0xc   : > { %p2734_p7 = scmp.ge.s32.totalorder %s3151_s29, 1  ;;  %p242_p8 = scmp.lt.s32.totalorder %s3151_s29, 3 }
   0xe   : > { %p243_p9 = pnand %p2734_p7, %p242_p8 }
  0x10   : > { %246 = sbr.rel (%p243_p9) target bundleno = 1168 (0x490), region = 48 }
  0x15   : > { %s3250_s14 = sshll.u32 %s2730_s6, 6  ;;  %v3256_v0 = vld [vmem:[%s5094_s1] sm:$0xff]   ;;  %vm5151_vm0 = vcmask 261120   ;;  %v384_v1 = vld [vmem:[%s5095_s2 + $0x10] sm:$0xff]  ;;  %v5101_v3 = vmov 0   ;;  %v385_v4 = vld [vmem:[%s5095_s2 + $0x18] sm:$0xff] }
  0x16   : > { %p275_p10 = scmp.lt.s32.totalorder %s3250_s14, 127  ;;  %v382_v2 = vld [vmem:[%s5095_s2] sm:$0xff]  ;;  %2838 = vmatprep.mubr.msk.bf16.mxu0 %vm5151_vm0, %v3256_v0  ;;  %2858 = vmatprep.mubr.msk.bf16.mxu1 %vm5151_vm0, %v3256_v0  ;;  %v383_v5 = vld [vmem:[%s5095_s2 + $0x8] sm:$0xff]  ;;  %v2303_v18 = vld [vmem:[%s5097_s4 + $0x10] sm:$0xff]  ;;  %s2536_s16 = sld [smem:[#allocation2]] }
  0x17   : > { %2989 = vset.pattern.permute.xlu0 %v5101_v3  ;;  %2990 = vset.pattern.permute.xlu1 %v5101_v3  ;;  %v2304_v31 = vld [vmem:[%s5097_s4 + $0x18] sm:$0xff]  ;;  %v2301_v38 = vld [vmem:[%s5097_s4] sm:$0xff]  ;;  %v2302_v39 = vld [vmem:[%s5097_s4 + $0x8] sm:$0xff]  ;;  %s271_s17 = sand.u32 1, %s3143_s27   ;;  %s2670_s23 = scalar_lea.hbm %s5100_s7, %s3250_s14 }
  0x18   : > { %s276_s21 = scalar_select %p275_p10, %s3250_s14, 127  ;;  %398 = vperm.xlu0 %2989, %v384_v1   ;;  %388 = vperm.xlu1 %2990, %v382_v2  }
  0x19   : > { %s2735_s18 = sshll.u32 %s271_s17, 2  ;;  %s2658_s24 = scalar_lea.sflag [#allocation4], %s271_s17 }
  0x1a   : > { %s2737_s22 = sshll.u32 %s276_s21, 3  ;;  %s273_s19 = scalar_lea.vmem [#allocation3], %s2735_s18 }
  0x1b   : > { %s3277_s30 = scalar_lea.vmem %s5093_s0, %s2737_s22  ;;  %s2672_s20 = sshll.u32 %s273_s19, 4  ;;  %s2673_s20 = int_to_ptr.vmem [resolvable:$true] %s2672_s20 }
  0x1c   : > { %v312_v6 = vld [vmem:[%s3277_s30 + $0xf0] sm:$0xff]  ;;  %v313_v7 = vld [vmem:[%s3277_s30 + $0xf8] sm:$0xff]  ;;  %v310_v17 = vld [vmem:[%s3277_s30 + $0xe0] sm:$0xff]  ;;  %403 = vperm.xlu0 %2989, %v385_v4   ;;  %393 = vperm.xlu1 %2990, %v383_v5   ;;  %s3091_s25 = scalar_lea.vmem %s2673_s20, 64  ;;  %s3161_s6 = smov [#allocation3]  }
  0x1d   : > { %v344_v8 = vld [vmem:[%s3277_s30 + $0x1f0] sm:$0xff]  ;;  %v361_v9 = vpack.c.bf16 %v313_v7, %v312_v6  ;;  %v345_v10 = vld [vmem:[%s3277_s30 + $0x1f8] sm:$0xff]  ;;  %v311_v20 = vld [vmem:[%s3277_s30 + $0xe8] sm:$0xff]  ;;  %p3092_p11 = scmp.ne.s32.totalorder %s2673_s20, %s3091_s25 }
  0x1e   : > { %v296_v11 = vld [vmem:[%s3277_s30 + $0x70] sm:$0xff]  ;;  %v297_v12 = vld [vmem:[%s3277_s30 + $0x78] sm:$0xff]  ;;  %v377_v13 = vpack.c.bf16 %v345_v10, %v344_v8  ;;  %v342_v21 = vld [vmem:[%s3277_s30 + $0x1e0] sm:$0xff]  ;;  %v360_v24 = vpack.c.bf16 %v311_v20, %v310_v17 }
  0x1f   : > { %v353_v14 = vpack.c.bf16 %v297_v12, %v296_v11  ;;  %v328_v15 = vld [vmem:[%s3277_s30 + $0x170] sm:$0xff]  ;;  %v329_v16 = vld [vmem:[%s3277_s30 + $0x178] sm:$0xff]  ;;  %2862 = vmatprep.subr.msk.bf16.mxu0 %vm5151_vm0, %v361_v9  ;;  %v343_v22 = vld [vmem:[%s3277_s30 + $0x1e8] sm:$0xff]  ;;  %p3093_p12 = pnand %p3092_p11, %p3240_p5 }
  0x20   : > { %v369_v19 = vpack.c.bf16 %v329_v16, %v328_v15  ;;  %2870 = vmatprep.subr.msk.bf16.mxu1 %vm5151_vm0, %v377_v13  ;;  %v376_v25 = vpack.c.bf16 %v343_v22, %v342_v21  ;;  %v294_v26 = vld [vmem:[%s3277_s30 + $0x60] sm:$0xff]  ;;  %v295_v27 = vld [vmem:[%s3277_s30 + $0x68] sm:$0xff]  ;;  %v308_v34 = vld [vmem:[%s3277_s30 + $0xd0] sm:$0xff]  ;;  %2317 = vperm.xlu0 %2989, %v2303_v18  }
  0x21   : > { %v445_v23 = vsel %vm5151_vm0, %v353_v14, 0  ;;  %v326_v28 = vld [vmem:[%s3277_s30 + $0x160] sm:$0xff]  ;;  %v327_v30 = vld [vmem:[%s3277_s30 + $0x168] sm:$0xff]  ;;  %v352_v32 = vpack.c.bf16 %v295_v27, %v294_v26  ;;  %v309_v35 = vld [vmem:[%s3277_s30 + $0xd8] sm:$0xff]  ;;  %2322 = vperm.xlu1 %2990, %v2304_v31   ;;  %p3094_p13 = pneg %p3093_p12 }
  0x22   : > { %2823 = vmatpush3.bf16.xpose.msra.mxu0 %v445_v23  ;;  %v493_v29 = vsel %vm5151_vm0, %v369_v19, 0  ;;  %v368_v33 = vpack.c.bf16 %v327_v30, %v326_v28  ;;  %v340_v36 = vld [vmem:[%s3277_s30 + $0x1d0] sm:$0xff]  ;;  %v341_v37 = vld [vmem:[%s3277_s30 + $0x1d8] sm:$0xff]  ;;  %v359_v41 = vpack.c.bf16 %v309_v35, %v308_v34  ;;  %v306_v50 = vld [vmem:[%s3277_s30 + $0xc0] sm:$0xff] }
  0x23   : > { %2843 = vmatpush3.bf16.xpose.msra.mxu1 %v493_v29  ;;  %2863 = vmatprep.subr.msk.bf16.mxu0 %vm5151_vm0, %v360_v24  ;;  %v442_v40 = vsel %vm5151_vm0, %v352_v32, 0  ;;  %v375_v43 = vpack.c.bf16 %v341_v37, %v340_v36  ;;  %v292_v44 = vld [vmem:[%s3277_s30 + $0x50] sm:$0xff]  ;;  %v293_v45 = vld [vmem:[%s3277_s30 + $0x58] sm:$0xff]  ;;  %v307_v51 = vld [vmem:[%s3277_s30 + $0xc8] sm:$0xff] }
  0x24   : > { %2871 = vmatprep.subr.msk.bf16.mxu1 %vm5151_vm0, %v376_v25  ;;  %v490_v42 = vsel %vm5151_vm0, %v368_v33, 0  ;;  %2307 = vperm.xlu0 %2989, %v2301_v38   ;;  %v324_v46 = vld [vmem:[%s3277_s30 + $0x150] sm:$0xff]  ;;  %v325_v47 = vld [vmem:[%s3277_s30 + $0x158] sm:$0xff]  ;;  %v351_v48 = vpack.c.bf16 %v293_v45, %v292_v44  ;;  %v338_v52 = vld [vmem:[%s3277_s30 + $0x1c0] sm:$0xff]  ;;  %v358_v55 = vpack.c.bf16 %v307_v51, %v306_v50 }
  0x25   : > { %2312 = vperm.xlu1 %2990, %v2302_v39   ;;  %v367_v49 = vpack.c.bf16 %v325_v47, %v324_v46  ;;  %v339_v53 = vld [vmem:[%s3277_s30 + $0x1c8] sm:$0xff]  ;;  %v290_v58 = vld [vmem:[%s3277_s30 + $0x40] sm:$0xff]  ;;  %v304_v1 = vld [vmem:[%s3277_s30 + $0xb0] sm:$0xff] }
  0x26   : > { %v439_v54 = vsel %vm5151_vm0, %v351_v48, 0  ;;  %v374_v57 = vpack.c.bf16 %v339_v53, %v338_v52  ;;  %v291_v59 = vld [vmem:[%s3277_s30 + $0x48] sm:$0xff]  ;;  %v322_v60 = vld [vmem:[%s3277_s30 + $0x140] sm:$0xff]  ;;  %v305_v2 = vld [vmem:[%s3277_s30 + $0xb8] sm:$0xff] }
  0x27   : > { %v487_v56 = vsel %vm5151_vm0, %v367_v49, 0  ;;  %v323_v61 = vld [vmem:[%s3277_s30 + $0x148] sm:$0xff]  ;;  %v350_v62 = vpack.c.bf16 %v291_v59, %v290_v58  ;;  %v336_v4 = vld [vmem:[%s3277_s30 + $0x1b0] sm:$0xff]  ;;  %v337_v5 = vld [vmem:[%s3277_s30 + $0x1b8] sm:$0xff]  ;;  %v357_v7 = vpack.c.bf16 %v305_v2, %v304_v1 }
  0x28   : > { %v366_v63 = vpack.c.bf16 %v323_v61, %v322_v60  ;;  %v373_v9 = vpack.c.bf16 %v337_v5, %v336_v4  ;;  %v288_v10 = vld [vmem:[%s3277_s30 + $0x30] sm:$0xff]  ;;  %v289_v11 = vld [vmem:[%s3277_s30 + $0x38] sm:$0xff]  ;;  %v302_v16 = vld [vmem:[%s3277_s30 + $0xa0] sm:$0xff] }
  0x29   : > { %v436_v6 = vsel %vm5151_vm0, %v350_v62, 0  ;;  %v320_v12 = vld [vmem:[%s3277_s30 + $0x130] sm:$0xff]  ;;  %v321_v13 = vld [vmem:[%s3277_s30 + $0x138] sm:$0xff]  ;;  %v349_v14 = vpack.c.bf16 %v289_v11, %v288_v10  ;;  %v303_v17 = vld [vmem:[%s3277_s30 + $0xa8] sm:$0xff] }
  0x2a   : > { %2825 = vmatpush3.bf16.xpose.msra.mxu0 %v442_v40  ;;  %v484_v8 = vsel %vm5151_vm0, %v366_v63, 0  ;;  %v365_v15 = vpack.c.bf16 %v321_v13, %v320_v12  ;;  %v334_v18 = vld [vmem:[%s3277_s30 + $0x1a0] sm:$0xff]  ;;  %v335_v19 = vld [vmem:[%s3277_s30 + $0x1a8] sm:$0xff]  ;;  %v356_v21 = vpack.c.bf16 %v303_v17, %v302_v16  ;;  %v300_v30 = vld [vmem:[%s3277_s30 + $0x90] sm:$0xff] }
  0x2b   : > { %2845 = vmatpush3.bf16.xpose.msra.mxu1 %v490_v42  ;;  %2864 = vmatprep.subr.msk.bf16.mxu0 %vm5151_vm0, %v359_v41  ;;  %v433_v20 = vsel %vm5151_vm0, %v349_v14, 0  ;;  %v372_v23 = vpack.c.bf16 %v335_v19, %v334_v18  ;;  %v286_v24 = vld [vmem:[%s3277_s30 + $0x20] sm:$0xff]  ;;  %v287_v25 = vld [vmem:[%s3277_s30 + $0x28] sm:$0xff]  ;;  %v301_v31 = vld [vmem:[%s3277_s30 + $0x98] sm:$0xff] }
  0x2c   : > { %2872 = vmatprep.subr.msk.bf16.mxu1 %vm5151_vm0, %v375_v43  ;;  %v481_v22 = vsel %vm5151_vm0, %v365_v15, 0  ;;  %v318_v26 = vld [vmem:[%s3277_s30 + $0x120] sm:$0xff]  ;;  %v319_v27 = vld [vmem:[%s3277_s30 + $0x128] sm:$0xff]  ;;  %v348_v28 = vpack.c.bf16 %v287_v25, %v286_v24  ;;  %v332_v32 = vld [vmem:[%s3277_s30 + $0x190] sm:$0xff]  ;;  %v355_v35 = vpack.c.bf16 %v301_v31, %v300_v30 }
  0x2d   : > { %v364_v29 = vpack.c.bf16 %v319_v27, %v318_v26  ;;  %v333_v33 = vld [vmem:[%s3277_s30 + $0x198] sm:$0xff]  ;;  %v284_v38 = vld [vmem:[%s3277_s30 + $0x10] sm:$0xff]  ;;  %v298_v44 = vld [vmem:[%s3277_s30 + $0x80] sm:$0xff] }
  0x2e   : > { %v430_v34 = vsel %vm5151_vm0, %v348_v28, 0  ;;  %v371_v37 = vpack.c.bf16 %v333_v33, %v332_v32  ;;  %v285_v39 = vld [vmem:[%s3277_s30 + $0x18] sm:$0xff]  ;;  %v316_v40 = vld [vmem:[%s3277_s30 + $0x110] sm:$0xff]  ;;  %v299_v45 = vld [vmem:[%s3277_s30 + $0x88] sm:$0xff]  ;;  %v5119_v32 = vmov 683565275  }
  0x2f   : > { %v478_v36 = vsel %vm5151_vm0, %v364_v29, 0  ;;  %v317_v41 = vld [vmem:[%s3277_s30 + $0x118] sm:$0xff]  ;;  %v347_v42 = vpack.c.bf16 %v285_v39, %v284_v38  ;;  %v330_v46 = vld [vmem:[%s3277_s30 + $0x180] sm:$0xff]  ;;  %v331_v47 = vld [vmem:[%s3277_s30 + $0x188] sm:$0xff]  ;;  %v354_v49 = vpack.c.bf16 %v299_v45, %v298_v44  ;;  %v5117_v38 = vmov 2131351028  }
  0x30   : > { %v363_v43 = vpack.c.bf16 %v317_v41, %v316_v40  ;;  %v370_v51 = vpack.c.bf16 %v331_v47, %v330_v46  ;;  %v282_v52 = vld [vmem:[%s3277_s30] sm:$0xff]  ;;  %v283_v53 = vld [vmem:[%s3277_s30 + $0x8] sm:$0xff]  ;;  %v5108_v40 = vmov 2102212464  }
  0x31   : > { %v427_v48 = vsel %vm5151_vm0, %v347_v42, 0  ;;  %v2992_v60 = vld [vmem:[%s5094_s1 + $0x8] sm:$0xff]   ;;  %v5112_v42 = vmov 920167782  }
  0x32   : > { %2827 = vmatpush3.bf16.xpose.msra.mxu0 %v439_v54  ;;  %v475_v50 = vsel %vm5151_vm0, %v363_v43, 0  ;;  %v314_v54 = vld [vmem:[%s3277_s30 + $0x100] sm:$0xff] }
  0x33   : > { %2847 = vmatpush3.bf16.xpose.msra.mxu1 %v487_v56  ;;  %2865 = vmatprep.subr.msk.bf16.mxu0 %vm5151_vm0, %v358_v55  ;;  %v315_v55 = vld [vmem:[%s3277_s30 + $0x108] sm:$0xff]  ;;  %v346_v56 = vpack.c.bf16 %v283_v53, %v282_v52  ;;  %s3095_s30 = sshll.u32 %s3161_s6, 4  ;;  %s3096_s30 = int_to_ptr.vmem [resolvable:$false] %s3095_s30 }
  0x34   : > { %2873 = vmatprep.subr.msk.bf16.mxu1 %vm5151_vm0, %v374_v57  ;;  %v362_v57 = vpack.c.bf16 %v315_v55, %v314_v54  ;;  %s3097_s9 = scalar_lea.vmem %s3096_s30, 128  ;;  %p3098_p0 = scmp.lt.s32.totalorder %s2673_s20, %s3096_s30 }
  0x35   : > { %v424_v58 = vsel %vm5151_vm0, %v346_v56, 0  ;;  %p3099_p1 = scmp.lt.s32.totalorder %s3097_s9, %s3091_s25 }
  0x36   : > { %v472_v59 = vsel %vm5151_vm0, %v362_v57, 0 }
  0x37   : > { %p3100_p2 = por %p3099_p1, %p3098_p0 }
  0x39   : > { %p3101_p3 = pnand %p3100_p2, %p3094_p13 }
  0x3a   : > { %2829 = vmatpush3.bf16.xpose.msra.mxu0 %v436_v6 }
  0x3b   : > { %2849 = vmatpush3.bf16.xpose.msra.mxu1 %v484_v8  ;;  %2866 = vmatprep.subr.msk.bf16.mxu0 %vm5151_vm0, %v357_v7 }
  0x3c   : > { %2874 = vmatprep.subr.msk.bf16.mxu1 %vm5151_vm0, %v373_v9 }
  0x42   : > { %2831 = vmatpush3.bf16.xpose.msra.mxu0 %v433_v20 }
  0x43   : > { %2851 = vmatpush3.bf16.xpose.msra.mxu1 %v481_v22  ;;  %2867 = vmatprep.subr.msk.bf16.mxu0 %vm5151_vm0, %v356_v21 }
  0x44   : > { %2875 = vmatprep.subr.msk.bf16.mxu1 %vm5151_vm0, %v372_v23 }
  0x4a   : > { %2833 = vmatpush3.bf16.xpose.msra.mxu0 %v430_v34 }
  0x4b   : > { %2853 = vmatpush3.bf16.xpose.msra.mxu1 %v478_v36  ;;  %2868 = vmatprep.subr.msk.bf16.mxu0 %vm5151_vm0, %v355_v35  ;;  %v5115_v36 = vmov 2475754826  }
  0x4c   : > { %2876 = vmatprep.subr.msk.bf16.mxu1 %vm5151_vm0, %v371_v37 }
  0x52   : > { %2835 = vmatpush3.bf16.xpose.msra.mxu0 %v427_v48 }
  0x53   : > { %2855 = vmatpush3.bf16.xpose.msra.mxu1 %v475_v50  ;;  %2869 = vmatprep.subr.msk.bf16.mxu0 %vm5151_vm0, %v354_v49  ;;  %v5110_v49 = vmov 1326507024  }
  0x54   : > { %2877 = vmatprep.subr.msk.bf16.mxu1 %vm5151_vm0, %v370_v51 }
  0x5a   : > { %2837 = vmatpush3.bf16.xpose.msra.mxu0 %v424_v58 }
  0x5b   : > { %2857 = vmatpush3.bf16.xpose.msra.mxu1 %v472_v59 }
  0x61   : > { %2839 = vmatmul.mubr.msk.bf16.vlgmr.msra.gmra.mxu0 %vm5151_vm0, %v3256_v0 }
  0x62   : > { %2859 = vmatmul.mubr.msk.bf16.vlgmr.msra.gmra.mxu1 %vm5151_vm0, %v3256_v0  ;;  %2840 = vmatprep.mubr.msk.bf16.mxu0 %vm5151_vm0, %v2992_v60 }
  0x63   : > { %2860 = vmatprep.mubr.msk.bf16.mxu1 %vm5151_vm0, %v2992_v60 }
  0x69   : > { %2841 = vmatmul.mubr.msk.bf16.gmra.mxu0 %vm5151_vm0, %v2992_v60 }
  0x6a   : > { %2861 = vmatmul.mubr.msk.bf16.gmra.mxu1 %vm5151_vm0, %v2992_v60  ;;  %2373 = vmatprep.mubr.bf16.mxu0 %v5101_v3 }
  0x6b   : > { %2426 = vmatprep.mubr.bf16.mxu1 %v5101_v3 }
  0x93   : > { %v389_v61 = vpop.permute.xlu1 %388 }
 0x121   : > { %v553_v62 = vpop.f32.mrf.mxu0 }
 0x122   : > { %v3403_v63 = vadd.f32 %v553_v62, %v389_v61  ;;  %v606_v1 = vpop.f32.mrf.mxu1 }
 0x123   : > { %v3405_v2 = vadd.f32 %v606_v1, %v389_v61  ;;  %v555_v0 = vpop.f32.mrf.mxu0 }
 0x124   : > { %5167 = vst [vmem:[#allocation6_spill] sm:$0xff] %v3403_v63  ;;  %v625_v4 = vand.u32 2147483647, %v3403_v63  ;;  %v628_v5 = vand.u32 2139095040, %v3403_v63  ;;  %v3409_v6 = vadd.f32 %v555_v0, %v389_v61  ;;  %v608_v22 = vpop.f32.mrf.mxu1 }
 0x125   : > { %5168 = vst [vmem:[#allocation7_spill] sm:$0xff] %v3405_v2  ;;  %v833_v7 = vand.u32 2147483647, %v3405_v2  ;;  %v836_v8 = vand.u32 2139095040, %v3405_v2  ;;  %v3424_v30 = vadd.f32 %v608_v22, %v389_v61 }
 0x126   : > { %v629_v9 = vshrl.u32 %v628_v5, 23  ;;  %v632_v10 = vand.u32 8388607, %v625_v4  ;;  %v732_v13 = vand.u32 2139095040, %v3409_v6 }
 0x127   : > { %v837_v11 = vshrl.u32 %v836_v8, 23  ;;  %v840_v12 = vand.u32 8388607, %v833_v7  ;;  %5169 = vst [vmem:[#allocation8_spill] sm:$0xff] %v3424_v30 }
 0x128   : > { %v2744_v14 = vadd.s32 4294967169, %v629_v9  ;;  %v733_v16 = vshrl.u32 %v732_v13, 23  ;;  %v633_v18 = vor.u32 8388608, %v632_v10 }
 0x129   : > { %v2752_v15 = vadd.s32 4294967169, %v837_v11  ;;  %v841_v19 = vor.u32 8388608, %v840_v12 }
 0x12a   : > { %v635_v17 = vadd.s32 1, %v2744_v14  ;;  %v2748_v21 = vadd.s32 4294967169, %v733_v16  ;;  %v3418_v27 = vshll.u32 %v633_v18, 8 }
 0x12b   : > { %v843_v20 = vadd.s32 1, %v2752_v15  ;;  %v3420_v28 = vshll.u32 %v841_v19, 8 }
 0x12c   : > { %vm636_vm1 = vcmp.gt.s32.totalorder %v635_v17, 0  ;;  %v3422_v29 = vadd.s32 1, %v2748_v21 }
 0x12d   : > { %v637_v23 = vsel %vm636_vm1, %v635_v17, 0  ;;  %vm844_vm2 = vcmp.gt.s32.totalorder %v843_v20, 0 }
 0x12e   : > { %v638_v24 = vshrl.u32 %v637_v23, 5  ;;  %v639_v25 = vand.u32 31, %v637_v23  ;;  %v845_v26 = vsel %vm844_vm2, %v843_v20, 0  ;;  %vm740_vm7 = vcmp.gt.s32.totalorder %v3422_v29, 0 }
 0x12f   : > { %v3427_v34 = vshrl.u32 %v845_v26, 5  ;;  %v847_v35 = vand.u32 31, %v845_v26 }
 0x130   : > { %v640_v31 = vsub.s32 32, %v639_v25  ;;  %v642_v33 = vshll.u32 %v5119_v32, %v639_v25  ;;  %v645_v37 = vshll.u32 %v5115_v36, %v639_v25  ;;  %v648_v39 = vshll.u32 %v5117_v38, %v639_v25 }
 0x131   : > { %v651_v41 = vshll.u32 %v5108_v40, %v639_v25  ;;  %v654_v43 = vshll.u32 %v5112_v42, %v639_v25  ;;  %vm657_vm3 = vcmp.lt.s32.totalorder %v638_v24, 1  ;;  %vm658_vm4 = vcmp.lt.s32.totalorder %v638_v24, 2 }
 0x132   : > { %v643_v44 = vshrl.u32 %v5115_v36, %v640_v31  ;;  %v646_v45 = vshrl.u32 %v5117_v38, %v640_v31  ;;  %v649_v46 = vshrl.u32 %v5108_v40, %v640_v31  ;;  %v641_v47 = vshrl.u32 %v5119_v32, %v640_v31 }
 0x133   : > { %v652_v48 = vshrl.u32 %v5112_v42, %v640_v31  ;;  %v655_v50 = vshrl.u32 %v5110_v49, %v640_v31  ;;  %v848_v54 = vsub.s32 32, %v847_v35  ;;  %vm659_vm5 = vcmp.lt.s32.totalorder %v638_v24, 3 }
 0x134   : > { %v644_v51 = vor.u32 %v643_v44, %v642_v33  ;;  %v647_v52 = vor.u32 %v646_v45, %v645_v37  ;;  %v650_v53 = vor.u32 %v649_v46, %v648_v39  ;;  %vm660_vm6 = vcmp.lt.s32.totalorder %v638_v24, 4 }
 0x135   : > { %v653_v55 = vor.u32 %v652_v48, %v651_v41  ;;  %v656_v56 = vor.u32 %v655_v50, %v654_v43  ;;  %v850_v0 = vshll.u32 %v5119_v32, %v847_v35  ;;  %v851_v9 = vshrl.u32 %v5115_v36, %v848_v54 }
 0x136   : > { %v661_v57 = vsel %vm657_vm3, %v641_v47, %v644_v51  ;;  %v662_v58 = vsel %vm660_vm6, %v650_v53, 2102212464  ;;  %v665_v59 = vsel %vm657_vm3, %v644_v51, %v647_v52  ;;  %v669_v60 = vsel %vm657_vm3, %v647_v52, %v650_v53 }
 0x137   : > { %v663_v61 = vsel %vm659_vm5, %v647_v52, %v662_v58  ;;  %v666_v62 = vsel %vm660_vm6, %v653_v55, 920167782  ;;  %v670_v1 = vsel %vm660_vm6, %v656_v56, 1326507024  ;;  %v853_v10 = vshll.u32 %v5115_v36, %v847_v35 }
 0x138   : > { %v667_v5 = vsel %vm659_vm5, %v650_v53, %v666_v62  ;;  %v671_v8 = vsel %vm659_vm5, %v653_v55, %v670_v1  ;;  %v664_v11 = vsel %vm658_vm4, %v661_v57, %v663_v61  ;;  %v854_v14 = vshrl.u32 %v5117_v38, %v848_v54 }
 0x139   : > { %v668_v12 = vsel %vm658_vm4, %v665_v59, %v667_v5  ;;  %v672_v13 = vsel %vm658_vm4, %v669_v60, %v671_v8  ;;  %v852_v19 = vor.u32 %v851_v9, %v850_v0  ;;  %v856_v21 = vshll.u32 %v5117_v38, %v847_v35 }
 0x13a   : > { %v3451_v15 = vmul.u32.u64.low %v3418_v27, %v672_v13  ;;  %v3452_v16 = vmul.u32.u64.high %v3418_v27, %v672_v13, %v3451_v15  ;;  %v3455_v17 = vmul.u32.u64.low %v3418_v27, %v668_v12  ;;  %v3456_v18 = vmul.u32.u64.high %v3418_v27, %v668_v12, %v3455_v17 }
 0x13b   : > { %v855_v20 = vor.u32 %v854_v14, %v853_v10  ;;  %v857_v22 = vshrl.u32 %v5108_v40, %v848_v54  ;;  %v849_v23 = vshrl.u32 %v5119_v32, %v848_v54  ;;  %v859_v24 = vshll.u32 %v5108_v40, %v847_v35 }
 0x13c   : > { %v860_v25 = vshrl.u32 %v5112_v42, %v848_v54  ;;  %v863_v26 = vshrl.u32 %v5110_v49, %v848_v54  ;;  %v680_v31 = vmul.u32 %v3418_v27, %v664_v11  ;;  %v862_v37 = vshll.u32 %v5112_v42, %v847_v35 }
 0x13d   : > { %v858_v33 = vor.u32 %v857_v22, %v856_v21  ;;  %vm865_vm8 = vcmp.lt.s32.totalorder %v3427_v34, 1  ;;  %vm682_vm9 = vc.u32 %v3452_v16, %v3455_v17  ;;  %v683_v39 = vadd.s32 1, %v3456_v18 }
 0x13e   : > { %v861_v41 = vor.u32 %v860_v25, %v859_v24  ;;  %vm866_vm10 = vcmp.lt.s32.totalorder %v3427_v34, 2  ;;  %v864_v43 = vor.u32 %v863_v26, %v862_v37  ;;  %vm867_vm11 = vcmp.lt.s32.totalorder %v3427_v34, 3 }
 0x13f   : > { %vm868_vm12 = vcmp.lt.s32.totalorder %v3427_v34, 4  ;;  %v873_v44 = vsel %vm865_vm8, %v852_v19, %v855_v20  ;;  %v684_v27 = vsel %vm682_vm9, %v683_v39, %v3456_v18  ;;  %v877_v46 = vsel %vm865_vm8, %v855_v20, %v858_v33 }
 0x140   : > { %v870_v45 = vsel %vm868_vm12, %v858_v33, 2102212464  ;;  %v874_v35 = vsel %vm868_vm12, %v861_v41, 920167782  ;;  %v685_v47 = vadd.s32 %v684_v27, %v680_v31  ;;  %v869_v48 = vsel %vm865_vm8, %v849_v23, %v852_v19 }
 0x141   : > { %v875_v50 = vsel %vm867_vm11, %v858_v33, %v874_v35  ;;  %v878_v51 = vsel %vm868_vm12, %v864_v43, 1326507024  ;;  %v871_v52 = vsel %vm867_vm11, %v855_v20, %v870_v45  ;;  %v741_v55 = vsel %vm740_vm7, %v3422_v29, 0 }
 0x142   : > { %v876_v53 = vsel %vm866_vm10, %v873_v44, %v875_v50  ;;  %v879_v54 = vsel %vm867_vm11, %v861_v41, %v878_v51  ;;  %v686_v56 = vadd.s32 536870912, %v685_v47  ;;  %v729_v62 = vand.u32 2147483647, %v3409_v6 }
 0x143   : > { %v880_v57 = vsel %vm866_vm10, %v877_v46, %v879_v54  ;;  %v3483_v58 = vmul.u32.u64.low %v3420_v28, %v876_v53  ;;  %v3484_v59 = vmul.u32.u64.high %v3420_v28, %v876_v53, %v3483_v58  ;;  %v872_v29 = vsel %vm866_vm10, %v869_v48, %v871_v52 }
 0x144   : > { %v3488_v60 = vmul.u32.u64.low %v3420_v28, %v880_v57  ;;  %v3489_v61 = vmul.u32.u64.high %v3420_v28, %v880_v57, %v3488_v60  ;;  %v3492_v1 = vshrl.u32 %v686_v56, 30  ;;  %v743_v0 = vand.u32 31, %v741_v55 }
 0x145   : > { %v940_v5 = vand.u32 2139095040, %v3424_v30  ;;  %v891_v9 = vadd.s32 1, %v3484_v59  ;;  %v888_v11 = vmul.u32 %v3420_v28, %v872_v29  ;;  %v736_v12 = vand.u32 8388607, %v729_v62 }
 0x146   : > { %v688_v8 = vshll.u32 %v3492_v1, 30  ;;  %v744_v10 = vsub.s32 32, %v743_v0  ;;  %vm890_vm13 = vc.u32 %v3489_v61, %v3483_v58  ;;  %v742_v14 = vshrl.u32 %v741_v55, 5 }
 0x147   : > { %v892_v34 = vsel %vm890_vm13, %v891_v9, %v3484_v59  ;;  %v941_v15 = vshrl.u32 %v940_v5, 23  ;;  %v746_v19 = vshll.u32 %v5119_v32, %v743_v0  ;;  %v749_v22 = vshll.u32 %v5115_v36, %v743_v0 }
 0x148   : > { %v3504_v13 = vsub.s32 %v685_v47, %v688_v8  ;;  %v893_v18 = vadd.s32 %v892_v34, %v888_v11  ;;  %v747_v20 = vshrl.u32 %v5115_v36, %v744_v10  ;;  %v750_v21 = vshrl.u32 %v5117_v38, %v744_v10 }
 0x149   : > { %v752_v23 = vshll.u32 %v5117_v38, %v743_v0  ;;  %v753_v24 = vshrl.u32 %v5108_v40, %v744_v10  ;;  %v755_v37 = vshll.u32 %v5108_v40, %v743_v0  ;;  %v756_v39 = vshrl.u32 %v5112_v42, %v744_v10 }
 0x14a   : > { %v691_v28 = vsub.s32 0, %v3504_v13  ;;  %v894_v25 = vadd.s32 536870912, %v893_v18  ;;  %v748_v26 = vor.u32 %v747_v20, %v746_v19  ;;  %v751_v31 = vor.u32 %v750_v21, %v749_v22 }
 0x14b   : > { %v754_v33 = vor.u32 %v753_v24, %v752_v23  ;;  %v758_v43 = vshll.u32 %v5112_v42, %v743_v0  ;;  %v759_v44 = vshrl.u32 %v5110_v49, %v744_v10  ;;  %v2756_v27 = vadd.s32 4294967169, %v941_v15 }
 0x14c   : > { %v3516_v41 = vshrl.u32 %v894_v25, 30  ;;  %v2745_v45 = vmin.u32 %v691_v28, %v3504_v13  ;;  %v737_v35 = vor.u32 8388608, %v736_v12  ;;  %v757_v46 = vor.u32 %v756_v39, %v755_v37 }
 0x14d   : > { %vm761_vm14 = vcmp.lt.s32.totalorder %v742_v14, 1  ;;  %v760_v48 = vor.u32 %v759_v44, %v758_v43  ;;  %vm762_vm15 = vcmp.lt.s32.totalorder %v742_v14, 2  ;;  %vm764_vm1 = vcmp.lt.s32.totalorder %v742_v14, 4 }
 0x14e   : > { %v896_v47 = vshll.u32 %v3516_v41, 30  ;;  %vm763_vm2 = vcmp.lt.s32.totalorder %v742_v14, 3  ;;  %v769_v50 = vsel %vm761_vm14, %v748_v26, %v751_v31  ;;  %v770_v51 = vsel %vm764_vm1, %v757_v46, 920167782 }
 0x14f   : > { %v773_v52 = vsel %vm761_vm14, %v751_v31, %v754_v33  ;;  %v771_v54 = vsel %vm763_vm2, %v754_v33, %v770_v51  ;;  %v774_v55 = vsel %vm764_vm1, %v760_v48, 1326507024  ;;  %v947_v56 = vadd.s32 1, %v2756_v27 }
 0x150   : > { %v3524_v53 = vsub.s32 %v893_v18, %v896_v47  ;;  %v693_v57 = vclz %v2745_v45  ;;  %v745_v59 = vshrl.u32 %v5119_v32, %v744_v10  ;;  %v766_v60 = vsel %vm764_vm1, %v754_v33, 2102212464 }
 0x151   : > { %v775_v29 = vsel %vm763_vm2, %v757_v46, %v774_v55  ;;  %v772_v5 = vsel %vm762_vm15, %v769_v50, %v771_v54  ;;  %v777_v9 = vshll.u32 %v737_v35, 8  ;;  %v767_v12 = vsel %vm763_vm2, %v751_v31, %v766_v60 }
 0x152   : > { %v899_v0 = vsub.s32 0, %v3524_v53  ;;  %v776_v8 = vsel %vm762_vm15, %v773_v52, %v775_v29  ;;  %v765_v11 = vsel %vm761_vm14, %v745_v59, %v748_v26  ;;  %vm948_vm3 = vcmp.gt.s32.totalorder %v947_v56, 0  ;;  %v557_v59 = vpop.f32.mrf.mxu0 }
 0x153   : > { %v3534_v34 = vmul.u32.u64.low %v777_v9, %v776_v8  ;;  %v3535_v15 = vmul.u32.u64.high %v777_v9, %v776_v8, %v3534_v34  ;;  %v2746_v18 = vadd.s32 4294967294, %v693_v57  ;;  %v5107_v21 = vand.u32 2147483647, %v3424_v30  ;;  %v3563_v57 = vpop.permute.xlu1 %393 }
 0x154   : > { %v3537_v10 = vmul.u32.u64.low %v777_v9, %v772_v5  ;;  %v3538_v19 = vmul.u32.u64.high %v777_v9, %v772_v5, %v3537_v10  ;;  %v2753_v20 = vmin.u32 %v899_v0, %v3524_v53  ;;  %v949_v28 = vsel %vm948_vm3, %v947_v56, 0 }
 0x155   : > { %v768_v22 = vsel %vm762_vm15, %v765_v11, %v767_v12  ;;  %v951_v23 = vand.u32 31, %v949_v28  ;;  %vm2747_vm5 = vcmp.lt.s32.totalorder %v2746_v18, 0  ;;  %v944_v33 = vand.u32 8388607, %v5107_v21 }
 0x156   : > { %vm786_vm4 = vc.u32 %v3535_v15, %v3537_v10  ;;  %v787_v24 = vadd.s32 1, %v3538_v19  ;;  %v901_v26 = vclz %v2753_v20  ;;  %v784_v31 = vmul.u32 %v777_v9, %v768_v22 }
 0x157   : > { %v952_v25 = vsub.s32 32, %v951_v23  ;;  %v3550_v39 = vsel %vm2747_vm5, 0, %v2746_v18  ;;  %v945_v35 = vor.u32 8388608, %v944_v33  ;;  %v950_v48 = vshrl.u32 %v949_v28, 5 }
 0x158   : > { %v788_v37 = vsel %vm786_vm4, %v787_v24, %v3538_v19  ;;  %v2754_v27 = vadd.s32 4294967294, %v901_v26  ;;  %v701_v47 = vsub.s32 4294967266, %v3550_v39  ;;  %v954_v50 = vshll.u32 %v5119_v32, %v951_v23 }
 0x159   : > { %v789_v43 = vadd.s32 %v788_v37, %v784_v31  ;;  %v955_v14 = vshrl.u32 %v5115_v36, %v952_v25  ;;  %v958_v44 = vshrl.u32 %v5117_v38, %v952_v25  ;;  %v961_v46 = vshrl.u32 %v5108_v40, %v952_v25 }
 0x15a   : > { %v957_v51 = vshll.u32 %v5115_v36, %v951_v23  ;;  %v960_v54 = vshll.u32 %v5117_v38, %v951_v23  ;;  %v963_v55 = vshll.u32 %v5108_v40, %v951_v23  ;;  %v964_v56 = vshrl.u32 %v5112_v42, %v952_v25 }
 0x15b   : > { %v790_v45 = vadd.s32 536870912, %v789_v43  ;;  %v956_v60 = vor.u32 %v955_v14, %v954_v50  ;;  %v966_v0 = vshll.u32 %v5112_v42, %v951_v23  ;;  %v967_v5 = vshrl.u32 %v5110_v49, %v952_v25 }
 0x15c   : > { %v959_v29 = vor.u32 %v958_v44, %v957_v51  ;;  %vm2755_vm6 = vcmp.lt.s32.totalorder %v2754_v27, 0  ;;  %v962_v9 = vor.u32 %v961_v46, %v960_v54  ;;  %v965_v11 = vor.u32 %v964_v56, %v963_v55 }
 0x15d   : > { %v3558_v52 = vshrl.u32 %v790_v45, 30  ;;  %v968_v12 = vor.u32 %v967_v5, %v966_v0  ;;  %v3569_v34 = vadd.f32 %v557_v59, %v3563_v57  ;;  %v702_v18 = vadd.s32 127, %v701_v47  ;;  %v610_v5 = vpop.f32.mrf.mxu1 }
 0x15e   : > { %vm969_vm7 = vcmp.lt.s32.totalorder %v950_v48, 1  ;;  %v985_v20 = vshll.u32 %v945_v35, 8  ;;  %v3573_v28 = vsel %vm2755_vm6, 0, %v2754_v27  ;;  %v953_v22 = vshrl.u32 %v5119_v32, %v952_v25 }
 0x15f   : > { %v792_v8 = vshll.u32 %v3558_v52, 30  ;;  %5170 = vst [vmem:[#allocation9_spill] sm:$0xff] %v3569_v34  ;;  %vm972_vm8 = vcmp.lt.s32.totalorder %v950_v48, 4  ;;  %v977_v23 = vsel %vm969_vm7, %v956_v60, %v959_v29  ;;  %vm970_vm9 = vcmp.lt.s32.totalorder %v950_v48, 2 }
 0x160   : > { %vm971_vm10 = vcmp.lt.s32.totalorder %v950_v48, 3  ;;  %v974_v24 = vsel %vm972_vm8, %v962_v9, 2102212464  ;;  %v978_v26 = vsel %vm972_vm8, %v965_v11, 920167782  ;;  %v981_v37 = vsel %vm969_vm7, %v959_v29, %v962_v9 }
 0x161   : > { %v3571_v19 = vsub.s32 %v789_v43, %v792_v8  ;;  %v979_v33 = vsel %vm971_vm10, %v962_v9, %v978_v26  ;;  %v982_v43 = vsel %vm972_vm8, %v968_v12, 1326507024  ;;  %v681_v14 = vadd.s32 %v3455_v17, %v3452_v16 }
 0x162   : > { %v697_v44 = vsub.s32 32, %v3550_v39  ;;  %v973_v25 = vsel %vm969_vm7, %v953_v22, %v956_v60  ;;  %v980_v27 = vsel %vm970_vm9, %v977_v23, %v979_v33  ;;  %v975_v45 = vsel %vm971_vm10, %v959_v29, %v974_v24 }
 0x163   : > { %v795_v31 = vsub.s32 0, %v3571_v19  ;;  %v983_v35 = vsel %vm971_vm10, %v965_v11, %v982_v43  ;;  %v3584_v46 = vmul.u32.u64.low %v985_v20, %v980_v27  ;;  %v3585_v47 = vmul.u32.u64.high %v985_v20, %v980_v27, %v3584_v46 }
 0x164   : > { %v703_v50 = vshll.u32 %v702_v18, 23  ;;  %v909_v51 = vsub.s32 4294967266, %v3573_v28  ;;  %v984_v54 = vsel %vm970_vm9, %v981_v37, %v983_v35  ;;  %v1044_v55 = vand.u32 2139095040, %v3569_v34 }
 0x165   : > { %v2749_v16 = vmin.u32 %v795_v31, %v3571_v19  ;;  %v3592_v17 = vmul.u32.u64.low %v985_v20, %v984_v54  ;;  %v3593_v56 = vmul.u32.u64.high %v985_v20, %v984_v54, %v3592_v17  ;;  %v699_v59 = vshrl.u32 %v681_v14, %v697_v44 }
 0x166   : > { %v976_v60 = vsel %vm970_vm9, %v973_v25, %v975_v45  ;;  %v1045_v29 = vshrl.u32 %v1044_v55, 23  ;;  %v995_v0 = vadd.s32 1, %v3585_v47  ;;  %v698_v8 = vshll.u32 %v3504_v13, %v3550_v39 }
 0x167   : > { %v704_v9 = vor.u32 4788187, %v703_v50  ;;  %v910_v11 = vadd.s32 127, %v909_v51  ;;  %v797_v18 = vclz %v2749_v16  ;;  %v992_v22 = vmul.u32 %v985_v20, %v976_v60 }
 0x168   : > { %v2760_v12 = vadd.s32 4294967169, %v1045_v29  ;;  %vm994_vm11 = vc.u32 %v3593_v56, %v3584_v46  ;;  %v700_v23 = vor.u32 %v699_v59, %v698_v8  ;;  %v3603_v48 = vadd.f32 %v610_v5, %v3563_v57 }
 0x169   : > { %v996_v24 = vsel %vm994_vm11, %v995_v0, %v3585_v47  ;;  %v711_v26 = vsub.s32 4, %v3492_v1  ;;  %vm627_vm12 = vcmp.lt.s32.totalorder %v3403_v63, 0  ;;  %v705_v13 = vand.u32 2147483647, %v704_v9 }
 0x16a   : > { %5171 = vst [vmem:[#allocation10_spill] sm:$0xff] %v3603_v48  ;;  %v997_v31 = vadd.s32 %v996_v24, %v992_v22  ;;  %v1051_v33 = vadd.s32 1, %v2760_v12  ;;  %v905_v39 = vsub.s32 32, %v3573_v28  ;;  %v911_v37 = vshll.u32 %v910_v11, 23 }
 0x16b   : > { %v2750_v20 = vadd.s32 4294967294, %v797_v18  ;;  %v5106_v14 = vand.u32 2147483647, %v3569_v34  ;;  %v707_v44 = vcvt.s32.f32 %v700_v23  ;;  %v889_v25 = vadd.s32 %v3483_v58, %v3489_v61 }
 0x16c   : > { %v998_v43 = vadd.s32 536870912, %v997_v31  ;;  %vm1052_vm13 = vcmp.gt.s32.totalorder %v1051_v33, 0  ;;  %v1252_v45 = vand.u32 2139095040, %v3603_v48  ;;  %v3615_v35 = vsel %vm627_vm12, %v711_v26, %v3492_v1 }
 0x16d   : > { %v1053_v27 = vsel %vm1052_vm13, %v1051_v33, 0  ;;  %v3619_v51 = vmul.f32 %v707_v44, %v705_v13  ;;  %v906_v54 = vshll.u32 %v3524_v53, %v3573_v28  ;;  %v907_v55 = vshrl.u32 %v889_v25, %v905_v39 }
 0x16e   : > { %v3617_v47 = vshrl.u32 %v998_v43, 30  ;;  %v1055_v50 = vand.u32 31, %v1053_v27  ;;  %v912_v16 = vor.u32 4788187, %v911_v37  ;;  %vm2751_vm14 = vcmp.lt.s32.totalorder %v2750_v20, 0 }
 0x16f   : > { %v1048_v61 = vand.u32 8388607, %v5106_v14  ;;  %v1054_v59 = vshrl.u32 %v1053_v27, 5  ;;  %v1253_v29 = vshrl.u32 %v1252_v45, 23  ;;  %vm3639_vm15 = vcmp.le.f32.partialorder %v625_v4, 0.7853982 }
 0x170   : > { %5172 = vst [vmem:[#allocation11_spill] sm:$0xff] %v3617_v47  ;;  %v1000_v58 = vshll.u32 %v3617_v47, 30  ;;  %v1056_v17 = vsub.s32 32, %v1055_v50  ;;  %v1058_v1 = vshll.u32 %v5119_v32, %v1055_v50  ;;  %v1061_v60 = vshll.u32 %v5115_v36, %v1055_v50 }
 0x171   : > { %v1064_v28 = vshll.u32 %v5117_v38, %v1055_v50  ;;  %v1067_v9 = vshll.u32 %v5108_v40, %v1055_v50  ;;  %v1070_v26 = vshll.u32 %v5112_v42, %v1055_v50  ;;  %v1049_v33 = vor.u32 8388608, %v1048_v61 }
 0x172   : > { %v3628_v0 = vsub.s32 %v997_v31, %v1000_v58  ;;  %v1059_v5 = vshrl.u32 %v5115_v36, %v1056_v17  ;;  %v1062_v53 = vshrl.u32 %v5117_v38, %v1056_v17  ;;  %v1065_v8 = vshrl.u32 %v5108_v40, %v1056_v17 }
 0x173   : > { %v1068_v11 = vshrl.u32 %v5112_v42, %v1056_v17  ;;  %v1071_v12 = vshrl.u32 %v5110_v49, %v1056_v17  ;;  %v908_v31 = vor.u32 %v907_v55, %v906_v54  ;;  %v913_v37 = vand.u32 2147483647, %v912_v16 }
 0x174   : > { %v1003_v22 = vsub.s32 0, %v3628_v0  ;;  %v1060_v23 = vor.u32 %v1059_v5, %v1058_v1  ;;  %v1063_v24 = vor.u32 %v1062_v53, %v1061_v60  ;;  %v1066_v13 = vor.u32 %v1065_v8, %v1064_v28 }
 0x175   : > { %v1069_v39 = vor.u32 %v1068_v11, %v1067_v9  ;;  %v3646_v43 = vsel %vm2751_vm14, 0, %v2750_v20  ;;  %v1072_v44 = vor.u32 %v1071_v12, %v1070_v26  ;;  %vm1073_vm1 = vcmp.lt.s32.totalorder %v1054_v59, 1 }
 0x176   : > { %v1057_v4 = vshrl.u32 %v5119_v32, %v1056_v17  ;;  %vm1076_vm2 = vcmp.lt.s32.totalorder %v1054_v59, 4  ;;  %v1081_v25 = vsel %vm1073_vm1, %v1060_v23, %v1063_v24  ;;  %v2768_v27 = vadd.s32 4294967169, %v1253_v29 }
 0x177   : > { %v2757_v45 = vmin.u32 %v1003_v22, %v3628_v0  ;;  %vm1075_vm3 = vcmp.lt.s32.totalorder %v1054_v59, 3  ;;  %v1078_v58 = vsel %vm1076_vm2, %v1066_v13, 2102212464  ;;  %v1082_v50 = vsel %vm1076_vm2, %v1069_v39, 920167782 }
 0x178   : > { %vm1074_vm4 = vcmp.lt.s32.totalorder %v1054_v59, 2  ;;  %v1083_v54 = vsel %vm1075_vm3, %v1066_v13, %v1082_v50  ;;  %v1085_v55 = vsel %vm1073_vm1, %v1063_v24, %v1066_v13  ;;  %v1089_v61 = vshll.u32 %v1049_v33, 8 }
 0x179   : > { %v805_v16 = vsub.s32 4294967266, %v3646_v43  ;;  %v1077_v20 = vsel %vm1073_vm1, %v1057_v4, %v1060_v23  ;;  %v1084_v1 = vsel %vm1074_vm4, %v1081_v25, %v1083_v54  ;;  %v1086_v60 = vsel %vm1076_vm2, %v1072_v44, 1326507024 }
 0x17a   : > { %v1079_v5 = vsel %vm1075_vm3, %v1063_v24, %v1078_v58  ;;  %v1087_v17 = vsel %vm1075_vm3, %v1069_v39, %v1086_v60  ;;  %v3652_v53 = vmul.u32.u64.low %v1089_v61, %v1084_v1  ;;  %v3653_v28 = vmul.u32.u64.high %v1089_v61, %v1084_v1, %v3652_v53  ;;  %v559_v24 = vpop.f32.mrf.mxu0 }
 0x17b   : > { %v915_v29 = vcvt.s32.f32 %v908_v31  ;;  %v1005_v8 = vclz %v2757_v45  ;;  %v1088_v9 = vsel %vm1074_vm4, %v1085_v55, %v1087_v17  ;;  %v1259_v11 = vadd.s32 1, %v2768_v27 }
 0x17c   : > { %v709_v12 = vxor.u32 2147483648, %v3619_v51  ;;  %v714_v22 = vsel %vm3639_vm15, 0, %v3615_v35  ;;  %v3661_v23 = vmul.u32.u64.low %v1089_v61, %v1088_v9  ;;  %v3662_v26 = vmul.u32.u64.high %v1089_v61, %v1088_v9, %v3661_v23 }
 0x17d   : > { %v3664_v33 = vmul.f32 %v915_v29, %v913_v37  ;;  %v1080_v13 = vsel %vm1074_vm4, %v1077_v20, %v1079_v5  ;;  %vm1260_vm5 = vcmp.gt.s32.totalorder %v1259_v11, 0  ;;  %v806_v31 = vadd.s32 127, %v805_v16 }
 0x17e   : > { %v1099_v39 = vadd.s32 1, %v3653_v28  ;;  %v5103_v44 = vand.u32 2147483647, %v3603_v48  ;;  %v1261_v4 = vsel %vm1260_vm5, %v1259_v11, 0  ;;  %v3669_v25 = vadd.s32 3, %v714_v22 }
 0x17f   : > { %v2758_v27 = vadd.s32 4294967294, %v1005_v8  ;;  %v1263_v45 = vand.u32 31, %v1261_v4  ;;  %v3672_v35 = vadd.f32 %v559_v24, %v3563_v57  ;;  %v3677_v37 = vsel %vm627_vm12, %v709_v12, %v3619_v51 }
 0x180   : > { %5175 = vst [vmem:[#allocation12_spill] sm:$0xff] %v3669_v25  ;;  %v785_v59 = vadd.s32 %v3537_v10, %v3535_v15  ;;  %v1096_v58 = vmul.u32 %v1089_v61, %v1080_v13  ;;  %vm1098_vm6 = vc.u32 %v3662_v26, %v3652_v53  ;;  %v917_v50 = vxor.u32 2147483648, %v3664_v33 }
 0x181   : > { %v801_v54 = vsub.s32 32, %v3646_v43  ;;  %v1100_v55 = vsel %vm1098_vm6, %v1099_v39, %v3653_v28  ;;  %v1264_v16 = vsub.s32 32, %v1263_v45  ;;  %v802_v20 = vshll.u32 %v3571_v19, %v3646_v43 }
 0x182   : > { %v807_v1 = vshll.u32 %v806_v31, 23  ;;  %v1101_v51 = vadd.s32 %v1100_v55, %v1096_v58  ;;  %v1256_v60 = vand.u32 8388607, %v5103_v44  ;;  %vm2759_vm7 = vcmp.lt.s32.totalorder %v2758_v27, 0 }
 0x183   : > { %v1266_v15 = vshll.u32 %v5119_v32, %v1263_v45  ;;  %v1267_v10 = vshrl.u32 %v5115_v36, %v1264_v16  ;;  %v1148_v61 = vand.u32 2139095040, %v3672_v35  ;;  %v1269_v17 = vshll.u32 %v5115_v36, %v1263_v45 }
 0x184   : > { %v1102_v5 = vadd.s32 536870912, %v1101_v51  ;;  %v1270_v28 = vshrl.u32 %v5117_v38, %v1264_v16  ;;  %v1273_v29 = vshrl.u32 %v5108_v40, %v1264_v16  ;;  %v1262_v19 = vshrl.u32 %v1261_v4, 5 }
 0x185   : > { %v1272_v43 = vshll.u32 %v5117_v38, %v1263_v45  ;;  %v1275_v8 = vshll.u32 %v5108_v40, %v1263_v45  ;;  %v1276_v9 = vshrl.u32 %v5112_v42, %v1264_v16  ;;  %v1268_v12 = vor.u32 %v1267_v10, %v1266_v15 }
 0x186   : > { %v3699_v11 = vshrl.u32 %v1102_v5, 30  ;;  %v1271_v22 = vor.u32 %v1270_v28, %v1269_v17  ;;  %v1279_v23 = vshrl.u32 %v5110_v49, %v1264_v16  ;;  %v1278_v31 = vshll.u32 %v5112_v42, %v1263_v45 }
 0x187   : > { %v1274_v24 = vor.u32 %v1273_v29, %v1272_v43  ;;  %v1277_v13 = vor.u32 %v1276_v9, %v1275_v8  ;;  %v1149_v39 = vshrl.u32 %v1148_v61, 23  ;;  %v803_v58 = vshrl.u32 %v785_v59, %v801_v54 }
 0x188   : > { %v1104_v4 = vshll.u32 %v3699_v11, 30  ;;  %v1257_v55 = vor.u32 8388608, %v1256_v60  ;;  %v5105_v3 = vand.u32 2147483647, %v3672_v35  ;;  %vm835_vm8 = vcmp.lt.s32.totalorder %v3405_v2, 0 }
 0x189   : > { %v3707_v5 = vsel %vm2759_vm7, 0, %v2758_v27  ;;  %v1280_v15 = vor.u32 %v1279_v23, %v1278_v31  ;;  %vm1281_vm9 = vcmp.lt.s32.totalorder %v1262_v19, 1  ;;  %vm1284_vm10 = vcmp.lt.s32.totalorder %v1262_v19, 4 }
 0x18a   : > { %v3709_v10 = vsub.s32 %v1101_v51, %v1104_v4  ;;  %vm1283_vm11 = vcmp.lt.s32.totalorder %v1262_v19, 3  ;;  %v1289_v45 = vsel %vm1281_vm9, %v1268_v12, %v1271_v22  ;;  %v1290_v59 = vsel %vm1284_vm10, %v1277_v13, 920167782 }
 0x18b   : > { %v808_v54 = vor.u32 4788187, %v807_v1  ;;  %v1286_v60 = vsel %vm1284_vm10, %v1274_v24, 2102212464  ;;  %v1291_v61 = vsel %vm1283_vm11, %v1274_v24, %v1290_v59  ;;  %v2764_v17 = vadd.s32 4294967169, %v1149_v39 }
 0x18c   : > { %v1013_v28 = vsub.s32 4294967266, %v3707_v5  ;;  %v1107_v27 = vsub.s32 0, %v3709_v10  ;;  %v1265_v29 = vshrl.u32 %v5119_v32, %v1264_v16  ;;  %vm1282_vm12 = vcmp.lt.s32.totalorder %v1262_v19, 2 }
 0x18d   : > { %vm3720_vm13 = vcmp.le.f32.partialorder %v833_v7, 0.7853982  ;;  %v1292_v1 = vsel %vm1282_vm12, %v1289_v45, %v1291_v61  ;;  %v1293_v43 = vsel %vm1281_vm9, %v1271_v22, %v1274_v24  ;;  %v1294_v8 = vsel %vm1284_vm10, %v1280_v15, 1326507024 }
 0x18e   : > { %v1297_v9 = vshll.u32 %v1257_v55, 8  ;;  %v2761_v23 = vmin.u32 %v1107_v27, %v3709_v10  ;;  %v1285_v31 = vsel %vm1281_vm9, %v1265_v29, %v1268_v12  ;;  %v1287_v16 = vsel %vm1283_vm11, %v1271_v22, %v1286_v60 }
 0x18f   : > { %v1295_v39 = vsel %vm1283_vm11, %v1277_v13, %v1294_v8  ;;  %v1155_v45 = vadd.s32 1, %v2764_v17  ;;  %v919_v24 = vsub.s32 4, %v3516_v41  ;;  %v1014_v61 = vadd.s32 127, %v1013_v28  ;;  %v612_v8 = vpop.f32.mrf.mxu1 }
 0x190   : > { %v1296_v7 = vsel %vm1282_vm12, %v1293_v43, %v1295_v39  ;;  %v3732_v4 = vmul.u32.u64.low %v1297_v9, %v1292_v1  ;;  %v3733_v59 = vmul.u32.u64.high %v1297_v9, %v1292_v1, %v3732_v4  ;;  %v804_v27 = vor.u32 %v803_v58, %v802_v20 }
 0x191   : > { %v3737_v15 = vmul.u32.u64.low %v1297_v9, %v1296_v7  ;;  %v3738_v55 = vmul.u32.u64.high %v1297_v9, %v1296_v7, %v3737_v15  ;;  %v1109_v44 = vclz %v2761_v23  ;;  %v1288_v12 = vsel %vm1282_vm12, %v1285_v31, %v1287_v16 }
 0x192   : > { %vm1156_vm14 = vcmp.gt.s32.totalorder %v1155_v45, 0  ;;  %v3745_v22 = vsel %vm3639_vm15, %v3403_v63, %v3677_v37  ;;  %v918_v13 = vsel %vm835_vm8, %v917_v50, %v3664_v33  ;;  %v809_v60 = vand.u32 2147483647, %v808_v54 }
 0x193   : > { %v1157_v17 = vsel %vm1156_vm14, %v1155_v45, 0  ;;  %v1009_v20 = vsub.s32 32, %v3707_v5  ;;  %v1307_v19 = vadd.s32 1, %v3733_v59  ;;  %v1152_v58 = vand.u32 8388607, %v5105_v3 }
 0x194   : > { %v1159_v28 = vand.u32 31, %v1157_v17  ;;  %v993_v18 = vadd.s32 %v3584_v46, %v3593_v56  ;;  %v1015_v37 = vshll.u32 %v1014_v61, 23  ;;  %v1304_v29 = vmul.u32 %v1297_v9, %v1288_v12 }
 0x195   : > { %vm1306_vm15 = vc.u32 %v3738_v55, %v3732_v4  ;;  %v811_v1 = vcvt.s32.f32 %v804_v27  ;;  %v2762_v33 = vadd.s32 4294967294, %v1109_v44  ;;  %2995 = vcosq.f32 %v3745_v22 }
 0x196   : > { %v1308_v50 = vsel %vm1306_vm15, %v1307_v19, %v3733_v59  ;;  %v1160_v54 = vsub.s32 32, %v1159_v28  ;;  %v3765_v43 = vsel %vm835_vm8, %v919_v24, %v3516_v41  ;;  %v3770_v46 = vsel %vm3720_vm13, %v3405_v2, %v918_v13 }
 0x197   : > { %v1309_v56 = vadd.s32 %v1308_v50, %v1304_v29  ;;  %v3772_v9 = vmul.f32 %v811_v1, %v809_v60  ;;  %v1010_v44 = vshll.u32 %v3628_v0, %v3707_v5  ;;  %v1011_v23 = vshrl.u32 %v993_v18, %v1009_v20 }
 0x198   : > { %v1153_v31 = vor.u32 8388608, %v1152_v58  ;;  %v3776_v16 = vor.u32 4788187, %v1015_v37  ;;  %v1163_v41 = vshrl.u32 %v5115_v36, %v1160_v54  ;;  %v1166_v7 = vshrl.u32 %v5117_v38, %v1160_v54 }
 0x199   : > { %v1310_v39 = vadd.s32 536870912, %v1309_v56  ;;  %vm2763_vm1 = vcmp.lt.s32.totalorder %v2762_v33, 0  ;;  %v3780_v59 = vshrl.u32 %v1157_v17, 5  ;;  %v1169_v45 = vshrl.u32 %v5108_v40, %v1160_v54 }
 0x19a   : > { %v3784_v24 = vadd.f32 %v612_v8, %v3563_v57  ;;  %v1162_v0 = vshll.u32 %v5119_v32, %v1159_v28  ;;  %v1165_v5 = vshll.u32 %v5115_v36, %v1159_v28  ;;  %v1172_v15 = vshrl.u32 %v5112_v42, %v1160_v54 }
 0x19b   : > { %v3786_v61 = vshrl.u32 %v1310_v39, 30  ;;  %v1168_v27 = vshll.u32 %v5117_v38, %v1159_v28  ;;  %v1171_v12 = vshll.u32 %v5108_v40, %v1159_v28  ;;  %v1174_v13 = vshll.u32 %v5112_v42, %v1159_v28 }
 0x19c   : > { %5178 = vst [vmem:[#allocation13_spill] sm:$0xff] %v3784_v24  ;;  %v1175_v60 = vshrl.u32 %v5110_v49, %v1160_v54  ;;  %v3795_v17 = vsel %vm2763_vm1, 0, %v2762_v33  ;;  %v1164_v20 = vor.u32 %v1163_v41, %v1162_v0  ;;  %v1167_v19 = vor.u32 %v1166_v7, %v1165_v5 }
 0x19d   : > { %v1312_v57 = vshll.u32 %v3786_v61, 30  ;;  %v813_v58 = vxor.u32 2147483648, %v3772_v9  ;;  %v1170_v18 = vor.u32 %v1169_v45, %v1168_v27  ;;  %v1173_v37 = vor.u32 %v1172_v15, %v1171_v12 }
 0x19e   : > { %v1176_v29 = vor.u32 %v1175_v60, %v1174_v13  ;;  %vm5163_vm2 = vcmp.lt.s32.totalorder %v3409_v6, 0  ;;  %v1012_v1 = vor.u32 %v1011_v23, %v1010_v44  ;;  %v1017_v50 = vand.u32 2147483647, %v3776_v16 }
 0x19f   : > { %v3801_v8 = vsub.s32 %v1309_v56, %v1312_v57  ;;  %v1193_v28 = vshll.u32 %v1153_v31, 8  ;;  %v1117_v33 = vsub.s32 4294967266, %v3795_v17  ;;  %v1161_v39 = vshrl.u32 %v5119_v32, %v1160_v54 }
 0x1a0   : > { %vm1177_vm3 = vcmp.lt.s32.totalorder %v3780_v59, 1  ;;  %v1356_v41 = vand.u32 2139095040, %v3784_v24  ;;  %vm1179_vm4 = vcmp.lt.s32.totalorder %v3780_v59, 3  ;;  %vm1180_vm5 = vcmp.lt.s32.totalorder %v3780_v59, 4 }
 0x1a1   : > { %v1315_v7 = vsub.s32 0, %v3801_v8  ;;  %v1185_v44 = vsel %vm1177_vm3, %v1164_v20, %v1167_v19  ;;  %v1182_v56 = vsel %vm1180_vm5, %v1170_v18, 2102212464  ;;  %v1186_v23 = vsel %vm1180_vm5, %v1173_v37, 920167782 }
 0x1a2   : > { %v1189_v31 = vsel %vm1177_vm3, %v1167_v19, %v1170_v18  ;;  %v1190_v16 = vsel %vm1180_vm5, %v1176_v29, 1326507024  ;;  %vm1178_vm6 = vcmp.lt.s32.totalorder %v3780_v59, 2  ;;  %v1187_v45 = vsel %vm1179_vm4, %v1170_v18, %v1186_v23  ;;  %v3820_v5 = vpop.eup %2995 }
 0x1a3   : > { %v2769_v54 = vmin.u32 %v1315_v7, %v3801_v8  ;;  %v1191_v0 = vsel %vm1179_vm4, %v1173_v37, %v1190_v16  ;;  %5179 = vst [vmem:[#allocation14_spill] sm:$0xff] %v3820_v5  ;;  %vm3824_vm7 = vcmp.le.f32.partialorder %v729_v62, 0.7853982  ;;  %v1113_v27 = vsub.s32 32, %v3795_v17 }
 0x1a4   : > { %v1188_v12 = vsel %vm1178_vm6, %v1185_v44, %v1187_v45  ;;  %v1192_v13 = vsel %vm1178_vm6, %v1189_v31, %v1191_v0  ;;  %v1357_v60 = vshrl.u32 %v1356_v41, 23  ;;  %v1181_v57 = vsel %vm1177_vm3, %v1161_v39, %v1164_v20  ;;  %v563_v44 = vpop.f32.mrf.mxu0  ;;  %v3847_v39 = vpop.permute.xlu0 %398 }
 0x1a5   : > { %v1183_v18 = vsel %vm1179_vm4, %v1167_v19, %v1182_v56  ;;  %v3837_v37 = vmul.u32.u64.low %v1193_v28, %v1192_v13  ;;  %v3838_v62 = vmul.u32.u64.high %v1193_v28, %v1192_v13, %v3837_v37  ;;  %v1118_v29 = vadd.s32 127, %v1117_v33 }
 0x1a6   : > { %v3840_v7 = vmul.u32.u64.low %v1193_v28, %v1188_v12  ;;  %v3841_v23 = vmul.u32.u64.high %v1193_v28, %v1188_v12, %v3840_v7  ;;  %v2772_v16 = vadd.s32 4294967169, %v1357_v60  ;;  %2997 = vsinq.f32 %v3745_v22 }
 0x1a7   : > { %v1019_v31 = vcvt.s32.f32 %v1012_v1  ;;  %v1097_v41 = vadd.s32 %v3652_v53, %v3662_v26  ;;  %v1317_v20 = vclz %v2769_v54  ;;  %2999 = vcosq.f32 %v3770_v46 }
 0x1a8   : > { %v814_v19 = vsel %vm5163_vm2, %v813_v58, %v3772_v9  ;;  %v1184_v33 = vsel %vm1178_vm6, %v1181_v57, %v1183_v18  ;;  %v1363_v56 = vadd.s32 1, %v2772_v16  ;;  %vm1202_vm8 = vc.u32 %v3838_v62, %v3840_v7 }
 0x1a9   : > { %v3855_v45 = vmul.f32 %v1019_v31, %v1017_v50  ;;  %v1115_v22 = vshrl.u32 %v1097_v41, %v1113_v27  ;;  %v3860_v53 = vadd.f32 %v563_v44, %v3847_v39  ;;  %v1119_v26 = vshll.u32 %v1118_v29, 23 }
 0x1aa   : > { %v1203_v1 = vadd.s32 1, %v3841_v23  ;;  %v5104_v54 = vand.u32 2147483647, %v3784_v24  ;;  %vm1364_vm9 = vcmp.gt.s32.totalorder %v1363_v56, 0  ;;  %v1114_v9 = vshll.u32 %v3709_v10, %v3795_v17 }
 0x1ab   : > { %v2770_v59 = vadd.s32 4294967294, %v1317_v20  ;;  %v1200_v58 = vmul.u32 %v1193_v28, %v1184_v33  ;;  %v1365_v50 = vsel %vm1364_vm9, %v1363_v56, 0  ;;  %v922_v0 = vsel %vm3720_vm13, 0, %v3765_v43  ;;  %v616_v43 = vpop.f32.mrf.mxu1 }
 0x1ac   : > { %3001 = vsinq.f32 %v3770_v46  ;;  %v1204_v27 = vsel %vm1202_vm8, %v1203_v1, %v3841_v23  ;;  %v1367_v12 = vand.u32 31, %v1365_v50  ;;  %v3874_v13 = vsel %vm3824_vm7, %v3409_v6, %v814_v19 }
 0x1ad   : > { %v1021_v60 = vxor.u32 2147483648, %v3855_v45  ;;  %v3877_v10 = vor.u32 %v1115_v22, %v1114_v9  ;;  %v1205_v17 = vadd.s32 %v1204_v27, %v1200_v58  ;;  %v3879_v28 = vor.u32 4788187, %v1119_v26 }
 0x1ae   : > { %v1360_v57 = vand.u32 8388607, %v5104_v54  ;;  %v1368_v18 = vsub.s32 32, %v1367_v12  ;;  %v1460_v46 = vand.u32 2139095040, %v3860_v53  ;;  %vm2771_vm10 = vcmp.lt.s32.totalorder %v2770_v59, 0 }
 0x1af   : > { %v1206_v37 = vadd.s32 536870912, %v1205_v17  ;;  %v1370_v29 = vshll.u32 %v5119_v32, %v1367_v12  ;;  %v1373_v23 = vshll.u32 %v5115_v36, %v1367_v12  ;;  %v1376_v31 = vshll.u32 %v5117_v38, %v1367_v12 }
 0x1b0   : > { %v1371_v16 = vshrl.u32 %v5115_v36, %v1368_v18  ;;  %v1374_v44 = vshrl.u32 %v5117_v38, %v1368_v18  ;;  %v1377_v41 = vshrl.u32 %v5108_v40, %v1368_v18  ;;  %v1366_v19 = vshrl.u32 %v1365_v50, 5 }
 0x1b1   : > { %v3890_v20 = vshrl.u32 %v1206_v37, 30  ;;  %v1379_v33 = vshll.u32 %v5108_v40, %v1367_v12  ;;  %v1380_v56 = vshrl.u32 %v5112_v42, %v1368_v18  ;;  %v1121_v22 = vand.u32 2147483647, %v3879_v28 }
 0x1b2   : > { %v1372_v26 = vor.u32 %v1371_v16, %v1370_v29  ;;  %v1375_v1 = vor.u32 %v1374_v44, %v1373_v23  ;;  %v1378_v9 = vor.u32 %v1377_v41, %v1376_v31  ;;  %v1382_v54 = vshll.u32 %v5112_v42, %v1367_v12 }
 0x1b3   : > { %v1208_v58 = vshll.u32 %v3890_v20, 30  ;;  %v1381_v27 = vor.u32 %v1380_v56, %v1379_v33  ;;  %v1383_v3 = vshrl.u32 %v5110_v49, %v1368_v18  ;;  %v3898_v14 = vpop.eup %2997  ;;  %v3901_v50 = vsel %vm2771_vm10, 0, %v2770_v59 }
 0x1b4   : > { %5182 = vst [vmem:[#allocation15_spill] sm:$0xff] %v3898_v14  ;;  %v1361_v37 = vor.u32 8388608, %v1360_v57  ;;  %v1369_v21 = vshrl.u32 %v5119_v32, %v1368_v18  ;;  %v1461_v40 = vshrl.u32 %v1460_v46, 23  ;;  %v3904_v28 = vpop.eup %2999  ;;  %vm1385_vm11 = vcmp.lt.s32.totalorder %v1366_v19, 1 }
 0x1b5   : > { %5183 = vst [vmem:[#allocation16_spill] sm:$0xff] %v3904_v28  ;;  %v3906_v29 = vsub.s32 %v1205_v17, %v1208_v58  ;;  %v1384_v23 = vor.u32 %v1383_v3, %v1382_v54  ;;  %vm1388_vm12 = vcmp.lt.s32.totalorder %v1366_v19, 4  ;;  %vm5161_vm14 = vcmp.lt.s32.totalorder %v3424_v30, 0 }
 0x1b6   : > { %vm1387_vm15 = vcmp.lt.s32.totalorder %v1366_v19, 3  ;;  %v1390_v12 = vsel %vm1388_vm12, %v1378_v9, 2102212464  ;;  %v1393_v16 = vsel %vm1385_vm11, %v1372_v26, %v1375_v1  ;;  %v1394_v44 = vsel %vm1388_vm12, %v1381_v27, 920167782 }
 0x1b7   : > { %v1211_v59 = vsub.s32 0, %v3906_v29  ;;  %vm1386_vm1 = vcmp.lt.s32.totalorder %v1366_v19, 2  ;;  %v1395_v57 = vsel %vm1387_vm15, %v1378_v9, %v1394_v44  ;;  %v1397_v18 = vsel %vm1385_vm11, %v1375_v1, %v1378_v9 }
 0x1b8   : > { %v1396_v17 = vsel %vm1386_vm1, %v1393_v16, %v1395_v57  ;;  %v1398_v46 = vsel %vm1388_vm12, %v1384_v23, 1326507024  ;;  %v1401_v3 = vshll.u32 %v1361_v37, 8  ;;  %v2776_v54 = vadd.s32 4294967169, %v1461_v40 }
 0x1b9   : > { %v3914_v31 = vpop.eup %3001  ;;  %v2765_v41 = vmin.u32 %v1211_v59, %v3906_v29  ;;  %v1389_v33 = vsel %vm1385_vm11, %v1369_v21, %v1372_v26  ;;  %v1391_v56 = vsel %vm1387_vm15, %v1375_v1, %v1390_v12  ;;  %v1399_v58 = vsel %vm1387_vm15, %v1381_v27, %v1398_v46 }
 0x1ba   : > { %5184 = vst [vmem:[#allocation17_spill] sm:$0xff] %v3914_v31  ;;  %v1325_v49 = vsub.s32 4294967266, %v3901_v50  ;;  %v1400_v44 = vsel %vm1386_vm1, %v1397_v18, %v1399_v58  ;;  %v3922_v9 = vmul.u32.u64.low %v1401_v3, %v1396_v17  ;;  %v3923_v42 = vmul.u32.u64.high %v1401_v3, %v1396_v17, %v3922_v9 }
 0x1bb   : > { %v1123_v40 = vcvt.s32.f32 %v3877_v10  ;;  %v1213_v37 = vclz %v2765_v41  ;;  %v3927_v23 = vmul.u32.u64.low %v1401_v3, %v1400_v44  ;;  %v3928_v16 = vmul.u32.u64.high %v1401_v3, %v1400_v44, %v3927_v23 }
 0x1bc   : > { %v3934_v21 = vadd.s32 3, %v922_v0  ;;  %3003 = vcosq.f32 %v3874_v13  ;;  %v1392_v26 = vsel %vm1386_vm1, %v1389_v33, %v1391_v56  ;;  %v1467_v1 = vadd.s32 1, %v2776_v54  ;;  %v565_v0 = vpop.f32.mrf.mxu0 }
 0x1bd   : > { %3005 = vsinq.f32 %v3874_v13  ;;  %v3939_v27 = vmul.f32 %v1123_v40, %v1121_v22  ;;  %v2766_v10 = vadd.s32 4294967294, %v1213_v37  ;;  %v5114_v12 = vand.u32 2147483647, %v3860_v53 }
 0x1be   : > { %5185 = vst [vmem:[#allocation18_spill] sm:$0xff] %v3934_v21  ;;  %v1321_v59 = vsub.s32 32, %v3901_v50  ;;  %v1326_v57 = vadd.s32 127, %v1325_v49  ;;  %v1411_v51 = vadd.s32 1, %v3923_v42  ;;  %vm1468_vm13 = vcmp.gt.s32.totalorder %v1467_v1, 0 }
 0x1bf   : > { %v3949_v19 = vsel %vm5161_vm14, %v1021_v60, %v3855_v45  ;;  %v1408_v13 = vmul.u32 %v1401_v3, %v1392_v26  ;;  %vm1410_vm3 = vc.u32 %v3928_v16, %v3922_v9  ;;  %v1469_v22 = vsel %vm1468_vm13, %v1467_v1, 0 }
 0x1c0   : > { %v1305_v49 = vadd.s32 %v3732_v4, %v3738_v55  ;;  %vm2767_vm4 = vcmp.lt.s32.totalorder %v2766_v10, 0  ;;  %v1412_v18 = vsel %vm1410_vm3, %v1411_v51, %v3923_v42  ;;  %v1471_v17 = vand.u32 31, %v1469_v22 }
 0x1c1   : > { %v1413_v54 = vadd.s32 %v1412_v18, %v1408_v13  ;;  %v3958_v41 = vadd.f32 %v616_v43, %v3847_v39  ;;  %v3961_v45 = vadd.f32 %v565_v0, %v3847_v39  ;;  %v1327_v3 = vshll.u32 %v1326_v57, 23 }
 0x1c2   : > { %v1323_v60 = vshrl.u32 %v1305_v49, %v1321_v59  ;;  %v1464_v33 = vand.u32 8388607, %v5114_v12  ;;  %v1472_v56 = vsub.s32 32, %v1471_v17  ;;  %v3965_v4 = vsel %vm2767_vm4, 0, %v2766_v10 }
 0x1c3   : > { %v1414_v55 = vadd.s32 536870912, %v1413_v54  ;;  %v3967_v42 = vshrl.u32 %v1469_v22, 5  ;;  %v1474_v58 = vshll.u32 %v5119_v32, %v1471_v17  ;;  %v1477_v40 = vshll.u32 %v5115_v36, %v1471_v17 }
 0x1c4   : > { %v1475_v44 = vshrl.u32 %v5115_v36, %v1472_v56  ;;  %v1478_v37 = vshrl.u32 %v5117_v38, %v1472_v56  ;;  %v5186_v23 = vmov 2102212464   ;;  %v1480_v59 = vshll.u32 %v5117_v38, %v1471_v17 }
 0x1c5   : > { %v1481_v26 = vshrl.u32 %v5186_v23, %v1472_v56  ;;  %v3974_v1 = vshrl.u32 %v1414_v55, 30  ;;  %v1483_v10 = vshll.u32 %v5186_v23, %v1471_v17  ;;  %v5188_v57 = vmov 920167782  }
 0x1c6   : > { %v1484_v51 = vshrl.u32 %v5188_v57, %v1472_v56  ;;  %v1322_v43 = vshll.u32 %v3801_v8, %v3901_v50  ;;  %v1328_v0 = vor.u32 4788187, %v1327_v3  ;;  %v1476_v13 = vor.u32 %v1475_v44, %v1474_v58 }
 0x1c7   : > { %5187 = vst [vmem:[#allocation19_spill] sm:$0xff] %v3974_v1  ;;  %v1479_v22 = vor.u32 %v1478_v37, %v1477_v40  ;;  %v1221_v49 = vsub.s32 4294967266, %v3965_v4  ;;  %v1416_v18 = vshll.u32 %v3974_v1, 30  ;;  %v1482_v12 = vor.u32 %v1481_v26, %v1480_v59 }
 0x1c8   : > { %v1485_v36 = vor.u32 %v1484_v51, %v1483_v10  ;;  %vm1043_vm5 = vcmp.lt.s32.totalorder %v3569_v34, 0  ;;  %v1324_v55 = vor.u32 %v1323_v60, %v1322_v43  ;;  %v1486_v38 = vshll.u32 %v5188_v57, %v1471_v17 }
 0x1c9   : > { %v5189_v46 = vmov 1326507024   ;;  %v1668_v2 = vand.u32 2139095040, %v3958_v41  ;;  %v3987_v28 = vpop.eup %3003  ;;  %v5190_v8 = vand.u32 2147483647, %v3424_v30  ;;  %v5191_v50 = vmov 0 }
 0x1ca   : > { %v1487_v32 = vshrl.u32 %v5189_v46, %v1472_v56  ;;  %v3995_v3 = vsub.s32 %v1413_v54, %v1416_v18  ;;  %v1465_v58 = vor.u32 8388608, %v1464_v33  ;;  %vm1489_vm8 = vcmp.lt.s32.totalorder %v3967_v42, 1  ;;  %v3999_v17 = vpop.eup %3005 }
 0x1cb   : > { %vm3991_vm6 = vcmp.le.f32.partialorder %v5190_v8, 0.7853982  ;;  %vm1492_vm9 = vcmp.lt.s32.totalorder %v3967_v42, 4  ;;  %vm1491_vm10 = vcmp.lt.s32.totalorder %v3967_v42, 3  ;;  %v1497_v44 = vsel %vm1489_vm8, %v1476_v13, %v1479_v22 }
 0x1cc   : > { %v5192_v50 = vsel %vm3991_vm6, 4294967295, %v5191_v50  ;;  %v1488_v60 = vor.u32 %v1487_v32, %v1486_v38  ;;  %v1498_v40 = vsel %vm1492_vm9, %v1485_v36, 920167782  ;;  %v5194_v37 = vand.u32 2147483647, %v3569_v34 }
 0x1cd   : > { %5193 = vst [vmem:[#allocation20_spill] sm:$0xff] %v5192_v50  ;;  %v5195_v26 = vmov 0  ;;  %v1329_v54 = vand.u32 2147483647, %v1328_v0  ;;  %v1222_v33 = vadd.s32 127, %v1221_v49  ;;  %v1419_v59 = vsub.s32 0, %v3995_v3 }
 0x1ce   : > { %vm4006_vm11 = vcmp.le.f32.partialorder %v5194_v37, 0.7853982  ;;  %v1499_v10 = vsel %vm1491_vm10, %v1482_v12, %v1498_v40  ;;  %vm1490_vm12 = vcmp.lt.s32.totalorder %v3967_v42, 2  ;;  %v1494_v32 = vsel %vm1492_vm9, %v1482_v12, 2102212464 }
 0x1cf   : > { %v5196_v26 = vsel %vm4006_vm11, 4294967295, %v5195_v26  ;;  %v1501_v38 = vsel %vm1489_vm8, %v1479_v22, %v1482_v12  ;;  %v1502_v51 = vsel %vm1492_vm9, %v1488_v60, 1326507024  ;;  %v5198_v43 = vmov 683565275  }
 0x1d0   : > { %5197 = vst [vmem:[#allocation21_spill] sm:$0xff] %v5196_v26  ;;  %v1473_v18 = vshrl.u32 %v5198_v43, %v1472_v56  ;;  %v1500_v8 = vsel %vm1490_vm12, %v1497_v44, %v1499_v10  ;;  %v1503_v0 = vsel %vm1491_vm10, %v1485_v36, %v1502_v51  ;;  %v1505_v49 = vshll.u32 %v1465_v58, 8 }
 0x1d1   : > { %v1331_v37 = vcvt.s32.f32 %v1324_v55  ;;  %v2773_v31 = vmin.u32 %v1419_v59, %v3995_v3  ;;  %v1504_v40 = vsel %vm1490_vm12, %v1501_v38, %v1503_v0  ;;  %v1669_v21 = vshrl.u32 %v1668_v2, 23 }
 0x1d2   : > { %vm1251_vm15 = vcmp.lt.s32.totalorder %v3603_v48, 0  ;;  %v1493_v12 = vsel %vm1489_vm8, %v1473_v18, %v1476_v13  ;;  %v1495_v56 = vsel %vm1491_vm10, %v1479_v22, %v1494_v32  ;;  %v1127_v36 = vsub.s32 4, %v3699_v11 }
 0x1d3   : > { %v4029_v60 = vmul.u32.u64.low %v1505_v49, %v1504_v40  ;;  %v4030_v44 = vmul.u32.u64.high %v1505_v49, %v1504_v40, %v4029_v60  ;;  %v1332_v55 = vmul.f32 %v1331_v37, %v1329_v54  ;;  %v5199_v2 = vxor.u32 2147483648, %v3939_v27 }
 0x1d4   : > { %v4033_v58 = vmul.u32.u64.low %v1505_v49, %v1500_v8  ;;  %v4034_v59 = vmul.u32.u64.high %v1505_v49, %v1500_v8, %v4033_v58  ;;  %v1217_v13 = vsub.s32 32, %v3965_v4  ;;  %v1223_v38 = vshll.u32 %v1222_v33, 23 }
 0x1d5   : > { %v1126_v10 = vsel %vm1043_vm5, %v5199_v2, %v3939_v27  ;;  %v2784_v22 = vadd.s32 4294967169, %v1669_v21  ;;  %v1025_v32 = vsel %vm3991_vm6, %v3424_v30, %v3949_v19  ;;  %v1421_v54 = vclz %v2773_v31 }
 0x1d6   : > { %v1496_v51 = vsel %vm1490_vm12, %v1493_v12, %v1495_v56  ;;  %v5124_v18 = vand.u32 2147483647, %v3958_v41  ;;  %v1201_v8 = vadd.s32 %v3840_v7, %v3838_v62  ;;  %vm1514_vm1 = vc.u32 %v4030_v44, %v4033_v58 }
 0x1d7   : > { %v1675_v27 = vadd.s32 1, %v2784_v22  ;;  %v1564_v21 = vand.u32 2139095040, %v3961_v45  ;;  %v4058_v33 = vsel %vm4006_vm11, %v3569_v34, %v1126_v10  ;;  %v1333_v31 = vxor.u32 2147483648, %v1332_v55 }
 0x1d8   : > { %v1335_v19 = vsub.s32 4, %v3786_v61  ;;  %v1515_v42 = vadd.s32 1, %v4034_v59  ;;  %v5200_v0 = vand.u32 2147483647, %v3603_v48  ;;  %v5201_v62 = vmov 0 }
 0x1d9   : > { %v1219_v7 = vshrl.u32 %v1201_v8, %v1217_v13  ;;  %v1224_v37 = vor.u32 4788187, %v1223_v38  ;;  %v1512_v40 = vmul.u32 %v1505_v49, %v1496_v51  ;;  %vm1676_vm3 = vcmp.gt.s32.totalorder %v1675_v27, 0 }
 0x1da   : > { %vm4064_vm13 = vcmp.le.f32.partialorder %v5200_v0, 0.7853982  ;;  %v2774_v12 = vadd.s32 4294967294, %v1421_v54  ;;  %v1516_v56 = vsel %vm1514_vm1, %v1515_v42, %v4034_v59  ;;  %v1672_v60 = vand.u32 8388607, %v5124_v18 }
 0x1db   : > { %v5202_v62 = vsel %vm4064_vm13, 4294967295, %v5201_v62  ;;  %v1677_v2 = vsel %vm1676_vm3, %v1675_v27, 0  ;;  %3007 = vcosq.f32 %v1025_v32  ;;  %v1218_v10 = vshll.u32 %v3906_v29, %v3965_v4 }
 0x1dc   : > { %5203 = vst [vmem:[#allocation22_spill] sm:$0xff] %v5202_v62  ;;  %v1517_v22 = vadd.s32 %v1516_v56, %v1512_v40  ;;  %v1565_v0 = vshrl.u32 %v1564_v21, 23  ;;  %3009 = vsinq.f32 %v1025_v32  ;;  %v4076_v13 = vsel %vm1043_vm5, %v1127_v36, %v3699_v11 }
 0x1dd   : > { %5204 = vst [vmem:[#allocation23_spill] sm:$0xff] %v4076_v13  ;;  %v4081_v49 = vsel %vm1251_vm15, %v1335_v19, %v3786_v61  ;;  %v1679_v59 = vand.u32 31, %v1677_v2  ;;  %3011 = vcosq.f32 %v4058_v33  ;;  %v1334_v38 = vsel %vm1251_vm15, %v1333_v31, %v1332_v55 }
 0x1de   : > { %5205 = vst [vmem:[#allocation24_spill] sm:$0xff] %v4081_v49  ;;  %v1220_v29 = vor.u32 %v1219_v7, %v1218_v10  ;;  %v1518_v4 = vadd.s32 536870912, %v1517_v22  ;;  %v1225_v54 = vand.u32 2147483647, %v1224_v37  ;;  %vm2775_vm4 = vcmp.lt.s32.totalorder %v2774_v12, 0 }
 0x1df   : > { %v1673_v32 = vor.u32 8388608, %v1672_v60  ;;  %v1680_v51 = vsub.s32 32, %v1679_v59  ;;  %v1678_v11 = vshrl.u32 %v1677_v2, 5  ;;  %v1682_v36 = vshll.u32 %v5198_v43, %v1679_v59 }
 0x1e0   : > { %v4086_v8 = vshrl.u32 %v1518_v4, 30  ;;  %v2780_v27 = vadd.s32 4294967169, %v1565_v0  ;;  %v5206_v61 = vmov 2475754826   ;;  %v5207_v42 = vmov 2131351028  }
 0x1e1   : > { %v1683_v21 = vshrl.u32 %v5206_v61, %v1680_v51  ;;  %v1685_v19 = vshll.u32 %v5206_v61, %v1679_v59  ;;  %v1686_v40 = vshrl.u32 %v5207_v42, %v1680_v51  ;;  %v1689_v55 = vshrl.u32 %v5186_v23, %v1680_v51 }
 0x1e2   : > { %v1520_v31 = vshll.u32 %v4086_v8, 30  ;;  %v1688_v7 = vshll.u32 %v5207_v42, %v1679_v59  ;;  %v1691_v37 = vshll.u32 %v5186_v23, %v1679_v59  ;;  %v1692_v56 = vshrl.u32 %v5188_v57, %v1680_v51 }
 0x1e3   : > { %v4100_v60 = vsel %vm4064_vm13, %v3603_v48, %v1334_v38  ;;  %v1227_v2 = vcvt.s32.f32 %v1220_v29  ;;  %v1684_v10 = vor.u32 %v1683_v21, %v1682_v36  ;;  %v1687_v0 = vor.u32 %v1686_v40, %v1685_v19 }
 0x1e4   : > { %v4102_v4 = vsub.s32 %v1517_v22, %v1520_v31  ;;  %v1690_v18 = vor.u32 %v1689_v55, %v1688_v7  ;;  %v1693_v34 = vor.u32 %v1692_v56, %v1691_v37  ;;  %v4106_v14 = vsel %vm2775_vm4, 0, %v2774_v12 }
 0x1e5   : > { %v1228_v5 = vmul.f32 %v1227_v2, %v1225_v54  ;;  %v1694_v25 = vshll.u32 %v5188_v57, %v1679_v59  ;;  %v1695_v50 = vshrl.u32 %v5189_v46, %v1680_v51  ;;  %vm1697_vm5 = vcmp.lt.s32.totalorder %v1678_v11, 1 }
 0x1e6   : > { %v1523_v38 = vsub.s32 0, %v4102_v4  ;;  %v1713_v29 = vshll.u32 %v1673_v32, 8  ;;  %v1571_v36 = vadd.s32 1, %v2780_v27  ;;  %vm5162_vm8 = vcmp.lt.s32.totalorder %v3672_v35, 0 }
 0x1e7   : > { %v1681_v22 = vshrl.u32 %v5198_v43, %v1680_v51  ;;  %v1696_v21 = vor.u32 %v1695_v50, %v1694_v25  ;;  %vm1700_vm9 = vcmp.lt.s32.totalorder %v1678_v11, 4  ;;  %v1705_v54 = vsel %vm1697_vm5, %v1684_v10, %v1687_v0 }
 0x1e8   : > { %v2777_v12 = vmin.u32 %v1523_v38, %v4102_v4  ;;  %vm1699_vm10 = vcmp.lt.s32.totalorder %v1678_v11, 3  ;;  %v1702_v19 = vsel %vm1700_vm9, %v1690_v18, 2102212464  ;;  %v1706_v59 = vsel %vm1700_vm9, %v1693_v34, 920167782  ;;  %v4115_v40 = vpop.eup %3007 }
 0x1e9   : > { %5208 = vst [vmem:[#allocation25_spill] sm:$0xff] %v4115_v40  ;;  %v1429_v55 = vsub.s32 4294967266, %v4106_v14  ;;  %vm1698_vm12 = vcmp.lt.s32.totalorder %v1678_v11, 2  ;;  %v1707_v32 = vsel %vm1699_vm10, %v1690_v18, %v1706_v59  ;;  %v1709_v27 = vsel %vm1697_vm5, %v1687_v0, %v1690_v18  ;;  %v4119_v31 = vpop.eup %3009 }
 0x1ea   : > { %5209 = vst [vmem:[#allocation26_spill] sm:$0xff] %v4119_v31  ;;  %v1525_v51 = vclz %v2777_v12  ;;  %v1701_v25 = vsel %vm1697_vm5, %v1681_v22, %v1684_v10  ;;  %v1708_v50 = vsel %vm1698_vm12, %v1705_v54, %v1707_v32  ;;  %v1710_v7 = vsel %vm1700_vm9, %v1696_v21, 1326507024  ;;  %v4123_v37 = vpop.eup %3011 }
 0x1eb   : > { %5210 = vst [vmem:[#allocation27_spill] sm:$0xff] %v4123_v37  ;;  %v1703_v56 = vsel %vm1699_vm10, %v1687_v0, %v1702_v19  ;;  %v1711_v2 = vsel %vm1699_vm10, %v1693_v34, %v1710_v7  ;;  %v4125_v38 = vmul.u32.u64.low %v1713_v29, %v1708_v50  ;;  %v4126_v63 = vmul.u32.u64.high %v1713_v29, %v1708_v50, %v4125_v38 }
 0x1ec   : > { %v1229_v48 = vxor.u32 2147483648, %v1228_v5  ;;  %v1712_v59 = vsel %vm1698_vm12, %v1709_v27, %v1711_v2  ;;  %v5211_v18 = vand.u32 2147483647, %v3961_v45  ;;  %vm1572_vm15 = vcmp.gt.s32.totalorder %v1571_v36, 0 }
 0x1ed   : > { %v1425_v10 = vsub.s32 32, %v4106_v14  ;;  %v4133_v22 = vmul.u32.u64.low %v1713_v29, %v1712_v59  ;;  %v4134_v54 = vmul.u32.u64.high %v1713_v29, %v1712_v59, %v4133_v22  ;;  %v1573_v21 = vsel %vm1572_vm15, %v1571_v36, 0 }
 0x1ee   : > { %v1568_v40 = vand.u32 8388607, %v5211_v18  ;;  %v1430_v12 = vadd.s32 127, %v1429_v55  ;;  %v2778_v0 = vadd.s32 4294967294, %v1525_v51  ;;  %v1704_v34 = vsel %vm1698_vm12, %v1701_v25, %v1703_v56  ;;  %v618_v22 = vpop.f32.mrf.mxu1 }
 0x1ef   : > { %v1575_v19 = vand.u32 31, %v1573_v21  ;;  %3013 = vsinq.f32 %v4058_v33  ;;  %v1723_v50 = vadd.s32 1, %v4126_v63  ;;  %v4148_v36 = vsel %vm5162_vm8, %v1229_v48, %v1228_v5 }
 0x1f0   : > { %3015 = vcosq.f32 %v4100_v60  ;;  %v1409_v11 = vadd.s32 %v3922_v9, %v3928_v16  ;;  %v1426_v51 = vshll.u32 %v3995_v3, %v4106_v14  ;;  %v1720_v33 = vmul.u32 %v1713_v29, %v1704_v34 }
 0x1f1   : > { %v1576_v55 = vsub.s32 32, %v1575_v19  ;;  %vm1722_vm1 = vc.u32 %v4134_v54, %v4125_v38  ;;  %v1569_v25 = vor.u32 8388608, %v1568_v40  ;;  %v1431_v56 = vshll.u32 %v1430_v12, 23 }
 0x1f2   : > { %v1427_v7 = vshrl.u32 %v1409_v11, %v1425_v10  ;;  %vm2779_vm3 = vcmp.lt.s32.totalorder %v2778_v0, 0  ;;  %v1724_v2 = vsel %vm1722_vm1, %v1723_v50, %v4126_v63  ;;  %v4157_v48 = vshrl.u32 %v1573_v21, 5 }
 0x1f3   : > { %v1725_v59 = vadd.s32 %v1724_v2, %v1720_v33  ;;  %v1579_v5 = vshrl.u32 %v5206_v61, %v1576_v55  ;;  %v1582_v9 = vshrl.u32 %v5207_v42, %v1576_v55  ;;  %v1578_v16 = vshll.u32 %v5198_v43, %v1575_v19 }
 0x1f4   : > { %v1581_v14 = vshll.u32 %v5206_v61, %v1575_v19  ;;  %v1584_v3 = vshll.u32 %v5207_v42, %v1575_v19  ;;  %v1585_v29 = vshrl.u32 %v5186_v23, %v1576_v55  ;;  %v4165_v40 = vsel %vm2779_vm3, 0, %v2778_v0 }
 0x1f5   : > { %v1726_v18 = vadd.s32 536870912, %v1725_v59  ;;  %v1587_v63 = vshll.u32 %v5186_v23, %v1575_v19  ;;  %v1588_v10 = vshrl.u32 %v5188_v57, %v1576_v55  ;;  %v1580_v21 = vor.u32 %v1579_v5, %v1578_v16 }
 0x1f6   : > { %v1583_v12 = vor.u32 %v1582_v9, %v1581_v14  ;;  %v1586_v34 = vor.u32 %v1585_v29, %v1584_v3  ;;  %v4169_v50 = vshll.u32 %v1569_v25, 8  ;;  %v1590_v2 = vshll.u32 %v5188_v57, %v1575_v19 }
 0x1f7   : > { %v4171_v11 = vshrl.u32 %v1726_v18, 30  ;;  %v1589_v33 = vor.u32 %v1588_v10, %v1587_v63  ;;  %v1591_v27 = vshrl.u32 %v5189_v46, %v1576_v55  ;;  %v1428_v0 = vor.u32 %v1427_v7, %v1426_v51 }
 0x1f8   : > { %v1432_v32 = vor.u32 4788187, %v1431_v56  ;;  %v1533_v37 = vsub.s32 4294967266, %v4165_v40  ;;  %v4177_v31 = vadd.f32 %v618_v22, %v3847_v39  ;;  %v5212_v5 = vand.u32 2147483647, %v3672_v35 }
 0x1f9   : > { %v5213_v9 = vmov 0  ;;  %v1728_v25 = vshll.u32 %v4171_v11, 30  ;;  %v1592_v16 = vor.u32 %v1591_v27, %v1590_v2  ;;  %vm1593_vm5 = vcmp.lt.s32.totalorder %v4157_v48, 1 }
 0x1fa   : > { %vm4181_vm4 = vcmp.le.f32.partialorder %v5212_v5, 0.7853982  ;;  %vm1596_vm9 = vcmp.lt.s32.totalorder %v4157_v48, 4  ;;  %v1577_v19 = vshrl.u32 %v5198_v43, %v1576_v55  ;;  %vm1595_vm10 = vcmp.lt.s32.totalorder %v4157_v48, 3 }
 0x1fb   : > { %v5214_v9 = vsel %vm4181_vm4, 4294967295, %v5213_v9  ;;  %v1601_v39 = vsel %vm1593_vm5, %v1580_v21, %v1583_v12  ;;  %v1602_v51 = vsel %vm1596_vm9, %v1589_v33, 920167782  ;;  %v4194_v7 = vsub.s32 %v1725_v59, %v1728_v25 }
 0x1fc   : > { %5215 = vst [vmem:[#allocation28_spill] sm:$0xff] %v5214_v9  ;;  %vm1594_vm12 = vcmp.lt.s32.totalorder %v4157_v48, 2  ;;  %v1598_v27 = vsel %vm1596_vm9, %v1586_v34, 2102212464  ;;  %v1603_v56 = vsel %vm1595_vm10, %v1586_v34, %v1602_v51  ;;  %v4201_v14 = vpop.eup %3013  ;;  %v1529_v55 = vsub.s32 32, %v4165_v40  ;;  %v567_v48 = vpop.f32.mrf.mxu0 }
 0x1fd   : > { %5216 = vst [vmem:[#allocation29_spill] sm:$0xff] %v4201_v14  ;;  %v1534_v3 = vadd.s32 127, %v1533_v37  ;;  %v1604_v29 = vsel %vm1594_vm12, %v1601_v39, %v1603_v56  ;;  %v1772_v18 = vand.u32 2139095040, %v4177_v31  ;;  %v4207_v59 = vpop.eup %3015  ;;  %v1731_v63 = vsub.s32 0, %v4194_v7 }
 0x1fe   : > { %5217 = vst [vmem:[#allocation30_spill] sm:$0xff] %v4207_v59  ;;  %v1597_v10 = vsel %vm1593_vm5, %v1577_v19, %v1580_v21  ;;  %v1605_v22 = vsel %vm1593_vm5, %v1583_v12, %v1586_v34  ;;  %v1606_v2 = vsel %vm1596_vm9, %v1592_v16, 1326507024  ;;  %v1599_v37 = vsel %vm1595_vm10, %v1583_v12, %v1598_v27 }
 0x1ff   : > { %v1607_v5 = vsel %vm1595_vm10, %v1589_v33, %v1606_v2  ;;  %v4221_v25 = vmul.u32.u64.low %v4169_v50, %v1604_v29  ;;  %v4222_v39 = vmul.u32.u64.high %v4169_v50, %v1604_v29, %v4221_v25  ;;  %v1513_v21 = vadd.s32 %v4033_v58, %v4030_v44 }
 0x200   : > { %v2785_v19 = vmin.u32 %v1731_v63, %v4194_v7  ;;  %v1608_v34 = vsel %vm1594_vm12, %v1605_v22, %v1607_v5  ;;  %v5136_v16 = vand.u32 2147483647, %v4177_v31  ;;  %v1433_v51 = vand.u32 2147483647, %v1432_v32 }
 0x201   : > { %v4232_v12 = vmul.u32.u64.low %v4169_v50, %v1608_v34  ;;  %v4233_v27 = vmul.u32.u64.high %v4169_v50, %v1608_v34, %v4232_v12  ;;  %v1773_v33 = vshrl.u32 %v1772_v18, 23  ;;  %v1531_v56 = vshrl.u32 %v1513_v21, %v1529_v55 }
 0x202   : > { %v1535_v29 = vshll.u32 %v1534_v3, 23  ;;  %v1733_v2 = vclz %v2785_v19  ;;  %v1600_v59 = vsel %vm1594_vm12, %v1597_v10, %v1599_v37  ;;  %v1233_v44 = vsel %vm4181_vm4, %v3672_v35, %v4148_v36 }
 0x203   : > { %v1435_v58 = vcvt.s32.f32 %v1428_v0  ;;  %v1619_v63 = vadd.s32 1, %v4222_v39  ;;  %v2788_v32 = vadd.s32 4294967169, %v1773_v33  ;;  %v1530_v22 = vshll.u32 %v4102_v4, %v4165_v40  ;;  %v4252_v0 = vpop.permute.xlu0 %403 }
 0x204   : > { %v1543_v18 = vsub.s32 4, %v4086_v8  ;;  %v2786_v55 = vadd.s32 4294967294, %v1733_v2  ;;  %v1776_v3 = vand.u32 8388607, %v5136_v16  ;;  %v1616_v37 = vmul.u32 %v4169_v50, %v1600_v59 }
 0x205   : > { %v4247_v10 = vmul.f32 %v1435_v58, %v1433_v51  ;;  %vm1618_vm15 = vc.u32 %v4233_v27, %v4221_v25  ;;  %v1779_v36 = vadd.s32 1, %v2788_v32  ;;  %v4254_v5 = vor.u32 %v1531_v56, %v1530_v22 }
 0x206   : > { %v4256_v4 = vor.u32 4788187, %v1535_v29  ;;  %vm2787_vm1 = vcmp.lt.s32.totalorder %v2786_v55, 0  ;;  %v1620_v40 = vsel %vm1618_vm15, %v1619_v63, %v4222_v39  ;;  %3017 = vsinq.f32 %v4100_v60 }
 0x207   : > { %v1621_v21 = vadd.s32 %v1620_v40, %v1616_v37  ;;  %vm1780_vm3 = vcmp.gt.s32.totalorder %v1779_v36, 0  ;;  %v4261_v19 = vadd.f32 %v567_v48, %v4252_v0  ;;  %3019 = vcosq.f32 %v1233_v44 }
 0x208   : > { %vm1459_vm5 = vcmp.lt.s32.totalorder %v3860_v53, 0  ;;  %v1777_v50 = vor.u32 8388608, %v1776_v3  ;;  %v1781_v59 = vsel %vm1780_vm3, %v1779_v36, 0  ;;  %3021 = vsinq.f32 %v1233_v44 }
 0x209   : > { %v4264_v34 = vsel %vm2787_vm1, 0, %v2786_v55  ;;  %v1622_v51 = vadd.s32 536870912, %v1621_v21  ;;  %v1783_v12 = vand.u32 31, %v1781_v59  ;;  %v1437_v33 = vxor.u32 2147483648, %v4247_v10 }
 0x20a   : > { %v4272_v56 = vsel %vm1459_vm5, %v1543_v18, %v4086_v8  ;;  %v1876_v58 = vand.u32 2139095040, %v4261_v19  ;;  %v1741_v63 = vsub.s32 4294967266, %v4264_v34  ;;  %v1782_v32 = vshrl.u32 %v1781_v59, 5 }
 0x20b   : > { %v4274_v29 = vshrl.u32 %v1622_v51, 30  ;;  %v1784_v2 = vsub.s32 32, %v1783_v12  ;;  %v1786_v22 = vshll.u32 %v5198_v43, %v1783_v12  ;;  %v4280_v55 = vshll.u32 %v1777_v50, 8 }
 0x20c   : > { %v1789_v8 = vshll.u32 %v5206_v61, %v1783_v12  ;;  %v1792_v37 = vshll.u32 %v5207_v42, %v1783_v12  ;;  %v1795_v40 = vshll.u32 %v5186_v23, %v1783_v12  ;;  %vm5152_vm9 = vcmp.lt.s32.totalorder %v3784_v24, 0 }
 0x20d   : > { %v1624_v3 = vshll.u32 %v4274_v29, 30  ;;  %v1787_v48 = vshrl.u32 %v5206_v61, %v1784_v2  ;;  %v1790_v18 = vshrl.u32 %v5207_v42, %v1784_v2  ;;  %v1793_v36 = vshrl.u32 %v5186_v23, %v1784_v2 }
 0x20e   : > { %v1796_v59 = vshrl.u32 %v5188_v57, %v1784_v2  ;;  %v1877_v60 = vshrl.u32 %v1876_v58, 23  ;;  %v1798_v14 = vshll.u32 %v5188_v57, %v1783_v12  ;;  %v1799_v49 = vshrl.u32 %v5189_v46, %v1784_v2 }
 0x20f   : > { %v4291_v50 = vsub.s32 %v1621_v21, %v1624_v3  ;;  %v1788_v51 = vor.u32 %v1787_v48, %v1786_v22  ;;  %v1791_v16 = vor.u32 %v1790_v18, %v1789_v8  ;;  %v1794_v39 = vor.u32 %v1793_v36, %v1792_v37 }
 0x210   : > { %v1797_v44 = vor.u32 %v1796_v59, %v1795_v40  ;;  %v1737_v62 = vsub.s32 32, %v4264_v34  ;;  %v1742_v13 = vadd.s32 127, %v1741_v63  ;;  %v1785_v1 = vshrl.u32 %v5198_v43, %v1784_v2 }
 0x211   : > { %v1627_v26 = vsub.s32 0, %v4291_v50  ;;  %v1800_v30 = vor.u32 %v1799_v49, %v1798_v14  ;;  %vm1801_vm10 = vcmp.lt.s32.totalorder %v1782_v32, 1  ;;  %vm1803_vm12 = vcmp.lt.s32.totalorder %v1782_v32, 3 }
 0x212   : > { %vm1804_vm15 = vcmp.lt.s32.totalorder %v1782_v32, 4  ;;  %v1809_v22 = vsel %vm1801_vm10, %v1788_v51, %v1791_v16  ;;  %vm1802_vm1 = vcmp.lt.s32.totalorder %v1782_v32, 2  ;;  %v1813_v8 = vsel %vm1801_vm10, %v1791_v16, %v1794_v39 }
 0x213   : > { %v2781_v21 = vmin.u32 %v1627_v26, %v4291_v50  ;;  %v1806_v58 = vsel %vm1804_vm15, %v1794_v39, 2102212464  ;;  %v1810_v3 = vsel %vm1804_vm15, %v1797_v44, 920167782  ;;  %v4299_v48 = vpop.eup %3017  ;;  %v2792_v63 = vadd.s32 4294967169, %v1877_v60 }
 0x214   : > { %5218 = vst [vmem:[#allocation31_spill] sm:$0xff] %v4299_v48  ;;  %v1811_v12 = vsel %vm1803_vm12, %v1794_v39, %v1810_v3  ;;  %v4302_v18 = vpop.eup %3019  ;;  %v1805_v2 = vsel %vm1801_vm10, %v1785_v1, %v1788_v51  ;;  %v1814_v14 = vsel %vm1804_vm15, %v1800_v30, 1326507024  ;;  %v1807_v26 = vsel %vm1803_vm12, %v1791_v16, %v1806_v58 }
 0x215   : > { %5219 = vst [vmem:[#allocation32_spill] sm:$0xff] %v4302_v18  ;;  %v1629_v37 = vclz %v2781_v21  ;;  %v1812_v49 = vsel %vm1802_vm1, %v1809_v22, %v1811_v12  ;;  %v4305_v36 = vpop.eup %3021  ;;  %v1815_v40 = vsel %vm1803_vm12, %v1797_v44, %v1814_v14  ;;  %v1743_v39 = vshll.u32 %v1742_v13, 23  ;;  %v620_v21 = vpop.f32.mrf.mxu1 }
 0x216   : > { %5220 = vst [vmem:[#allocation33_spill] sm:$0xff] %v4305_v36  ;;  %v4310_v59 = vmul.u32.u64.low %v4280_v55, %v1812_v49  ;;  %v4311_v48 = vmul.u32.u64.high %v4280_v55, %v1812_v49, %v4310_v59  ;;  %v1816_v3 = vsel %vm1802_vm1, %v1813_v8, %v1815_v40  ;;  %v5221_v1 = vand.u32 2147483647, %v4261_v19 }
 0x217   : > { %v2782_v60 = vadd.s32 4294967294, %v1629_v37  ;;  %v4320_v30 = vsel %vm5152_vm9, %v1437_v33, %v4247_v10  ;;  %v1721_v16 = vadd.s32 %v4125_v38, %v4134_v54  ;;  %v5222_v13 = vand.u32 2147483647, %v4256_v4 }
 0x218   : > { %v1880_v51 = vand.u32 8388607, %v5221_v1  ;;  %v4325_v44 = vmul.u32.u64.low %v4280_v55, %v1816_v3  ;;  %v4326_v58 = vmul.u32.u64.high %v4280_v55, %v1816_v3, %v4325_v44  ;;  %v5223_v22 = vcvt.s32.f32 %v4254_v5  ;;  %v569_v5 = vpop.f32.mrf.mxu0 }
 0x219   : > { %vm2783_vm3 = vcmp.lt.s32.totalorder %v2782_v60, 0  ;;  %v1808_v8 = vsel %vm1802_vm1, %v1805_v2, %v1807_v26  ;;  %v1883_v37 = vadd.s32 1, %v2792_v63  ;;  %v1739_v49 = vshrl.u32 %v1721_v16, %v1737_v62 }
 0x21a   : > { %v4332_v12 = vmul.f32 %v5223_v22, %v5222_v13  ;;  %v4335_v10 = vsel %vm2783_vm3, 0, %v2782_v60  ;;  %v1827_v33 = vadd.s32 1, %v4311_v48  ;;  %v4339_v38 = vadd.f32 %v620_v21, %v4252_v0 }
 0x21b   : > { %v4341_v54 = vor.u32 4788187, %v1743_v39  ;;  %v1637_v4 = vsub.s32 4294967266, %v4335_v10  ;;  %v1881_v14 = vor.u32 8388608, %v1880_v51  ;;  %vm1884_vm10 = vcmp.gt.s32.totalorder %v1883_v37, 0 }
 0x21c   : > { %v1633_v40 = vsub.s32 32, %v4335_v10  ;;  %v1824_v32 = vmul.u32 %v4280_v55, %v1808_v8  ;;  %vm1826_vm12 = vc.u32 %v4326_v58, %v4310_v59  ;;  %v1885_v62 = vsel %vm1884_vm10, %v1883_v37, 0 }
 0x21d   : > { %v1738_v2 = vshll.u32 %v4194_v7, %v4264_v34  ;;  %v1638_v26 = vadd.s32 127, %v1637_v4  ;;  %v1828_v39 = vsel %vm1826_vm12, %v1827_v33, %v4311_v48  ;;  %v1617_v60 = vadd.s32 %v4221_v25, %v4233_v27 }
 0x21e   : > { %v1829_v3 = vadd.s32 %v1828_v39, %v1824_v32  ;;  %v1887_v1 = vand.u32 31, %v1885_v62  ;;  %v4355_v51 = vadd.f32 %v569_v5, %v4252_v0  ;;  %v1634_v16 = vshll.u32 %v4291_v50, %v4335_v10 }
 0x21f   : > { %v4357_v55 = vor.u32 %v1739_v49, %v1738_v2  ;;  %v4362_v44 = vshll.u32 %v1881_v14, 8  ;;  %v1635_v7 = vshrl.u32 %v1617_v60, %v1633_v40  ;;  %v2084_v13 = vand.u32 2139095040, %v4339_v38 }
 0x220   : > { %v1830_v34 = vadd.s32 536870912, %v1829_v3  ;;  %v1888_v48 = vsub.s32 32, %v1887_v1  ;;  %v1639_v25 = vshll.u32 %v1638_v26, 23  ;;  %v1886_v27 = vshrl.u32 %v1885_v62, 5 }
 0x221   : > { %v1890_v22 = vshll.u32 %v5198_v43, %v1887_v1  ;;  %v1893_v8 = vshll.u32 %v5206_v61, %v1887_v1  ;;  %v1896_v50 = vshll.u32 %v5207_v42, %v1887_v1  ;;  %v1899_v4 = vshll.u32 %v5186_v23, %v1887_v1 }
 0x222   : > { %v4367_v37 = vshrl.u32 %v1830_v34, 30  ;;  %v1891_v49 = vshrl.u32 %v5206_v61, %v1888_v48  ;;  %v1894_v33 = vshrl.u32 %v5207_v42, %v1888_v48  ;;  %v1897_v10 = vshrl.u32 %v5186_v23, %v1888_v48 }
 0x223   : > { %v1900_v14 = vshrl.u32 %v5188_v57, %v1888_v48  ;;  %v1902_v5 = vshll.u32 %v5188_v57, %v1887_v1  ;;  %v5224_v40 = vand.u32 2147483647, %v3784_v24  ;;  %v5225_v32 = vmov 0 }
 0x224   : > { %v1832_v62 = vshll.u32 %v4367_v37, 30  ;;  %v1892_v2 = vor.u32 %v1891_v49, %v1890_v22  ;;  %v1895_v26 = vor.u32 %v1894_v33, %v1893_v8  ;;  %v1903_v39 = vshrl.u32 %v5189_v46, %v1888_v48 }
 0x225   : > { %vm4378_vm15 = vcmp.le.f32.partialorder %v5224_v40, 0.7853982  ;;  %v1898_v60 = vor.u32 %v1897_v10, %v1896_v50  ;;  %v1901_v34 = vor.u32 %v1900_v14, %v1899_v4  ;;  %vm1905_vm1 = vcmp.lt.s32.totalorder %v1886_v27, 1 }
 0x226   : > { %v5226_v32 = vsel %vm4378_vm15, 4294967295, %v5225_v32  ;;  %vm1906_vm3 = vcmp.lt.s32.totalorder %v1886_v27, 2  ;;  %v1640_v21 = vor.u32 4788187, %v1639_v25  ;;  %v4384_v63 = vsub.s32 %v1829_v3, %v1832_v62 }
 0x227   : > { %5227 = vst [vmem:[#allocation34_spill] sm:$0xff] %v5226_v32  ;;  %v1904_v1 = vor.u32 %v1903_v39, %v1902_v5  ;;  %vm1908_vm10 = vcmp.lt.s32.totalorder %v1886_v27, 4  ;;  %vm1907_vm12 = vcmp.lt.s32.totalorder %v1886_v27, 3  ;;  %v1913_v47 = vsel %vm1905_vm1, %v1892_v2, %v1895_v26 }
 0x228   : > { %v1910_v40 = vsel %vm1908_vm10, %v1898_v60, 2102212464  ;;  %v1914_v18 = vsel %vm1908_vm10, %v1901_v34, 920167782  ;;  %v5228_v36 = vand.u32 2147483647, %v3860_v53  ;;  %v1889_v49 = vshrl.u32 %v5198_v43, %v1888_v48 }
 0x229   : > { %v1835_v8 = vsub.s32 0, %v4384_v63  ;;  %v1915_v3 = vsel %vm1907_vm12, %v1898_v60, %v1914_v18  ;;  %v1917_v25 = vsel %vm1905_vm1, %v1895_v26, %v1898_v60  ;;  %vm1667_vm9 = vcmp.lt.s32.totalorder %v3958_v41, 0 }
 0x22a   : > { %vm4389_vm0 = vcmp.le.f32.partialorder %v5228_v36, 0.7853982  ;;  %v1636_v33 = vor.u32 %v1635_v7, %v1634_v16  ;;  %v1916_v50 = vsel %vm1906_vm3, %v1913_v47, %v1915_v3  ;;  %v1918_v10 = vsel %vm1908_vm10, %v1904_v1, 1326507024 }
 0x22b   : > { %v2085_v4 = vshrl.u32 %v2084_v13, 23  ;;  %v2789_v36 = vmin.u32 %v1835_v8, %v4384_v63  ;;  %v1909_v14 = vsel %vm1905_vm1, %v1889_v49, %v1892_v2  ;;  %v1911_v5 = vsel %vm1907_vm12, %v1895_v26, %v1910_v40 }
 0x22c   : > { %v1919_v62 = vsel %vm1907_vm12, %v1901_v34, %v1918_v10  ;;  %v1641_v48 = vand.u32 2147483647, %v1640_v21  ;;  %v4405_v39 = vmul.u32.u64.low %v4362_v44, %v1916_v50  ;;  %v4406_v60 = vmul.u32.u64.high %v4362_v44, %v1916_v50, %v4405_v39 }
 0x22d   : > { %v1920_v18 = vsel %vm1906_vm3, %v1917_v25, %v1919_v62  ;;  %v5231_v47 = vand.u32 2147483647, %v3958_v41  ;;  %v1747_v7 = vcvt.s32.f32 %v4357_v55  ;;  %v1837_v13 = vclz %v2789_v36 }
 0x22e   : > { %v4417_v2 = vmul.u32.u64.low %v4362_v44, %v1920_v18  ;;  %v4418_v26 = vmul.u32.u64.high %v4362_v44, %v1920_v18, %v4417_v2  ;;  %v1441_v21 = vsel %vm4378_vm15, %v3784_v24, %v4320_v30  ;;  %v1643_v34 = vcvt.s32.f32 %v1636_v33 }
 0x22f   : > { %vm4411_vm10 = vcmp.le.f32.partialorder %v5231_v47, 0.7853982  ;;  %v1912_v1 = vsel %vm1906_vm3, %v1909_v14, %v1911_v5  ;;  %v2800_v40 = vadd.s32 4294967169, %v2085_v4  ;;  %v5234_v8 = vxor.u32 2147483648, %v4332_v12 }
 0x230   : > { %v5235_v49 = vand.u32 2147483647, %v4341_v54  ;;  %v1751_v25 = vsub.s32 4, %v4171_v11  ;;  %vm1563_vm1 = vcmp.lt.s32.totalorder %v3961_v45, 0  ;;  %v2790_v50 = vadd.s32 4294967294, %v1837_v13 }
 0x231   : > { %v1542_v55 = vsel %vm1459_vm5, %v5234_v8, %v4332_v12  ;;  %v1644_v10 = vmul.f32 %v1643_v34, %v1641_v48  ;;  %v1931_v30 = vadd.s32 1, %v4406_v60  ;;  %v5154_v27 = vand.u32 2147483647, %v4339_v38 }
 0x232   : > { %v1748_v3 = vmul.f32 %v1747_v7, %v5235_v49  ;;  %v2091_v33 = vadd.s32 1, %v2800_v40  ;;  %vm2791_vm3 = vcmp.lt.s32.totalorder %v2790_v50, 0  ;;  %v1928_v4 = vmul.u32 %v4362_v44, %v1912_v1 }
 0x233   : > { %vm1930_vm5 = vc.u32 %v4418_v26, %v4405_v39  ;;  %v1980_v12 = vand.u32 2139095040, %v4355_v51  ;;  %3023 = vcosq.f32 %v1441_v21  ;;  %v1546_v54 = vsel %vm4389_vm0, 0, %v4272_v56 }
 0x234   : > { %v1932_v36 = vsel %vm1930_vm5, %v1931_v30, %v4406_v60  ;;  %vm2092_vm12 = vcmp.gt.s32.totalorder %v2091_v33, 0  ;;  %v1545_v14 = vsel %vm4389_vm0, %v3860_v53, %v1542_v55  ;;  %v1749_v5 = vxor.u32 2147483648, %v1748_v3 }
 0x235   : > { %v4450_v44 = vsel %vm1667_vm9, %v1751_v25, %v4171_v11  ;;  %v1933_v62 = vadd.s32 %v1932_v36, %v1928_v4  ;;  %v1645_v48 = vxor.u32 2147483648, %v1644_v10  ;;  %v4452_v18 = vsel %vm2791_vm3, 0, %v2790_v50 }
 0x236   : > { %v2088_v56 = vand.u32 8388607, %v5154_v27  ;;  %v2093_v47 = vsel %vm2092_vm12, %v2091_v33, 0  ;;  %3025 = vsinq.f32 %v1441_v21  ;;  %v5153_v7 = vand.u32 2147483647, %v4355_v51 }
 0x237   : > { %v1934_v60 = vadd.s32 536870912, %v1933_v62  ;;  %v1981_v22 = vshrl.u32 %v1980_v12, 23  ;;  %3027 = vcosq.f32 %v1545_v14  ;;  %v4457_v13 = vadd.s32 3, %v1546_v54 }
 0x238   : > { %v2095_v2 = vand.u32 31, %v2093_v47  ;;  %3029 = vsinq.f32 %v1545_v14  ;;  %v4464_v34 = vsel %vm1667_vm9, %v1749_v5, %v1748_v3  ;;  %v1845_v1 = vsub.s32 4294967266, %v4452_v18 }
 0x239   : > { %v4467_v21 = vshrl.u32 %v1934_v60, 30  ;;  %v4471_v40 = vsel %vm1563_vm1, %v1645_v48, %v1644_v10  ;;  %v1825_v8 = vadd.s32 %v4310_v59, %v4326_v58  ;;  %v2089_v55 = vor.u32 8388608, %v2088_v56 }
 0x23a   : > { %v2096_v49 = vsub.s32 32, %v2095_v2  ;;  %v2098_v50 = vshll.u32 %v5198_v43, %v2095_v2  ;;  %v2796_v30 = vadd.s32 4294967169, %v1981_v22  ;;  %v4479_v3 = vand.u32 8388607, %v5153_v7 }
 0x23b   : > { %v1936_v25 = vshll.u32 %v4467_v21, 30  ;;  %v2101_v4 = vshll.u32 %v5206_v61, %v2095_v2  ;;  %v1846_v59 = vadd.s32 127, %v1845_v1  ;;  %v2094_v54 = vshrl.u32 %v2093_v47, 5 }
 0x23c   : > { %v2099_v33 = vshrl.u32 %v5206_v61, %v2096_v49  ;;  %v2102_v10 = vshrl.u32 %v5207_v42, %v2096_v49  ;;  %v2105_v12 = vshrl.u32 %v5186_v23, %v2096_v49  ;;  %v2104_v36 = vshll.u32 %v5207_v42, %v2095_v2 }
 0x23d   : > { %v4485_v58 = vsub.s32 %v1933_v62, %v1936_v25  ;;  %v1841_v14 = vsub.s32 32, %v4452_v18  ;;  %v4489_v56 = vshll.u32 %v2089_v55, 8  ;;  %v2107_v7 = vshll.u32 %v5186_v23, %v2095_v2 }
 0x23e   : > { %v2100_v5 = vor.u32 %v2099_v33, %v2098_v50  ;;  %v2103_v48 = vor.u32 %v2102_v10, %v2101_v4  ;;  %v2106_v22 = vor.u32 %v2105_v12, %v2104_v36  ;;  %v2108_v11 = vshrl.u32 %v5188_v57, %v2096_v49 }
 0x23f   : > { %v1939_v60 = vsub.s32 0, %v4485_v58  ;;  %v2110_v1 = vshll.u32 %v5188_v57, %v2095_v2  ;;  %v2111_v62 = vshrl.u32 %v5189_v46, %v2096_v49  ;;  %v1985_v47 = vor.u32 8388608, %v4479_v3 }
 0x240   : > { %v1987_v25 = vadd.s32 1, %v2796_v30  ;;  %v4497_v27 = vpop.eup %3023  ;;  %v1847_v50 = vshll.u32 %v1846_v59, 23  ;;  %v2109_v33 = vor.u32 %v2108_v11, %v2107_v7  ;;  %vm2113_vm0 = vcmp.lt.s32.totalorder %v2094_v54, 1 }
 0x241   : > { %5236 = vst [vmem:[#allocation35_spill] sm:$0xff] %v4497_v27  ;;  %v2793_v55 = vmin.u32 %v1939_v60, %v4485_v58  ;;  %v2097_v4 = vshrl.u32 %v5198_v43, %v2096_v49  ;;  %v2112_v10 = vor.u32 %v2111_v62, %v2110_v1  ;;  %vm2116_vm9 = vcmp.lt.s32.totalorder %v2094_v54, 4 }
 0x242   : > { %v2121_v12 = vsel %vm2113_vm0, %v2100_v5, %v2103_v48  ;;  %vm2115_vm3 = vcmp.lt.s32.totalorder %v2094_v54, 3  ;;  %v2118_v2 = vsel %vm2116_vm9, %v2106_v22, 2102212464  ;;  %v2122_v32 = vsel %vm2116_vm9, %v2109_v33, 920167782 }
 0x243   : > { %v1941_v36 = vclz %v2793_v55  ;;  %v4502_v24 = vpop.eup %3025  ;;  %v1843_v30 = vshrl.u32 %v1825_v8, %v1841_v14  ;;  %vm2114_vm5 = vcmp.lt.s32.totalorder %v2094_v54, 2  ;;  %v2123_v3 = vsel %vm2115_vm3, %v2106_v22, %v2122_v32  ;;  %v622_v14 = vpop.f32.mrf.mxu1 }
 0x244   : > { %5237 = vst [vmem:[#allocation36_spill] sm:$0xff] %v4502_v24  ;;  %v2125_v59 = vsel %vm2113_vm0, %v2103_v48, %v2106_v22  ;;  %v4505_v60 = vpop.eup %3027  ;;  %v2117_v11 = vsel %vm2113_vm0, %v2097_v4, %v2100_v5  ;;  %v2124_v49 = vsel %vm2114_vm5, %v2121_v12, %v2123_v3  ;;  %v2126_v1 = vsel %vm2116_vm9, %v2112_v10, 1326507024 }
 0x245   : > { %v2794_v7 = vadd.s32 4294967294, %v1941_v36  ;;  %v4509_v62 = vpop.eup %3029  ;;  %v2119_v55 = vsel %vm2115_vm3, %v2103_v48, %v2118_v2  ;;  %v2127_v27 = vsel %vm2115_vm3, %v2109_v33, %v2126_v1  ;;  %v1848_v32 = vor.u32 4788187, %v1847_v50 }
 0x246   : > { %v4512_v9 = vmul.u32.u64.low %v4489_v56, %v2124_v49  ;;  %v4513_v24 = vmul.u32.u64.high %v4489_v56, %v2124_v49, %v4512_v9  ;;  %v2128_v8 = vsel %vm2114_vm5, %v2125_v59, %v2127_v27  ;;  %vm1988_vm14 = vcmp.gt.s32.totalorder %v1987_v25, 0 }
 0x247   : > { %vm2795_vm12 = vcmp.lt.s32.totalorder %v2794_v7, 0  ;;  %v4518_v5 = vmul.u32.u64.low %v4489_v56, %v2128_v8  ;;  %v4519_v4 = vmul.u32.u64.high %v4489_v56, %v2128_v8, %v4518_v5  ;;  %v1989_v10 = vsel %vm1988_vm14, %v1987_v25, 0 }
 0x248   : > { %v1944_v22 = vsel %vm2795_vm12, 0, %v2794_v7  ;;  %v1842_v48 = vshll.u32 %v4384_v63, %v4452_v18  ;;  %v2120_v36 = vsel %vm2114_vm5, %v2117_v11, %v2119_v55  ;;  %v1929_v50 = vadd.s32 %v4405_v39, %v4418_v26 }
 0x249   : > { %v1945_v33 = vsub.s32 32, %v1944_v22  ;;  %v1949_v12 = vsub.s32 4294967266, %v1944_v22  ;;  %v2139_v27 = vadd.s32 1, %v4513_v24  ;;  %v1991_v2 = vand.u32 31, %v1989_v10 }
 0x24a   : > { %v4528_v3 = vadd.f32 %v622_v14, %v4252_v0  ;;  %v1844_v59 = vor.u32 %v1843_v30, %v1842_v48  ;;  %v1849_v7 = vand.u32 2147483647, %v1848_v32  ;;  %v4530_v25 = vshll.u32 %v1985_v47, 8 }
 0x24b   : > { %v1950_v49 = vadd.s32 127, %v1949_v12  ;;  %v1947_v1 = vshrl.u32 %v1929_v50, %v1945_v33  ;;  %v2136_v63 = vmul.u32 %v4489_v56, %v2120_v36  ;;  %vm2138_vm14 = vc.u32 %v4519_v4, %v4512_v9 }
 0x24c   : > { %v1992_v18 = vsub.s32 32, %v1991_v2  ;;  %v1946_v39 = vshll.u32 %v4485_v58, %v1944_v22  ;;  %v2140_v54 = vsel %vm2138_vm14, %v2139_v27, %v4513_v24  ;;  %v1990_v11 = vshrl.u32 %v1989_v10, 5 }
 0x24d   : > { %v1951_v26 = vshll.u32 %v1950_v49, 23  ;;  %v2141_v0 = vadd.s32 %v2140_v54, %v2136_v63  ;;  %v1994_v30 = vshll.u32 %v5198_v43, %v1991_v2  ;;  %v1997_v56 = vshll.u32 %v5206_v61, %v1991_v2 }
 0x24e   : > { %v1995_v55 = vshrl.u32 %v5206_v61, %v1992_v18  ;;  %v1998_v47 = vshrl.u32 %v5207_v42, %v1992_v18  ;;  %v2000_v8 = vshll.u32 %v5207_v42, %v1991_v2  ;;  %v2001_v14 = vshrl.u32 %v5186_v23, %v1992_v18 }
 0x24f   : > { %v1952_v32 = vor.u32 4788187, %v1951_v26  ;;  %v1851_v5 = vcvt.s32.f32 %v1844_v59  ;;  %v1948_v58 = vor.u32 %v1947_v1, %v1946_v39  ;;  %v2142_v22 = vadd.s32 536870912, %v2141_v0 }
 0x250   : > { %v1996_v48 = vor.u32 %v1995_v55, %v1994_v30  ;;  %v1999_v24 = vor.u32 %v1998_v47, %v1997_v56  ;;  %v2002_v10 = vor.u32 %v2001_v14, %v2000_v8  ;;  %v2003_v33 = vshll.u32 %v5186_v23, %v1991_v2 }
 0x251   : > { %v2004_v12 = vshrl.u32 %v5188_v57, %v1992_v18  ;;  %v5238_v36 = vand.u32 2147483647, %v3961_v45  ;;  %v1852_v27 = vmul.f32 %v1851_v5, %v1849_v7  ;;  %v4551_v49 = vshrl.u32 %v2142_v22, 30 }
 0x252   : > { %v2006_v59 = vshll.u32 %v5188_v57, %v1991_v2  ;;  %v2007_v1 = vshrl.u32 %v5189_v46, %v1992_v18  ;;  %v1953_v63 = vand.u32 2147483647, %v1952_v32  ;;  %vm2009_vm9 = vcmp.lt.s32.totalorder %v1990_v11, 1 }
 0x253   : > { %vm4547_vm0 = vcmp.le.f32.partialorder %v5238_v36, 0.7853982  ;;  %v2005_v39 = vor.u32 %v2004_v12, %v2003_v33  ;;  %vm2010_vm3 = vcmp.lt.s32.totalorder %v1990_v11, 2  ;;  %vm1771_vm5 = vcmp.lt.s32.totalorder %v4177_v31, 0 }
 0x254   : > { %v1955_v26 = vcvt.s32.f32 %v1948_v58  ;;  %v2144_v54 = vshll.u32 %v4551_v49, 30  ;;  %v2008_v30 = vor.u32 %v2007_v1, %v2006_v59  ;;  %vm2012_vm12 = vcmp.lt.s32.totalorder %v1990_v11, 4 }
 0x255   : > { %vm2011_vm14 = vcmp.lt.s32.totalorder %v1990_v11, 3  ;;  %v2014_v55 = vsel %vm2012_vm12, %v2002_v10, 2102212464  ;;  %v2017_v7 = vsel %vm2009_vm9, %v1996_v48, %v1999_v24  ;;  %v2018_v47 = vsel %vm2012_vm12, %v2005_v39, 920167782 }
 0x256   : > { %v4558_v56 = vsub.s32 %v2141_v0, %v2144_v54  ;;  %v1993_v2 = vshrl.u32 %v5198_v43, %v1992_v18  ;;  %v2019_v32 = vsel %vm2011_vm14, %v2002_v10, %v2018_v47  ;;  %v2021_v8 = vsel %vm2009_vm9, %v1999_v24, %v2002_v10 }
 0x257   : > { %v5241_v14 = vand.u32 2147483647, %v4177_v31  ;;  %v1956_v58 = vmul.f32 %v1955_v26, %v1953_v63  ;;  %v2020_v22 = vsel %vm2010_vm3, %v2017_v7, %v2019_v32  ;;  %v2022_v33 = vsel %vm2012_vm12, %v2008_v30, 1326507024 }
 0x258   : > { %v2188_v12 = vand.u32 2139095040, %v4528_v3  ;;  %v2147_v0 = vsub.s32 0, %v4558_v56  ;;  %v2013_v18 = vsel %vm2009_vm9, %v1993_v2, %v1996_v48  ;;  %v2015_v36 = vsel %vm2011_vm14, %v1999_v24, %v2014_v55 }
 0x259   : > { %vm4565_vm8 = vcmp.le.f32.partialorder %v5241_v14, 0.7853982  ;;  %v2023_v10 = vsel %vm2011_vm14, %v2005_v39, %v2022_v33  ;;  %v1853_v59 = vxor.u32 2147483648, %v1852_v27  ;;  %v4585_v63 = vsel %vm4411_vm10, %v3958_v41, %v4464_v34 }
 0x25a   : > { %v2024_v1 = vsel %vm2010_vm3, %v2021_v8, %v2023_v10  ;;  %v4577_v54 = vmul.u32.u64.low %v4530_v25, %v2020_v22  ;;  %v4578_v47 = vmul.u32.u64.high %v4530_v25, %v2020_v22, %v4577_v54  ;;  %v2801_v48 = vmin.u32 %v2147_v0, %v4558_v56 }
 0x25b   : > { %v4589_v24 = vmul.u32.u64.low %v4530_v25, %v2024_v1  ;;  %v4590_v26 = vmul.u32.u64.high %v4530_v25, %v2024_v1, %v4589_v24  ;;  %v1649_v39 = vsel %vm4547_vm0, %v3961_v45, %v4471_v40  ;;  %v1959_v30 = vsub.s32 4, %v4467_v21 }
 0x25c   : > { %v2016_v55 = vsel %vm2010_vm3, %v2013_v18, %v2015_v36  ;;  %v2189_v7 = vshrl.u32 %v2188_v12, 23  ;;  %v5244_v2 = vand.u32 2147483647, %v4261_v19  ;;  %vm1875_vm12 = vcmp.lt.s32.totalorder %v4261_v19, 0 }
 0x25d   : > { %v1957_v32 = vxor.u32 2147483648, %v1956_v58  ;;  %v2149_v8 = vclz %v2801_v48  ;;  %3031 = vcosq.f32 %v4585_v63  ;;  %v1854_v40 = vsel %vm1771_vm5, %v1853_v59, %v1852_v27 }
 0x25e   : > { %vm4600_vm9 = vcmp.le.f32.partialorder %v5244_v2, 0.7853982  ;;  %v2035_v14 = vadd.s32 1, %v4578_v47  ;;  %v2804_v11 = vadd.s32 4294967169, %v2189_v7  ;;  %3033 = vcosq.f32 %v1649_v39 }
 0x25f   : > { %v2802_v22 = vadd.s32 4294967294, %v2149_v8  ;;  %v2032_v33 = vmul.u32 %v4530_v25, %v2016_v55  ;;  %vm2034_vm3 = vc.u32 %v4590_v26, %v4577_v54  ;;  %v4615_v12 = vsel %vm1875_vm12, %v1959_v30, %v4467_v21 }
 0x260   : > { %v2036_v0 = vsel %vm2034_vm3, %v2035_v14, %v4578_v47  ;;  %v2195_v18 = vadd.s32 1, %v2804_v11  ;;  %v1647_v27 = vsub.s32 4, %v4274_v29  ;;  %v1857_v36 = vsel %vm4565_vm8, %v4177_v31, %v1854_v40 }
 0x261   : > { %v1958_v25 = vsel %vm1875_vm12, %v1957_v32, %v1956_v58  ;;  %vm2803_vm14 = vcmp.lt.s32.totalorder %v2802_v22, 0  ;;  %v2037_v10 = vadd.s32 %v2036_v0, %v2032_v33  ;;  %3035 = vsinq.f32 %v1649_v39 }
 0x262   : > { %v2152_v59 = vsel %vm2803_vm14, 0, %v2802_v22  ;;  %v5164_v1 = vand.u32 2147483647, %v4528_v3  ;;  %vm2196_vm2 = vcmp.gt.s32.totalorder %v2195_v18, 0  ;;  %v2137_v21 = vadd.s32 %v4512_v9, %v4519_v4 }
 0x263   : > { %v2153_v47 = vsub.s32 32, %v2152_v59  ;;  %v2157_v48 = vsub.s32 4294967266, %v2152_v59  ;;  %v2038_v24 = vadd.s32 536870912, %v2037_v10  ;;  %3037 = vcosq.f32 %v1857_v36 }
 0x264   : > { %v1961_v30 = vsel %vm4600_vm9, %v4261_v19, %v1958_v25  ;;  %v2197_v39 = vsel %vm2196_vm2, %v2195_v18, 0  ;;  %v1648_v9 = vsel %vm1563_vm1, %v1647_v27, %v4274_v29  ;;  %3039 = vsinq.f32 %v1857_v36 }
 0x265   : > { %v2155_v55 = vshrl.u32 %v2137_v21, %v2153_v47  ;;  %v2158_v7 = vadd.s32 127, %v2157_v48  ;;  %v4633_v2 = vshrl.u32 %v2038_v24, 30  ;;  %v2154_v4 = vshll.u32 %v4558_v56, %v2152_v59 }
 0x266   : > { %v2199_v8 = vand.u32 31, %v2197_v39  ;;  %3041 = vcosq.f32 %v1961_v30  ;;  %v2192_v11 = vand.u32 8388607, %v5164_v1  ;;  %v4643_v33 = vshrl.u32 %v2197_v39, 5 }
 0x267   : > { %v2159_v40 = vshll.u32 %v2158_v7, 23  ;;  %v2040_v14 = vshll.u32 %v4633_v2, 30  ;;  %v2156_v22 = vor.u32 %v2155_v55, %v2154_v4  ;;  %v1650_v29 = vsel %vm4547_vm0, 0, %v1648_v9 }
 0x268   : > { %v2200_v0 = vsub.s32 32, %v2199_v8  ;;  %v2202_v56 = vshll.u32 %v5198_v43, %v2199_v8  ;;  %v2205_v27 = vshll.u32 %v5206_v61, %v2199_v8  ;;  %v2208_v36 = vshll.u32 %v5207_v42, %v2199_v8 }
 0x269   : > { %v4647_v18 = vsub.s32 %v2037_v10, %v2040_v14  ;;  %v2160_v25 = vor.u32 4788187, %v2159_v40  ;;  %v2211_v10 = vshll.u32 %v5186_v23, %v2199_v8  ;;  %v2214_v39 = vshll.u32 %v5188_v57, %v2199_v8 }
 0x26a   : > { %v2203_v59 = vshrl.u32 %v5206_v61, %v2200_v0  ;;  %v2206_v21 = vshrl.u32 %v5207_v42, %v2200_v0  ;;  %v2209_v47 = vshrl.u32 %v5186_v23, %v2200_v0  ;;  %v4655_v48 = vpop.eup %3031  ;;  %v2212_v24 = vshrl.u32 %v5188_v57, %v2200_v0 }
 0x26b   : > { %v2043_v50 = vsub.s32 0, %v4647_v18  ;;  %v4661_v55 = vpop.eup %3033  ;;  %v2215_v61 = vshrl.u32 %v5189_v46, %v2200_v0  ;;  %3043 = vsinq.f32 %v1961_v30  ;;  %v2193_v40 = vor.u32 8388608, %v2192_v11 }
 0x26c   : > { %v2204_v7 = vor.u32 %v2203_v59, %v2202_v56  ;;  %v2207_v9 = vor.u32 %v2206_v21, %v2205_v27  ;;  %v2210_v4 = vor.u32 %v2209_v47, %v2208_v36  ;;  %v2213_v14 = vor.u32 %v2212_v24, %v2211_v10 }
 0x26d   : > { %v2797_v42 = vmin.u32 %v2043_v50, %v4647_v18  ;;  %v2161_v1 = vand.u32 2147483647, %v2160_v25  ;;  %v2216_v32 = vor.u32 %v2215_v61, %v2214_v39  ;;  %vm2217_vm2 = vcmp.lt.s32.totalorder %v4643_v33, 1 }
 0x26e   : > { %v1654_v23 = vadd.s32 3, %v1650_v29  ;;  %v4666_v58 = vpop.eup %3035  ;;  %v2163_v57 = vcvt.s32.f32 %v2156_v22  ;;  %vm2219_vm1 = vcmp.lt.s32.totalorder %v4643_v33, 3  ;;  %vm2220_vm0 = vcmp.lt.s32.totalorder %v4643_v33, 4 }
 0x26f   : > { %v2045_v8 = vclz %v2797_v42  ;;  %v2225_v46 = vsel %vm2217_vm2, %v2204_v7, %v2207_v9  ;;  %v2226_v30 = vsel %vm2220_vm0, %v2213_v14, 920167782  ;;  %v2229_v11 = vsel %vm2217_vm2, %v2207_v9, %v2210_v4 }
 0x270   : > { %v2230_v56 = vsel %vm2220_vm0, %v2216_v32, 1326507024  ;;  %v4675_v27 = vpop.eup %3037  ;;  %v2033_v22 = vadd.s32 %v4577_v54, %v4590_v26  ;;  %v2227_v36 = vsel %vm2219_vm1, %v2210_v4, %v2226_v30  ;;  %v2233_v25 = vshll.u32 %v2193_v40, 8 }
 0x271   : > { %v2798_v29 = vadd.s32 4294967294, %v2045_v8  ;;  %v2164_v59 = vmul.f32 %v2163_v57, %v2161_v1  ;;  %vm2218_vm3 = vcmp.lt.s32.totalorder %v4643_v33, 2  ;;  %v2222_v21 = vsel %vm2220_vm0, %v2210_v4, 2102212464  ;;  %v4684_v50 = vpop.eup %3039 }
 0x272   : > { %v2231_v47 = vsel %vm2219_vm1, %v2213_v14, %v2230_v56  ;;  %v5247_v32 = vand.u32 2147483647, %v4339_v38  ;;  %v2201_v54 = vshrl.u32 %v5198_v43, %v2200_v0  ;;  %v2228_v26 = vsel %vm2218_vm3, %v2225_v46, %v2227_v36 }
 0x273   : > { %vm2799_vm12 = vcmp.lt.s32.totalorder %v2798_v29, 0  ;;  %v2232_v1 = vsel %vm2218_vm3, %v2229_v11, %v2231_v47  ;;  %v4697_v24 = vpop.eup %3041  ;;  %v1855_v42 = vsub.s32 4, %v4367_v37  ;;  %vm1979_vm0 = vcmp.lt.s32.totalorder %v4355_v51, 0 }
 0x274   : > { %vm4688_vm14 = vcmp.le.f32.partialorder %v5247_v32, 0.7853982  ;;  %v2048_v39 = vsel %vm2799_vm12, 0, %v2798_v29  ;;  %v4699_v4 = vmul.u32.u64.low %v2233_v25, %v2232_v1  ;;  %v4700_v61 = vmul.u32.u64.high %v2233_v25, %v2232_v1, %v4699_v4 }
 0x275   : > { %v2049_v40 = vsub.s32 32, %v2048_v39  ;;  %v2053_v14 = vsub.s32 4294967266, %v2048_v39  ;;  %v2221_v43 = vsel %vm2217_vm2, %v2201_v54, %v2204_v7  ;;  %v2223_v0 = vsel %vm2219_vm1, %v2207_v9, %v2222_v21 }
 0x276   : > { %v2165_v57 = vxor.u32 2147483648, %v2164_v59  ;;  %v4708_v8 = vmul.u32.u64.low %v2233_v25, %v2228_v26  ;;  %v4709_v46 = vmul.u32.u64.high %v2233_v25, %v2228_v26, %v4708_v8  ;;  %v1655_v30 = vand.u32 3, %v1654_v23 }
 0x277   : > { %v5250_v11 = vsel %vm4600_vm9, 0, %v4615_v12  ;;  %v2050_v29 = vshll.u32 %v4647_v18, %v2048_v39  ;;  %v2051_v36 = vshrl.u32 %v2033_v22, %v2049_v40  ;;  %v2054_v47 = vadd.s32 127, %v2053_v14 }
 0x278   : > { %v1966_v56 = vadd.s32 3, %v5250_v11  ;;  %v2224_v7 = vsel %vm2218_vm3, %v2221_v43, %v2223_v0  ;;  %v1658_v9 = vxor.u32 2147483648, %v4666_v58  ;;  %v1661_v21 = vxor.u32 2147483648, %v4661_v55  ;;  %v3044_v33 = vpop.eup %3043 }
 0x279   : > { %v1856_v23 = vsel %vm1771_vm5, %v1855_v42, %v4367_v37  ;;  %v5251_v34 = vsub.s32 4, %v4551_v49  ;;  %vm5252_vm9 = vcmp.lt.s32.totalorder %v4339_v38, 0  ;;  %v2052_v18 = vor.u32 %v2051_v36, %v2050_v29 }
 0x27a   : > { %v2055_v22 = vshll.u32 %v2054_v47, 23  ;;  %vm2242_vm2 = vc.u32 %v4700_v61, %v4708_v8  ;;  %vm5253_vm1 = vmmov %vm5252_vm9  ;;  %v2243_v54 = vadd.s32 1, %v4709_v46  ;;  %vm1657_vm12 = vcmp.eq.s32.totalorder %v1655_v30, 0 }
 0x27b   : > { %v2168_v12 = vsel %vm5252_vm9, %v5251_v34, %v4551_v49  ;;  %v2166_v32 = vsel %vm5253_vm1, %v2165_v57, %v2164_v59  ;;  %v2063_v37 = vsub.s32 4, %v4633_v2  ;;  %v2240_v1 = vmul.u32 %v2233_v25, %v2224_v7 }
 0x27c   : > { %v2056_v26 = vor.u32 4788187, %v2055_v22  ;;  %vm1660_vm5 = vcmp.eq.s32.totalorder %v1655_v30, 2  ;;  %v1858_v49 = vsel %vm4565_vm8, 0, %v1856_v23  ;;  %v2170_v39 = vsel %vm4688_vm14, 0, %v2168_v12 }
 0x27d   : > { %v2244_v4 = vsel %vm2242_vm2, %v2243_v54, %v4709_v46  ;;  %v1659_v42 = vsel %vm1657_vm12, %v4661_v55, %v1658_v9  ;;  %v1662_v59 = vsel %vm1660_vm5, %v1661_v21, %v4666_v58  ;;  %v2169_v40 = vsel %vm4688_vm14, %v4339_v38, %v2166_v32 }
 0x27e   : > { %v2057_v14 = vand.u32 2147483647, %v2056_v26  ;;  %v2059_v43 = vcvt.s32.f32 %v2052_v18  ;;  %v2245_v25 = vadd.s32 %v2244_v4, %v2240_v1  ;;  %3045 = vsinq.f32 %v4585_v63 }
 0x27f   : > { %v5254_v5 = vsel %vm4411_vm10, 0, %v4450_v44  ;;  %v2064_v55 = vsel %vm1979_vm0, %v2063_v37, %v4633_v2  ;;  %v1862_v58 = vadd.s32 3, %v1858_v49  ;;  %v5255_v57 = vand.u32 2147483647, %v4355_v51 }
 0x280   : > { %v4750_v0 = vadd.s32 3, %v5254_v5  ;;  %v2060_v46 = vmul.f32 %v2059_v43, %v2057_v14  ;;  %v2246_v11 = vadd.s32 536870912, %v2245_v25  ;;  %vm1656_vm3 = vcmp.lt.s32.totalorder %v1655_v30, 2 }
 0x281   : > { %vm4757_vm8 = vcmp.le.f32.partialorder %v5255_v57, 0.7853982  ;;  %3047 = vsinq.f32 %v2169_v40  ;;  %v4761_v16 = vadd.s32 3, %v2170_v39  ;;  %vm2187_vm10 = vcmp.lt.s32.totalorder %v4528_v3, 0 }
 0x282   : > { %v1663_v44 = vsel %vm1656_vm3, %v1659_v42, %v1662_v59  ;;  %v2061_v63 = vxor.u32 2147483648, %v2060_v46  ;;  %v2247_v29 = vshrl.u32 %v2246_v11, 30  ;;  %v2066_v2 = vsel %vm4757_vm8, 0, %v2064_v55 }
 0x283   : > { %v1967_v36 = vand.u32 3, %v1966_v56  ;;  %vm1653_vm14 = vweird.f32 %v3961_v45  ;;  %v1863_v47 = vand.u32 3, %v1862_v58  ;;  %v1866_v7 = vxor.u32 2147483648, %v4684_v50 }
 0x284   : > { %v1869_v9 = vxor.u32 2147483648, %v4675_v27  ;;  %v1970_v30 = vxor.u32 2147483648, %v3044_v33  ;;  %v2062_v21 = vsel %vm1979_vm0, %v2061_v63, %v2060_v46  ;;  %v5258_v23 = vand.u32 2147483647, %v4528_v3 }
 0x285   : > { %v2248_v12 = vshll.u32 %v2247_v29, 30  ;;  %v1551_v56 = vand.u32 3, %v4457_v13  ;;  %v1973_v18 = vxor.u32 2147483648, %v4697_v24  ;;  %v2065_v22 = vsel %vm4757_vm8, %v4355_v51, %v2062_v21 }
 0x286   : > { %vm4773_vm9 = vcmp.le.f32.partialorder %v5258_v23, 0.7853982  ;;  %v2070_v32 = vadd.s32 3, %v2066_v2  ;;  %v1554_v54 = vxor.u32 2147483648, %v4509_v62  ;;  %v1557_v37 = vxor.u32 2147483648, %v4505_v60 }
 0x287   : > { %3049 = vcosq.f32 %v2065_v22  ;;  %v4784_v26 = vsub.s32 %v2245_v25, %v2248_v12  ;;  %v2271_v1 = vsub.s32 4, %v2247_v29  ;;  %vm1969_vm0 = vcmp.eq.s32.totalorder %v1967_v36, 0 }
 0x288   : > { %3051 = vsinq.f32 %v2065_v22  ;;  %vm1865_vm2 = vcmp.eq.s32.totalorder %v1863_v47, 0  ;;  %v1971_v13 = vsel %vm1969_vm0, %v4697_v24, %v1970_v30  ;;  %vm1972_vm1 = vcmp.eq.s32.totalorder %v1967_v36, 2 }
 0x289   : > { %v2251_v49 = vsub.s32 0, %v4784_v26  ;;  %vm1553_vm12 = vcmp.eq.s32.totalorder %v1551_v56, 0  ;;  %vm1556_vm5 = vcmp.eq.s32.totalorder %v1551_v56, 2  ;;  %v1974_v39 = vsel %vm1972_vm1, %v1973_v18, %v3044_v33 }
 0x28a   : > { %vm1868_vm8 = vcmp.eq.s32.totalorder %v1863_v47, 2  ;;  %v1555_v4 = vsel %vm1553_vm12, %v4505_v60, %v1554_v54  ;;  %v1558_v42 = vsel %vm1556_vm5, %v1557_v37, %v4509_v62  ;;  %vm1968_vm3 = vcmp.lt.s32.totalorder %v1967_v36, 2 }
 0x28b   : > { %v2805_v59 = vmin.u32 %v2251_v49, %v4784_v26  ;;  %v4791_v14 = vand.u32 3, %v2070_v32  ;;  %v2272_v43 = vsel %vm2187_vm10, %v2271_v1, %v2247_v29  ;;  %v1975_v24 = vsel %vm1968_vm3, %v1971_v13, %v1974_v39  ;;  %v4798_v5 = vpop.eup %3045 }
 0x28c   : > { %3053 = vcosq.f32 %v2169_v40  ;;  %v1867_v25 = vsel %vm1865_vm2, %v4675_v27, %v1866_v7  ;;  %v1870_v33 = vsel %vm1868_vm8, %v1869_v9, %v4684_v50  ;;  %vm1552_vm0 = vcmp.lt.s32.totalorder %v1551_v56, 2 }
 0x28d   : > { %v2253_v60 = vclz %v2805_v59  ;;  %v4802_v62 = vsel %vm1653_vm14, nan, %v1663_v44  ;;  %v1559_v55 = vsel %vm1552_vm0, %v1555_v4, %v1558_v42  ;;  %vm1965_vm1 = vweird.f32 %v4261_v19  ;;  %v5265_v42 = vld [vmem:[#allocation32_spill] sm:$0xff] }
 0x28e   : > { %v2241_v58 = vadd.s32 %v4708_v8, %v4700_v61  ;;  %vm1864_vm12 = vcmp.lt.s32.totalorder %v1863_v47, 2  ;;  %v2274_v27 = vsel %vm4773_vm9, 0, %v2272_v43  ;;  %v4809_v40 = vsel %vm1965_vm1, nan, %v1975_v24  ;;  %v4811_v50 = vpop.eup %3047  ;;  %v5266_v43 = vld [vmem:[#allocation11_spill] sm:$0xff] }
 0x28f   : > { %v2806_v57 = vadd.s32 4294967294, %v2253_v60  ;;  %vm2073_vm2 = vcmp.eq.s32.totalorder %v4791_v14, 0  ;;  %v4814_v45 = vsel %vm1864_vm12, %v1867_v25, %v1870_v33  ;;  %vm1549_vm14 = vweird.f32 %v3860_v53 }
 0x290   : > { %vm2072_vm5 = vcmp.lt.s32.totalorder %v4791_v14, 2  ;;  %vm2076_vm8 = vcmp.eq.s32.totalorder %v4791_v14, 2  ;;  %v4819_v19 = vsel %vm1549_vm14, nan, %v1559_v55  ;;  %v4822_v61 = vand.u32 3, %v4750_v0 }
 0x291   : > { %v815_v8 = vsub.s32 4, %v3558_v52  ;;  %vm2807_vm3 = vcmp.lt.s32.totalorder %v2806_v57, 0  ;;  %vm2069_vm0 = vweird.f32 %v4355_v51  ;;  %v4826_v10 = vadd.s32 3, %v2274_v27 }
 0x292   : > { %v2297_v46 = vpack.c.bf16 %v4809_v40, %v4819_v19  ;;  %v1762_v53 = vxor.u32 2147483648, %v4798_v5  ;;  %v2256_v11 = vsel %vm2807_vm3, 0, %v2806_v57  ;;  %v1765_v44 = vxor.u32 2147483648, %v4655_v48 }
 0x293   : > { %vm5261_vm1 = vcmp.lt.s32.totalorder %v3409_v6, 0  ;;  %v1231_v63 = vsub.s32 4, %v3890_v20  ;;  %v2257_v29 = vsub.s32 32, %v2256_v11  ;;  %v2261_v2 = vsub.s32 4294967266, %v2256_v11 }
 0x294   : > { %v816_v0 = vsel %vm5261_vm1, %v815_v8, %v3558_v52  ;;  %v4837_v36 = vand.u32 3, %v4761_v16  ;;  %v2178_v47 = vxor.u32 2147483648, %v4811_v50  ;;  %v3050_v7 = vpop.eup %3049  ;;  %v2258_v9 = vshll.u32 %v4784_v26, %v2256_v11  ;;  %v5264_v26 = vld [vmem:[#allocation33_spill] sm:$0xff] }
 0x295   : > { %v818_v30 = vsel %vm3824_vm7, 0, %v816_v0  ;;  %v826_v21 = vxor.u32 2147483648, %v3999_v17  ;;  %vm5262_vm12 = vcmp.lt.s32.totalorder %v3672_v35, 0  ;;  %v3052_v23 = vpop.eup %3051  ;;  %v2259_v12 = vshrl.u32 %v2241_v58, %v2257_v29 }
 0x296   : > { %v1232_v52 = vsel %vm5262_vm12, %v1231_v63, %v3890_v20  ;;  %v2262_v56 = vadd.s32 127, %v2261_v2  ;;  %v2077_v18 = vxor.u32 2147483648, %v3050_v7  ;;  %v822_v16 = vadd.s32 3, %v818_v30 }
 0x297   : > { %v2074_v22 = vxor.u32 2147483648, %v3052_v23  ;;  %v829_v32 = vxor.u32 2147483648, %v3987_v28  ;;  %v1234_v37 = vsel %vm4181_vm4, 0, %v1232_v52  ;;  %v1242_v15 = vxor.u32 2147483648, %v5264_v26 }
 0x298   : > { %v2260_v1 = vor.u32 %v2259_v12, %v2258_v9  ;;  %v2263_v13 = vshll.u32 %v2262_v56, 23  ;;  %v2078_v49 = vsel %vm2076_vm8, %v2077_v18, %v3052_v23  ;;  %vm2177_vm7 = vcmp.eq.s32.totalorder %v4837_v36, 0  ;;  %v5269_v9 = vld [vmem:[#allocation19_spill] sm:$0xff]  ;;  %v5271_v12 = vld [vmem:[#allocation13_spill] sm:$0xff] }
 0x299   : > { %vm2180_vm14 = vcmp.eq.s32.totalorder %v4837_v36, 2  ;;  %v823_v20 = vand.u32 3, %v822_v16  ;;  %v2075_v39 = vsel %vm2073_vm2, %v3050_v7, %v2074_v22  ;;  %v1238_v4 = vadd.s32 3, %v1234_v37  ;;  %v3054_v25 = vpop.eup %3053  ;;  %v5294_v37 = vld [vmem:[#allocation16_spill] sm:$0xff] }
 0x29a   : > { %v1245_v59 = vxor.u32 2147483648, %v5265_v42  ;;  %v1023_v24 = vsub.s32 4, %v5266_v43  ;;  %v2264_v33 = vor.u32 4788187, %v2263_v13  ;;  %v2267_v60 = vcvt.s32.f32 %v2260_v1  ;;  %v5276_v1 = vld [vmem:[#allocation14_spill] sm:$0xff] }
 0x29b   : > { %v2079_v55 = vsel %vm2072_vm5, %v2075_v39, %v2078_v49  ;;  %vm824_vm4 = vcmp.lt.s32.totalorder %v823_v20, 2  ;;  %vm825_vm8 = vcmp.eq.s32.totalorder %v823_v20, 0  ;;  %vm828_vm3 = vcmp.eq.s32.totalorder %v823_v20, 2  ;;  %v5281_v49 = vld [vmem:[#allocation24_spill] sm:$0xff] }
 0x29c   : > { %v2080_v58 = vsel %vm2069_vm0, nan, %v2079_v55  ;;  %v1239_v27 = vand.u32 3, %v1238_v4  ;;  %v2265_v40 = vand.u32 2147483647, %v2264_v33  ;;  %v827_v19 = vsel %vm825_vm8, %v3987_v28, %v826_v21  ;;  %v5267_v28 = vld [vmem:[#allocation8_spill] sm:$0xff]  ;;  %v5283_v33 = vld [vmem:[#allocation26_spill] sm:$0xff] }
 0x29d   : > { %v2298_v57 = vpack.c.bf16 %v2080_v58, %v4802_v62  ;;  %v830_v8 = vsel %vm828_vm3, %v829_v32, %v3999_v17  ;;  %v2181_v11 = vxor.u32 2147483648, %v3054_v25  ;;  %vm821_vm0 = vweird.f32 %v3409_v6  ;;  %v5273_v32 = vld [vmem:[#allocation12_spill] sm:$0xff] }
 0x29e   : > { %v831_v0 = vsel %vm824_vm4, %v827_v19, %v830_v8  ;;  %vm1241_vm2 = vcmp.eq.s32.totalorder %v1239_v27, 0  ;;  %vm1244_vm1 = vcmp.eq.s32.totalorder %v1239_v27, 2  ;;  %v2268_v14 = vmul.f32 %v2267_v60, %v2265_v40  ;;  %v5284_v60 = vld [vmem:[#allocation25_spill] sm:$0xff]  ;;  %v5288_v8 = vld [vmem:[#allocation6_spill] sm:$0xff] }
 0x29f   : > { %2353 = vmatprep.subr.bf16.mxu0 %v2298_v57  ;;  %vm1240_vm5 = vcmp.lt.s32.totalorder %v1239_v27, 2  ;;  %v1243_v51 = vsel %vm1241_vm2, %v5265_v42, %v1242_v15  ;;  %v1246_v63 = vsel %vm1244_vm1, %v1245_v59, %v5264_v26  ;;  %vm1237_vm12 = vweird.f32 %v3672_v35  ;;  %v5275_v26 = vld [vmem:[#allocation15_spill] sm:$0xff]  ;;  %v5286_v40 = vld [vmem:[#allocation29_spill] sm:$0xff] }
 0x2a0   : > { %2354 = vmatpush1.bf16.msra.mxu0 %v2297_v46  ;;  %v1247_v62 = vsel %vm1240_vm5, %v1243_v51, %v1246_v63  ;;  %vm5268_vm8 = vcmp.lt.s32.totalorder %v5267_v28, 0  ;;  %v2269_v29 = vxor.u32 2147483648, %v2268_v14  ;;  %v832_v2 = vsel %vm821_vm0, nan, %v831_v0 }
 0x2a1   : > { %v1024_v17 = vsel %vm5268_vm8, %v1023_v24, %v5266_v43  ;;  %v1248_v7 = vsel %vm1237_vm12, nan, %v1247_v62  ;;  %v1439_v30 = vsub.s32 4, %v5269_v9  ;;  %v2179_v21 = vsel %vm2177_vm7, %v3054_v25, %v2178_v47 }
 0x2a2   : > { %v2182_v46 = vsel %vm2180_vm14, %v2181_v11, %v4811_v50  ;;  %v2294_v6 = vpack.c.bf16 %v1248_v7, %v832_v2  ;;  %v1026_v35 = vsel %vm3991_vm6, 0, %v1024_v17  ;;  %v2270_v23 = vsel %vm2187_vm10, %v2269_v29, %v2268_v14  ;;  %v5289_v11 = vld [vmem:[#allocation27_spill] sm:$0xff]  ;;  %v5290_v17 = vld [vmem:[#allocation9_spill] sm:$0xff] }
 0x2a3   : > { %vm1761_vm4 = vcmp.eq.s32.totalorder %v4822_v61, 0  ;;  %vm1764_vm3 = vcmp.eq.s32.totalorder %v4822_v61, 2  ;;  %vm5272_vm2 = vcmp.lt.s32.totalorder %v5271_v12, 0  ;;  %v2273_v47 = vsel %vm4773_vm9, %v4528_v3, %v2270_v23  ;;  %v5291_v23 = vld [vmem:[#allocation18_spill] sm:$0xff] }
 0x2a4   : > { %v1440_v56 = vsel %vm5272_vm2, %v1439_v30, %v5269_v9  ;;  %v1763_v50 = vsel %vm1761_vm4, %v4655_v48, %v1762_v53  ;;  %v1766_v18 = vsel %vm1764_vm3, %v1765_v44, %v4798_v5  ;;  %vm2176_vm6 = vcmp.lt.s32.totalorder %v4837_v36, 2  ;;  %2355 = vmatprep.subr.bf16.mxu0 %v2294_v6  ;;  %v5278_v48 = vld [vmem:[#allocation23_spill] sm:$0xff] }
 0x2a5   : > { %3055 = vcosq.f32 %v2273_v47  ;;  %v2183_v16 = vsel %vm2176_vm6, %v2179_v21, %v2182_v46  ;;  %v1030_v22 = vadd.s32 3, %v1026_v35  ;;  %v719_v54 = vand.u32 3, %v5273_v32  ;;  %v5293_v32 = vld [vmem:[#allocation17_spill] sm:$0xff] }
 0x2a6   : > { %3057 = vsinq.f32 %v2273_v47  ;;  %v1442_v34 = vsel %vm4378_vm15, 0, %v1440_v56  ;;  %v722_v15 = vxor.u32 2147483648, %v5275_v26  ;;  %v725_v53 = vxor.u32 2147483648, %v5276_v1  ;;  %v5292_v47 = vld [vmem:[#allocation31_spill] sm:$0xff] }
 0x2a7   : > { %v5279_v5 = vsel %vm4006_vm11, 0, %v5278_v48  ;;  %v5282_v20 = vsel %vm4064_vm13, 0, %v5281_v49  ;;  %vm1861_vm10 = vweird.f32 %v4177_v31  ;;  %vm1760_vm9 = vcmp.lt.s32.totalorder %v4822_v61, 2 }
 0x2a8   : > { %v1134_v44 = vadd.s32 3, %v5279_v5  ;;  %v1342_v39 = vadd.s32 3, %v5282_v20  ;;  %v4914_v4 = vsel %vm1861_vm10, nan, %v4814_v45  ;;  %v4917_v42 = vand.u32 3, %v4826_v10  ;;  %v5285_v10 = vld [vmem:[#allocation36_spill] sm:$0xff] }
 0x2a9   : > { %v4919_v59 = vsel %vm1760_vm9, %v1763_v50, %v1766_v18  ;;  %vm2173_vm11 = vweird.f32 %v4339_v38  ;;  %v1446_v24 = vadd.s32 3, %v1442_v34  ;;  %vm721_vm15 = vcmp.eq.s32.totalorder %v719_v54, 0  ;;  %v5287_v38 = vld [vmem:[#allocation35_spill] sm:$0xff]  ;;  %v2993_v18 = vld [vmem:[%s5096_s3] sm:$0xff]  }
 0x2aa   : > { %v4922_v43 = vsel %vm2173_vm11, nan, %v2183_v16  ;;  %vm724_vm13 = vcmp.eq.s32.totalorder %v719_v54, 2  ;;  %v1031_v25 = vand.u32 3, %v1030_v22  ;;  %v1034_v31 = vxor.u32 2147483648, %v5283_v33 }
 0x2ab   : > { %v723_v61 = vsel %vm721_vm15, %v5276_v1, %v722_v15  ;;  %v726_v45 = vsel %vm724_vm13, %v725_v53, %v5275_v26  ;;  %v1037_v55 = vxor.u32 2147483648, %v5284_v60  ;;  %v1450_v58 = vxor.u32 2147483648, %v5285_v10  ;;  %v5295_v26 = vld [vmem:[#allocation30_spill] sm:$0xff] }
 0x2ac   : > { %v1135_v27 = vand.u32 3, %v1134_v44  ;;  %v1138_v57 = vxor.u32 2147483648, %v5286_v40  ;;  %vm2284_vm7 = vcmp.eq.s32.totalorder %v4917_v42, 2  ;;  %v1453_v19 = vxor.u32 2147483648, %v5287_v38 }
 0x2ad   : > { %vm717_vm14 = vweird.f32 %v5288_v8  ;;  %vm720_vm1 = vcmp.lt.s32.totalorder %v719_v54, 2  ;;  %v1141_v0 = vxor.u32 2147483648, %v5289_v11  ;;  %vm2281_vm5 = vcmp.eq.s32.totalorder %v4917_v42, 0 }
 0x2ae   : > { %v1447_v14 = vand.u32 3, %v1446_v24  ;;  %v727_v51 = vsel %vm720_vm1, %v723_v61, %v726_v45  ;;  %vm1137_vm0 = vcmp.eq.s32.totalorder %v1135_v27, 0  ;;  %vm1140_vm12 = vcmp.eq.s32.totalorder %v1135_v27, 2 }
 0x2af   : > { %vm2280_vm8 = vcmp.lt.s32.totalorder %v4917_v42, 2  ;;  %vm1032_vm4 = vcmp.lt.s32.totalorder %v1031_v25, 2  ;;  %vm1136_vm3 = vcmp.lt.s32.totalorder %v1135_v27, 2  ;;  %v1139_v63 = vsel %vm1137_vm0, %v5289_v11, %v1138_v57 }
 0x2b0   : > { %v1142_v62 = vsel %vm1140_vm12, %v1141_v0, %v5286_v40  ;;  %vm2277_vm2 = vweird.f32 %v4528_v3  ;;  %vm1033_vm6 = vcmp.eq.s32.totalorder %v1031_v25, 0  ;;  %vm1036_vm10 = vcmp.eq.s32.totalorder %v1031_v25, 2 }
 0x2b1   : > { %vm1445_vm9 = vweird.f32 %v5271_v12  ;;  %vm1133_vm11 = vweird.f32 %v5290_v17  ;;  %v1143_v29 = vsel %vm1136_vm3, %v1139_v63, %v1142_v62  ;;  %v1035_v2 = vsel %vm1033_vm6, %v5284_v60, %v1034_v31 }
 0x2b2   : > { %v728_v7 = vsel %vm717_vm14, nan, %v727_v51  ;;  %v1144_v9 = vsel %vm1133_vm11, nan, %v1143_v29  ;;  %v1343_v30 = vand.u32 3, %v1342_v39  ;;  %v1038_v21 = vsel %vm1036_vm10, %v1037_v55, %v5283_v33  ;;  %v3056_v6 = vpop.eup %3055 }
 0x2b3   : > { %vm1449_vm15 = vcmp.eq.s32.totalorder %v1447_v14, 0  ;;  %vm1452_vm13 = vcmp.eq.s32.totalorder %v1447_v14, 2  ;;  %v2293_v46 = vpack.c.bf16 %v1144_v9, %v728_v7  ;;  %v927_v56 = vand.u32 3, %v5291_v23  ;;  %v3058_v16 = vpop.eup %3057 }
 0x2b4   : > { %v1451_v52 = vsel %vm1449_vm15, %v5287_v38, %v1450_v58  ;;  %v1454_v35 = vsel %vm1452_vm13, %v1453_v19, %v5285_v10  ;;  %v1346_v50 = vxor.u32 2147483648, %v5292_v47  ;;  %v2285_v22 = vxor.u32 2147483648, %v3056_v6  ;;  %v5298_v10 = vld [vmem:[#allocation10_spill] sm:$0xff]  ;;  %v4988_v58 = vpop.permute.xlu1 %2322 }
 0x2b5   : > { %2356 = vmatpush1.bf16.msra.mxu0 %v2293_v46  ;;  %v930_v54 = vxor.u32 2147483648, %v5293_v32  ;;  %v933_v34 = vxor.u32 2147483648, %v5294_v37  ;;  %v1349_v15 = vxor.u32 2147483648, %v5295_v26  ;;  %v2282_v1 = vxor.u32 2147483648, %v3058_v16 }
 0x2b6   : > { %vm1448_vm14 = vcmp.lt.s32.totalorder %v1447_v14, 2  ;;  %vm1345_vm1 = vcmp.eq.s32.totalorder %v1343_v30, 0  ;;  %vm1348_vm0 = vcmp.eq.s32.totalorder %v1343_v30, 2  ;;  %v2286_v53 = vsel %vm2284_vm7, %v2285_v22, %v3058_v16 }
 0x2b7   : > { %v1455_v13 = vsel %vm1448_vm14, %v1451_v52, %v1454_v35  ;;  %v1347_v48 = vsel %vm1345_vm1, %v5295_v26, %v1346_v50  ;;  %v1350_v5 = vsel %vm1348_vm0, %v1349_v15, %v5292_v47  ;;  %v2283_v44 = vsel %vm2281_vm5, %v3056_v6, %v2282_v1 }
 0x2b8   : > { %v1039_v36 = vsel %vm1032_vm4, %v1035_v2, %v1038_v21  ;;  %vm929_vm12 = vcmp.eq.s32.totalorder %v927_v56, 0  ;;  %vm932_vm3 = vcmp.eq.s32.totalorder %v927_v56, 2  ;;  %vm5296_vm6 = vcmask 261120   ;;  %v2313_v8 = vpop.permute.xlu1 %2312 }
 0x2b9   : > { %2810 = vmatmul.mubr.msk.bf16.vlgmr.msra.gmra.mxu0 %vm5296_vm6, %v2993_v18  ;;  %v2287_v49 = vsel %vm2280_vm8, %v2283_v44, %v2286_v53  ;;  %v931_v20 = vsel %vm929_vm12, %v5294_v37, %v930_v54  ;;  %v934_v39 = vsel %vm932_vm3, %v933_v34, %v5293_v32  ;;  %vm1344_vm7 = vcmp.lt.s32.totalorder %v1343_v30, 2  ;;  %vm5301_vm11 = vmmov %vm5296_vm6 }
 0x2ba   : > { %v5297_v24 = vmov 0   ;;  %v2288_v33 = vsel %vm2277_vm2, nan, %v2287_v49  ;;  %vm1757_vm5 = vweird.f32 %v3958_v41  ;;  %v1456_v25 = vsel %vm1445_vm9, nan, %v1455_v13  ;;  %v2994_v41 = vld [vmem:[%s5096_s3 + $0x8] sm:$0xff]   ;;  %vm5300_vm9 = vmmov %vm5296_vm6 }
 0x2bb   : > { %2383 = vmatprep.mubr.bf16.mxu0 %v5297_v24  ;;  %v1351_v31 = vsel %vm1344_vm7, %v1347_v48, %v1350_v5  ;;  %v2300_v61 = vpack.c.bf16 %v2288_v33, %v4914_v4  ;;  %v1768_v42 = vsel %vm1757_vm5, nan, %v4919_v59  ;;  %vm1029_vm8 = vweird.f32 %v5267_v28  ;;  %v5299_v4 = vld [vmem:[#allocation7_spill] sm:$0xff]  ;;  %vm5302_vm15 = vmmov %vm5296_vm6 }
 0x2bc   : > { %vm928_vm4 = vcmp.lt.s32.totalorder %v927_v56, 2  ;;  %v2299_v45 = vpack.c.bf16 %v4922_v43, %v1768_v42  ;;  %v1040_v60 = vsel %vm1029_vm8, nan, %v1039_v36  ;;  %vm1341_vm10 = vweird.f32 %v5298_v10  ;;  %v2318_v43 = vpop.permute.xlu0 %2317  ;;  %vm5303_vm13 = vmmov %vm5296_vm6 }
 0x2bd   : > { %v935_v55 = vsel %vm928_vm4, %v931_v20, %v934_v39  ;;  %2406 = vmatprep.subr.bf16.mxu1 %v2300_v61  ;;  %v2296_v3 = vpack.c.bf16 %v1456_v25, %v1040_v60  ;;  %v1352_v12 = vsel %vm1341_vm10, nan, %v1351_v31  ;;  %vm925_vm2 = vweird.f32 %v5299_v4  ;;  %vm5304_vm14 = vmmov %vm5296_vm6 }
 0x2be   : > { %2407 = vmatpush1.bf16.msra.mxu1 %v2299_v45  ;;  %v936_v59 = vsel %vm925_vm2, nan, %v935_v55 }
 0x2bf   : > { %2408 = vmatprep.subr.bf16.mxu1 %v2296_v3  ;;  %v2295_v28 = vpack.c.bf16 %v1352_v12, %v936_v59 }
 0x2c0   : > { %v2308_v57 = vpop.permute.xlu0 %2307 }
 0x2c1   : > { %2811 = vmatmul.mubr.msk.bf16.gmra.mxu0 %vm5300_vm9, %v2994_v41 }
 0x2c2   : > { %2573 = vmatprep.mubr.bf16.mxu0 %v5297_v24  ;;  %2409 = vmatpush1.bf16.msra.mxu1 %v2295_v28 }
 0x2c5   : > { %2812 = vmatmul.mubr.msk.bf16.vlgmr.msra.gmra.mxu1 %vm5301_vm11, %v2993_v18 }
 0x2c6   : > { %2436 = vmatprep.mubr.bf16.mxu1 %v5297_v24 }
 0x2cd   : > { %2813 = vmatmul.mubr.msk.bf16.gmra.mxu1 %vm5302_vm15, %v2994_v41 }
 0x2ce   : > { %2614 = vmatprep.mubr.bf16.mxu1 %v5297_v24 }
 0x379   : > { %v2375_v27 = vpop.f32.mrf.mxu0 }
 0x37a   : > { %v5000_v29 = vadd.f32 %v2375_v27, %v2308_v57 }
 0x37b   : > { %v2377_v40 = vpop.f32.mrf.mxu0 }
 0x37c   : > { %v4990_v38 = vadd.f32 %v2377_v40, %v2308_v57  ;;  %v2447_v35 = vmul.f32 0.5, %v5000_v29 }
 0x37d   : > { %v2379_v19 = vpop.f32.mrf.mxu0 }
 0x37e   : > { %v2448_v14 = vmul.f32 0.5, %v4990_v38  ;;  %v4995_v51 = vadd.f32 %v2379_v19, %v2313_v8 }
 0x37f   : > { %v2381_v11 = vpop.f32.mrf.mxu0 }
 0x380   : > { %v4992_v0 = vadd.f32 %v2381_v11, %v2313_v8  ;;  %3059 = vtanh.f32 %v2448_v14  ;;  %v2451_v30 = vmul.f32 0.5, %v4995_v51 }
 0x381   : > { %v2385_v63 = vpop.f32.mrf.mxu0 }
 0x382   : > { %v2452_v62 = vmul.f32 0.5, %v4992_v0  ;;  %v4998_v17 = vadd.f32 %v2385_v63, %v2318_v43 }
 0x383   : > { %v2387_v2 = vpop.f32.mrf.mxu0 }
 0x384   : > { %v2455_v7 = vmul.f32 0.5, %v4998_v17  ;;  %v5003_v9 = vadd.f32 %v2387_v2, %v2318_v43  ;;  %3061 = vtanh.f32 %v2452_v62 }
 0x385   : > { %v2389_v21 = vpop.f32.mrf.mxu0  ;;  %v2428_v46 = vpop.f32.mrf.mxu1 }
 0x386   : > { %v2456_v6 = vmul.f32 0.5, %v5003_v9  ;;  %v5008_v52 = vadd.f32 %v2389_v21, %v4988_v58  ;;  %3063 = vtanh.f32 %v2455_v7  ;;  %v5023_v53 = vadd.f32 %v2428_v46, %v2308_v57 }
 0x387   : > { %v2391_v23 = vpop.f32.mrf.mxu0  ;;  %v2430_v56 = vpop.f32.mrf.mxu1 }
 0x388   : > { %3065 = vtanh.f32 %v2456_v6  ;;  %v2459_v47 = vmul.f32 0.5, %v5008_v52  ;;  %v2392_v50 = vadd.f32 %v2391_v23, %v4988_v58  ;;  %v5013_v18 = vadd.f32 %v2430_v56, %v2308_v57 }
 0x389   : > { %3067 = vtanh.f32 %v2451_v30  ;;  %v2432_v16 = vpop.f32.mrf.mxu1  ;;  %v2449_v25 = vmul.f32 0.5, %v5023_v53 }
 0x38a   : > { %3069 = vtanh.f32 %v2459_v47  ;;  %v2460_v22 = vmul.f32 0.5, %v2392_v50  ;;  %v2450_v37 = vmul.f32 0.5, %v5013_v18  ;;  %v5018_v34 = vadd.f32 %v2432_v16, %v2313_v8 }
 0x38b   : > { %3071 = vtanh.f32 %v2447_v35  ;;  %v2434_v32 = vpop.f32.mrf.mxu1 }
 0x38c   : > { %3073 = vtanh.f32 %v2460_v22  ;;  %v5015_v54 = vadd.f32 %v2434_v32, %v2313_v8  ;;  %v2453_v36 = vmul.f32 0.5, %v5018_v34 }
 0x38d   : > { %v2438_v26 = vpop.f32.mrf.mxu1  ;;  %v3060_v44 = vpop.eup %3059  ;;  %3075 = vtanh.f32 %v2450_v37 }
 0x38e   : > { %v2454_v15 = vmul.f32 0.5, %v5015_v54  ;;  %v5021_v1 = vadd.f32 %v2438_v26, %v2318_v43  ;;  %v2480_v59 = vmul.f32 0.5, %v3060_v44 }
 0x38f   : > { %v2440_v13 = vpop.f32.mrf.mxu1 }
 0x390   : > { %v2457_v48 = vmul.f32 0.5, %v5021_v1  ;;  %v5026_v5 = vadd.f32 %v2440_v13, %v2318_v43  ;;  %3077 = vtanh.f32 %v2454_v15  ;;  %v2496_v14 = vadd.f32 0.5, %v2480_v59 }
 0x391   : > { %v2442_v49 = vpop.f32.mrf.mxu1  ;;  %v3062_v20 = vpop.eup %3061 }
 0x392   : > { %v2458_v39 = vmul.f32 0.5, %v5026_v5  ;;  %v5031_v24 = vadd.f32 %v2442_v49, %v4988_v58  ;;  %3079 = vtanh.f32 %v2457_v48  ;;  %v2484_v55 = vmul.f32 0.5, %v3062_v20 }
 0x393   : > { %v3064_v33 = vpop.eup %3063  ;;  %v2444_v31 = vpop.f32.mrf.mxu1  ;;  %v2512_v56 = vmul.f32 %v2496_v14, %v4990_v38 }
 0x394   : > { %3081 = vtanh.f32 %v2458_v39  ;;  %v2461_v42 = vmul.f32 0.5, %v5031_v24  ;;  %v5036_v45 = vadd.f32 %v2444_v31, %v4988_v58  ;;  %v2487_v3 = vmul.f32 0.5, %v3064_v33 }
 0x395   : > { %v3066_v61 = vpop.eup %3065  ;;  %3083 = vtanh.f32 %v2453_v36  ;;  %v2500_v40 = vadd.f32 0.5, %v2484_v55 }
 0x396   : > { %v3068_v60 = vpop.eup %3067  ;;  %v2488_v10 = vmul.f32 0.5, %v3066_v61  ;;  %3085 = vtanh.f32 %v2461_v42  ;;  %v2462_v12 = vmul.f32 0.5, %v5036_v45  ;;  %v2503_v11 = vadd.f32 0.5, %v2487_v3 }
 0x397   : > { %v3070_v41 = vpop.eup %3069  ;;  %3087 = vtanh.f32 %v2449_v25  ;;  %v2483_v27 = vmul.f32 0.5, %v3068_v60  ;;  %v2516_v7 = vmul.f32 %v2500_v40, %v4992_v0 }
 0x398   : > { %v3072_v4 = vpop.eup %3071  ;;  %v2491_v28 = vmul.f32 0.5, %v3070_v41  ;;  %3089 = vtanh.f32 %v2462_v12  ;;  %v2504_v57 = vadd.f32 0.5, %v2488_v10  ;;  %v2519_v35 = vmul.f32 %v2503_v11, %v4998_v17 }
 0x399   : > { %v3074_v43 = vpop.eup %3073  ;;  %v2479_v8 = vmul.f32 0.5, %v3072_v4  ;;  %v2499_v62 = vadd.f32 0.5, %v2483_v27 }
 0x39a   : > { %v2507_v58 = vadd.f32 0.5, %v2491_v28  ;;  %v2492_v19 = vmul.f32 0.5, %v3074_v43  ;;  %v2520_v30 = vmul.f32 %v2504_v57, %v5003_v9  ;;  %v3076_v46 = vpop.eup %3075 }
 0x39b   : > { %v2495_v6 = vadd.f32 0.5, %v2479_v8  ;;  %v2515_v22 = vmul.f32 %v2499_v62, %v4995_v51  ;;  %v2482_v48 = vmul.f32 0.5, %v3076_v46 }
 0x39c   : > { %v2508_v63 = vadd.f32 0.5, %v2492_v19  ;;  %v2523_v2 = vmul.f32 %v2507_v58, %v5008_v52  ;;  %v2529_v52 = vpack.c.bf16 %v2516_v7, %v2512_v56  ;;  %v2632_v58 = vlaneseq }
 0x39d   : > { %v3078_v23 = vpop.eup %3077  ;;  %v2511_v0 = vmul.f32 %v2495_v6, %v5000_v29  ;;  %v2527_v29 = vld [vmem:[%s5098_s5] sm:$0x1]  ;;  %v2498_v61 = vadd.f32 0.5, %v2482_v48  ;;  %v2537_v19 = vstv %s2536_s16 }
 0x39e   : > { %v2524_v21 = vmul.f32 %v2508_v63, %v2392_v50  ;;  %v2532_v32 = vpack.c.bf16 %v2523_v2, %v2519_v35  ;;  %v2486_v9 = vmul.f32 0.5, %v3078_v23  ;;  %v2633_v14 = vshrl.u32 %v2632_v58, 7 }
 0x39f   : > { %v3080_v16 = vpop.eup %3079  ;;  %v2528_v38 = vpack.c.bf16 %v2515_v22, %v2511_v0  ;;  %v2514_v59 = vmul.f32 %v2498_v61, %v5013_v18  ;;  %v3160_v18 = vmov 1966171168   ;;  %vm2654_vm1 = vcmp.lt.s32.totalorder %v2632_v58, 512 }
 0x3a0   : > { %v2533_v47 = vpack.c.bf16 %v2524_v21, %v2520_v30  ;;  %v2489_v13 = vmul.f32 0.5, %v3080_v16  ;;  %v2502_v51 = vadd.f32 0.5, %v2486_v9  ;;  %v2630_v57 = vunpack.c.l.s4 %v3160_v18 }
 0x3a1   : > { %v3082_v37 = vpop.eup %3081 }
 0x3a2   : > { %2553 = vmatprep.subr.bf16.mxu0 %v2533_v47  ;;  %v3084_v26 = vpop.eup %3083  ;;  %v2490_v50 = vmul.f32 0.5, %v3082_v37  ;;  %v2505_v31 = vadd.f32 0.5, %v2489_v13  ;;  %v2518_v10 = vmul.f32 %v2502_v51, %v5015_v54  ;;  %v2631_v11 = vunpack.c.0.s8 %v2630_v57 }
 0x3a3   : > { %2554 = vmatpush1.bf16.msra.mxu0 %v2532_v32  ;;  %v3086_v15 = vpop.eup %3085  ;;  %v2485_v49 = vmul.f32 0.5, %v3084_v26 }
 0x3a4   : > { %2555 = vmatprep.subr.bf16.mxu0 %v2529_v52  ;;  %v3088_v17 = vpop.eup %3087  ;;  %v2493_v44 = vmul.f32 0.5, %v3086_v15  ;;  %v2506_v20 = vadd.f32 0.5, %v2490_v50  ;;  %v2521_v4 = vmul.f32 %v2505_v31, %v5021_v1  ;;  %v2531_v40 = vpack.c.bf16 %v2518_v10, %v2514_v59 }
 0x3a5   : > { %v3090_v36 = vpop.eup %3089  ;;  %v2481_v25 = vmul.f32 0.5, %v3088_v17  ;;  %v2501_v60 = vadd.f32 0.5, %v2485_v49  ;;  %v2634_v2 = vsub.s32 %v2631_v11, %v2633_v14 }
 0x3a6   : > { %v2509_v39 = vadd.f32 0.5, %v2493_v44  ;;  %v2494_v33 = vmul.f32 0.5, %v3090_v36  ;;  %v2522_v41 = vmul.f32 %v2506_v20, %v5026_v5 }
 0x3a7   : > { %2556 = vmatpush1.bf16.msra.mxu0 %v2528_v38  ;;  %v2497_v12 = vadd.f32 0.5, %v2481_v25  ;;  %v2517_v43 = vmul.f32 %v2501_v60, %v5018_v34 }
 0x3a8   : > { %v2510_v42 = vadd.f32 0.5, %v2494_v33  ;;  %v2525_v55 = vmul.f32 %v2509_v39, %v5031_v24 }
 0x3a9   : > { %v2513_v24 = vmul.f32 %v2497_v12, %v5023_v53 }
 0x3aa   : > { %2814 = vmatmul.mubr.msk.bf16.vlgmr.msra.gmra.mxu0 %vm5303_vm13, %v2527_v29  ;;  %v2526_v3 = vmul.f32 %v2510_v42, %v5036_v45  ;;  %v2534_v27 = vpack.c.bf16 %v2525_v55, %v2521_v4 }
 0x3ab   : > { %v2530_v54 = vpack.c.bf16 %v2517_v43, %v2513_v24 }
 0x3ac   : > { %v2535_v28 = vpack.c.bf16 %v2526_v3, %v2522_v41 }
 0x3ae   : > { %2594 = vmatprep.subr.bf16.mxu1 %v2535_v28 }
 0x3af   : > { %2595 = vmatpush1.bf16.msra.mxu1 %v2534_v27 }
 0x3b0   : > { %2596 = vmatprep.subr.bf16.mxu1 %v2531_v40 }
 0x3b3   : > { %2597 = vmatpush1.bf16.msra.mxu1 %v2530_v54 }
 0x3b6   : > { %2815 = vmatmul.mubr.msk.bf16.vlgmr.msra.gmra.mxu1 %vm5304_vm14, %v2527_v29 }
 0x46a   : > { %v2575_v5 = vpop.f32.mrf.mxu0 }
 0x46b   : > { %v2576_v53 = vadd.f32 %v2575_v5, %v2537_v19 }
 0x46c   : > { %v2577_v1 = vpop.f32.mrf.mxu0 }
 0x46d   : > { %v2578_v8 = vadd.f32 %v2577_v1, %v2537_v19 }
 0x46e   : > { %v2579_v45 = vpop.f32.mrf.mxu0 }
 0x46f   : > { %v2627_v62 = vcombine.low %v2576_v53, %v2578_v8 }
 0x470   : > { %v2580_v34 = vpop.f32.mrf.mxu0 }
 0x471   : > { %v2635_v6 = vrot.slane %v2627_v62, %v2634_v2 }
 0x476   : > { %v2616_v63 = vpop.f32.mrf.mxu1 }
 0x477   : > { %v2617_v30 = vadd.f32 %v2616_v63, %v2537_v19 }
 0x478   : > { %v2618_v7 = vpop.f32.mrf.mxu1 }
 0x479   : > { %v2619_v21 = vadd.f32 %v2618_v7, %v2537_v19 }
 0x47a   : > { %v2620_v46 = vpop.f32.mrf.mxu1 }
 0x47b   : > { %v2628_v35 = vcombine.low %v2617_v30, %v2619_v21 }
 0x47c   : > { %v2621_v23 = vpop.f32.mrf.mxu1 }
 0x47d   : > { %v2642_v56 = vrot.slane %v2628_v35, %v2634_v2 }
 0x47f   : > { %v2643_v47 = vcombine.low %v2635_v6, %v2642_v56 }
 0x481   : > { %v2650_v16 = vrot.slane %v2643_v47, %v2634_v2 }
 0x483   : > { %2656 = vst.msk [vmem:[%s273_s19] sm:$0xf] %vm2654_vm1, %v2650_v16 }
 0x484   : > { %3104 = shalt.err (!%p3101_p3)
}
 0x485   : > { %s3105_s10 = scalar_lea.hbm %s2670_s23, 64  ;;  %s3109_s16 = scalar_lea.hbm %s5100_s7, 128 }
 0x486   : > { %p3106_p4 = scmp.ne.s32.totalorder %s2670_s23, %s3105_s10  ;;  %p3110_p9 = scmp.lt.s32.totalorder %s2670_s23, %s5100_s7 }
 0x487   : > { %p3111_p10 = scmp.lt.s32.totalorder %s3109_s16, %s3105_s10 }
 0x488   : > { %p3107_p7 = pnand %p3106_p4, %p3240_p5 }
 0x489   : > { %p3112_p11 = por %p3111_p10, %p3110_p9 }
 0x48a   : > { %p3108_p8 = pneg %p3107_p7 }
 0x48c   : > { %p3113_p12 = pnand %p3112_p11, %p3108_p8 }
 0x48e   : > { %3116 = shalt.err (!%p3113_p12)
}
 0x48f   : > { %2942 = dma.vmem_to_hbm [thread:$0]  (%p3240_p5), %s2673_s20, 64, %s2670_s23, %s2658_s24  }
 0x490 PF: > { %p2948_p13 = scmp.ge.s32.totalorder %s3151_s29, 2  ;;  %s2684_s19 = sand.u32 1, %s3139_s26  }
 0x491   : > { %s2685_s21 = scalar_lea.sflag [#allocation4], %s2684_s19 }
 0x492   : > { %p2945_p0 = pnand %p2948_p13, %p3244_p6 }
 0x494   : > { %p2946_p1 = pneg %p2945_p0 }
 0x496   : > { %3134 = dma.done.wait (%p2946_p1), %s2685_s21, 64  }
 0x497   : > { %3136 = vsyncadd (%p2946_p1), %s2685_s21, 4294967232  ;;  %p18_p2 = scmp.ge.s32.totalorder %s3228_s8, 4   ;;  %s5305_s26 = smov %s3143_s27 }
 0x498   : > { %s5306_s27 = smov %s3147_s28  ;;  %s5307_s28 = smov %s3238_s11 }
 0x499   : > { %s5308_s29 = smov %s3228_s8  ;;  %20 = sbr.rel (!%p18_p2) target bundleno = 5 (0x5), region = 83 }
 0x49e   :  { %2690 = vsyncpa [#allocation4], 1 }
 0x49f   :  { %2692 = vsyncpa [#allocation4 + $0x1], 1 }

</bundles_post_ra>
